<compile_context>
chip_gen: v5e
topology: v5e:2x2
jax: 0.10.0
libtpu: 0.0.40
codegen_flags: <defaults>
</compile_context>

<pallas_src>
import jax
import jax.numpy as jnp
from jax.experimental import pallas as pl
from jax.experimental.pallas import tpu as pltpu


def _round_up(v, m):
    return (v + m - 1) // m * m


def _pad_gate_cols(w, H, Hp):
    """(R, 4H) -> (R, 4Hp): each gate block re-placed at a 128-aligned offset."""
    R = w.shape[0]
    out = jnp.zeros((R, 4 * Hp), w.dtype)
    for k in range(4):
        out = out.at[:, k * Hp:k * Hp + H].set(w[:, k * H:(k + 1) * H])
    return out


def lstm_fc_kernel(x_ref, wih_ref, whh_ref, b_ref, fcw_ref, fcb_ref,
                   out_ref, gx_ref):
    """One grid step = one independent batch chunk; full time loop in-kernel."""
    BC, T, Dp = x_ref.shape
    Hp = whh_ref.shape[0]

    # ---- Phase 1: hoisted, time-parallel input projection for ALL timesteps.
    # One MXU-friendly (BC*T, Dp) @ (Dp, 4Hp) matmul; bias folded in once.
    x2d = x_ref[...].reshape(BC * T, Dp)
    gx = jnp.dot(x2d, wih_ref[...],
                 preferred_element_type=jnp.float32) + b_ref[...]
    gx = gx.reshape(BC, T, 4 * Hp)
    # Stage time-major in VMEM so the recurrence dynamic-indexes the leading
    # axis (cheap, well-supported); static unrolled stores, T is small.
    for t in range(T):
        gx_ref[t] = gx[:, t, :]

    # ---- Phase 2: serial recurrence. Per step: h @ W_hh + gates_x[t] only.
    w_hh = whh_ref[...]          # hoisted out of the loop (no re-load per iter)

    def step(t, carry):
        h, c = carry
        gates = gx_ref[t] + jnp.dot(h.astype(w_hh.dtype), w_hh,
                                    preferred_element_type=jnp.float32)
        # Hp is a multiple of 128 -> every gate slice is a whole-vreg,
        # lane-dense 128-aligned block (no sub-lane extracts).
        i_g = jax.nn.sigmoid(gates[:, 0 * Hp:1 * Hp])
        f_g = jax.nn.sigmoid(gates[:, 1 * Hp:2 * Hp])
        g_g = jnp.tanh(gates[:, 2 * Hp:3 * Hp])
        o_g = jax.nn.sigmoid(gates[:, 3 * Hp:4 * Hp])
        c_new = f_g * c + i_g * g_g
        h_new = o_g * jnp.tanh(c_new)
        return h_new, c_new

    h0 = jnp.zeros((BC, Hp), jnp.float32)
    c0 = jnp.zeros((BC, Hp), jnp.float32)
    h_n, _ = jax.lax.fori_loop(0, T, step, (h0, c0), unroll=True)

    # ---- fc head on the last hidden state; output width padded to 128 lanes
    # so the store is unmasked / lane-dense.
    out_ref[...] = (jnp.dot(h_n.astype(fcw_ref.dtype), fcw_ref[...],
                            preferred_element_type=jnp.float32)
                    + fcb_ref[...])


def lstm_classifier_forward(x, params, *, matmul_dtype=jnp.float32):
    """x: (B, T, D) float32, batch_first like the PyTorch module.

    matmul_dtype=jnp.bfloat16 is recommended on v6e/v7x (f32 accumulation and
    f32 gate math are kept either way); default f32 for exact comparison here.
    """
    B, T, D = x.shape
    H = params["w_hh"].shape[0]
    O = params["fc_w"].shape[1]

    # Padded, lane/sublane-aligned sizes.
    Bp = _round_up(max(B, 8), 8)
    BC = min(Bp, 128)                 # batch chunk per grid step
    Bp = _round_up(Bp, BC)
    Dp = _round_up(D, 128)
    Hp = _round_up(H, 128)
    Op = _round_up(O, 128)
    n_chunks = Bp // BC

    f32 = jnp.float32
    xp = jnp.zeros((Bp, T, Dp), f32).at[:B, :, :D].set(x).astype(matmul_dtype)
    w_ih = (jnp.zeros((Dp, 4 * Hp), f32)
            .at[:D].set(_pad_gate_cols(params["w_ih"], H, Hp))
            .astype(matmul_dtype))
    w_hh = (jnp.zeros((Hp, 4 * Hp), f32)
            .at[:H].set(_pad_gate_cols(params["w_hh"], H, Hp))
            .astype(matmul_dtype))
    b = _pad_gate_cols(params["b"], H, Hp)                       # (1, 4Hp) f32
    fc_w = (jnp.zeros((Hp, Op), f32)
            .at[:H, :O].set(params["fc_w"]).astype(matmul_dtype))
    fc_b = jnp.zeros((1, Op), f32).at[:, :O].set(params["fc_b"])

    out = pl.pallas_call(
        lstm_fc_kernel,
        out_shape=jax.ShapeDtypeStruct((Bp, Op), jnp.float32),
        grid_spec=pltpu.PrefetchScalarGridSpec(
            num_scalar_prefetch=0,
            grid=(n_chunks,),
            in_specs=[
                pl.BlockSpec((BC, T, Dp), lambda bi: (bi, 0, 0)),   # x chunk
                pl.BlockSpec((Dp, 4 * Hp), lambda bi: (0, 0)),      # W_ih^T
                pl.BlockSpec((Hp, 4 * Hp), lambda bi: (0, 0)),      # W_hh^T
                pl.BlockSpec((1, 4 * Hp), lambda bi: (0, 0)),       # b_ih+b_hh
                pl.BlockSpec((Hp, Op), lambda bi: (0, 0)),          # fc W^T
                pl.BlockSpec((1, Op), lambda bi: (0, 0)),           # fc b
            ],
            out_specs=pl.BlockSpec((BC, Op), lambda bi: (bi, 0)),
            scratch_shapes=[
                pltpu.VMEM((T, BC, 4 * Hp), jnp.float32),   # staged gates_x
            ],
        ),
        compiler_params=pltpu.CompilerParams(
            dimension_semantics=("parallel",)),   # batch chunks independent
    )(xp, w_ih, w_hh, b, fc_w, fc_b)

    return out[:B, :O]


def init_params(key, input_dim, hidden_dim, output_dim):
    """Deterministic init; same shapes as nn.LSTM / nn.Linear (stored transposed)."""
    k = jax.random.split(key, 6)
    s = 1.0 / jnp.sqrt(hidden_dim)
    # PyTorch: weight_ih_l0 (4H, D), weight_hh_l0 (4H, H), bias_ih/hh (4H,)
    # stored here pre-transposed for right-multiplication, biases summed.
    w_ih = jax.random.uniform(k[0], (input_dim, 4 * hidden_dim), jnp.float32, -s, s)
    w_hh = jax.random.uniform(k[1], (hidden_dim, 4 * hidden_dim), jnp.float32, -s, s)
    b_ih = jax.random.uniform(k[2], (4 * hidden_dim,), jnp.float32, -s, s)
    b_hh = jax.random.uniform(k[3], (4 * hidden_dim,), jnp.float32, -s, s)
    fc_w = jax.random.uniform(k[4], (hidden_dim, output_dim), jnp.float32, -s, s)
    fc_b = jax.random.uniform(k[5], (output_dim,), jnp.float32, -s, s)
    return {
        "w_ih": w_ih,
        "w_hh": w_hh,
        "b": (b_ih + b_hh).reshape(1, 4 * hidden_dim),
        "fc_w": fc_w,
        "fc_b": fc_b.reshape(1, output_dim),
    }


def reference_forward(x, params, hidden_dim):
    """Pure-JAX reference matching PyTorch LSTM gate math (i, f, g, o order)."""
    B = x.shape[0]
    H = hidden_dim

    def step(carry, x_t):
        h, c = carry
        gates = x_t @ params["w_ih"] + h @ params["w_hh"] + params["b"]
        i = jax.nn.sigmoid(gates[:, 0 * H:1 * H])
        f = jax.nn.sigmoid(gates[:, 1 * H:2 * H])
        g = jnp.tanh(gates[:, 2 * H:3 * H])
        o = jax.nn.sigmoid(gates[:, 3 * H:4 * H])
        c = f * c + i * g
        h = o * jnp.tanh(c)
        return (h, c), None

    h0 = jnp.zeros((B, H), jnp.float32)
    c0 = jnp.zeros((B, H), jnp.float32)
    (h_n, _), _ = jax.lax.scan(step, (h0, c0), jnp.transpose(x, (1, 0, 2)))
    return h_n @ params["fc_w"] + params["fc_b"]


if __name__ == "__main__":
    B, T, D, H, O = 2, 8, 16, 32, 8

    key = jax.random.PRNGKey(0)
    k_x, k_p = jax.random.split(key)
    x = jax.random.normal(k_x, (B, T, D), jnp.float32)
    params = init_params(k_p, D, H, O)

    out = lstm_classifier_forward(x, params)
    out = jax.block_until_ready(out)

    ref = reference_forward(x, params, H)
    assert out.shape == (B, O)
    err = float(jnp.max(jnp.abs(out - ref)))
    assert jnp.allclose(out, ref, atol=1e-4, rtol=1e-4), (
        f"mismatch: max abs err {err}")

    print("KERNEL_OK")
</pallas_src>

<mosaic_0001>
module attributes {stable_mosaic.version = 11 : i64} {
  func.func @lstm_fc_kernel(%arg0: i32, %arg1: memref<8x8x128xf32, #tpu.memory_space<vmem>>, %arg2: memref<128x512xf32, #tpu.memory_space<vmem>>, %arg3: memref<128x512xf32, #tpu.memory_space<vmem>>, %arg4: memref<1x512xf32, #tpu.memory_space<vmem>>, %arg5: memref<128x128xf32, #tpu.memory_space<vmem>>, %arg6: memref<1x128xf32, #tpu.memory_space<vmem>>, %arg7: memref<8x128xf32, #tpu.memory_space<vmem>>, %arg8: memref<8x8x512xf32, #tpu.memory_space<vmem>>) attributes {dimension_semantics = [#tpu.dimension_semantics<parallel>], iteration_bounds = array<i64: 1>, scalar_prefetch = 0 : i64, scratch_operands = 1 : i64, tpu.core_type = #tpu.core_type<tc>, window_params = [{transform_indices = @transform_0, window_bounds = array<i64: 8, 8, 128>}, {pipeline_mode = #tpu.pipeline_mode<synchronous>, transform_indices = @transform_1, window_bounds = array<i64: 128, 512>}, {pipeline_mode = #tpu.pipeline_mode<synchronous>, transform_indices = @transform_2, window_bounds = array<i64: 128, 512>}, {pipeline_mode = #tpu.pipeline_mode<synchronous>, transform_indices = @transform_3, window_bounds = array<i64: 1, 512>}, {pipeline_mode = #tpu.pipeline_mode<synchronous>, transform_indices = @transform_4, window_bounds = array<i64: 128, 128>}, {pipeline_mode = #tpu.pipeline_mode<synchronous>, transform_indices = @transform_5, window_bounds = array<i64: 1, 128>}, {transform_indices = @transform_6, window_bounds = array<i64: 8, 128>}]} {
    %c0 = arith.constant 0 : index
    %c0_0 = arith.constant 0 : index
    %c0_1 = arith.constant 0 : index
    %0 = vector.load %arg1[%c0, %c0_0, %c0_1] : memref<8x8x128xf32, #tpu.memory_space<vmem>>, vector<8x8x128xf32>
    %1 = vector.shape_cast %0 : vector<8x8x128xf32> to vector<64x128xf32>
    %c0_2 = arith.constant 0 : index
    %c0_3 = arith.constant 0 : index
    %2 = vector.load %arg2[%c0_2, %c0_3] : memref<128x512xf32, #tpu.memory_space<vmem>>, vector<128x512xf32>
    %cst = arith.constant dense<0.000000e+00> : vector<64x512xf32>
    %3 = tpu.matmul %1, %2, %cst {dimension_numbers = #tpu.dot_dimension_numbers<[1], [0], [0], [1], [0, 0, 1, 1], [], []>} : vector<64x128xf32>, vector<128x512xf32>, vector<64x512xf32> -> vector<64x512xf32>
    %c0_4 = arith.constant 0 : index
    %c0_5 = arith.constant 0 : index
    %4 = vector.load %arg4[%c0_4, %c0_5] : memref<1x512xf32, #tpu.memory_space<vmem>>, vector<1x512xf32>
    %5 = vector.broadcast %4 : vector<1x512xf32> to vector<64x512xf32>
    %6 = arith.addf %3, %5 : vector<64x512xf32>
    %7 = vector.shape_cast %6 : vector<64x512xf32> to vector<8x8x512xf32>
    %8 = vector.extract_strided_slice %7 {offsets = [0, 0, 0], sizes = [8, 1, 512], strides = [1, 1, 1]} : vector<8x8x512xf32> to vector<8x1x512xf32>
    %9 = vector.shape_cast %8 : vector<8x1x512xf32> to vector<8x512xf32>
    %c0_6 = arith.constant 0 : index
    %c0_7 = arith.constant 0 : index
    %c0_8 = arith.constant 0 : index
    %10 = vector.load %arg8[%c0_6, %c0_7, %c0_8] : memref<8x8x512xf32, #tpu.memory_space<vmem>>, vector<1x8x512xf32>
    %11 = vector.shape_cast %10 : vector<1x8x512xf32> to vector<8x512xf32>
    %12 = vector.shape_cast %9 : vector<8x512xf32> to vector<1x8x512xf32>
    tpu.vector_store %arg8[%c0_6, %c0_7, %c0_8], %12 {strides = array<i32>} : memref<8x8x512xf32, #tpu.memory_space<vmem>>, vector<1x8x512xf32>,
    %13 = vector.extract_strided_slice %7 {offsets = [0, 1, 0], sizes = [8, 1, 512], strides = [1, 1, 1]} : vector<8x8x512xf32> to vector<8x1x512xf32>
    %14 = vector.shape_cast %13 : vector<8x1x512xf32> to vector<8x512xf32>
    %c1 = arith.constant 1 : index
    %c0_9 = arith.constant 0 : index
    %c0_10 = arith.constant 0 : index
    %15 = vector.load %arg8[%c1, %c0_9, %c0_10] : memref<8x8x512xf32, #tpu.memory_space<vmem>>, vector<1x8x512xf32>
    %16 = vector.shape_cast %15 : vector<1x8x512xf32> to vector<8x512xf32>
    %17 = vector.shape_cast %14 : vector<8x512xf32> to vector<1x8x512xf32>
    tpu.vector_store %arg8[%c1, %c0_9, %c0_10], %17 {strides = array<i32>} : memref<8x8x512xf32, #tpu.memory_space<vmem>>, vector<1x8x512xf32>,
    %18 = vector.extract_strided_slice %7 {offsets = [0, 2, 0], sizes = [8, 1, 512], strides = [1, 1, 1]} : vector<8x8x512xf32> to vector<8x1x512xf32>
    %19 = vector.shape_cast %18 : vector<8x1x512xf32> to vector<8x512xf32>
    %c2 = arith.constant 2 : index
    %c0_11 = arith.constant 0 : index
    %c0_12 = arith.constant 0 : index
    %20 = vector.load %arg8[%c2, %c0_11, %c0_12] : memref<8x8x512xf32, #tpu.memory_space<vmem>>, vector<1x8x512xf32>
    %21 = vector.shape_cast %20 : vector<1x8x512xf32> to vector<8x512xf32>
    %22 = vector.shape_cast %19 : vector<8x512xf32> to vector<1x8x512xf32>
    tpu.vector_store %arg8[%c2, %c0_11, %c0_12], %22 {strides = array<i32>} : memref<8x8x512xf32, #tpu.memory_space<vmem>>, vector<1x8x512xf32>,
    %23 = vector.extract_strided_slice %7 {offsets = [0, 3, 0], sizes = [8, 1, 512], strides = [1, 1, 1]} : vector<8x8x512xf32> to vector<8x1x512xf32>
    %24 = vector.shape_cast %23 : vector<8x1x512xf32> to vector<8x512xf32>
    %c3 = arith.constant 3 : index
    %c0_13 = arith.constant 0 : index
    %c0_14 = arith.constant 0 : index
    %25 = vector.load %arg8[%c3, %c0_13, %c0_14] : memref<8x8x512xf32, #tpu.memory_space<vmem>>, vector<1x8x512xf32>
    %26 = vector.shape_cast %25 : vector<1x8x512xf32> to vector<8x512xf32>
    %27 = vector.shape_cast %24 : vector<8x512xf32> to vector<1x8x512xf32>
    tpu.vector_store %arg8[%c3, %c0_13, %c0_14], %27 {strides = array<i32>} : memref<8x8x512xf32, #tpu.memory_space<vmem>>, vector<1x8x512xf32>,
    %28 = vector.extract_strided_slice %7 {offsets = [0, 4, 0], sizes = [8, 1, 512], strides = [1, 1, 1]} : vector<8x8x512xf32> to vector<8x1x512xf32>
    %29 = vector.shape_cast %28 : vector<8x1x512xf32> to vector<8x512xf32>
    %c4 = arith.constant 4 : index
    %c0_15 = arith.constant 0 : index
    %c0_16 = arith.constant 0 : index
    %30 = vector.load %arg8[%c4, %c0_15, %c0_16] : memref<8x8x512xf32, #tpu.memory_space<vmem>>, vector<1x8x512xf32>
    %31 = vector.shape_cast %30 : vector<1x8x512xf32> to vector<8x512xf32>
    %32 = vector.shape_cast %29 : vector<8x512xf32> to vector<1x8x512xf32>
    tpu.vector_store %arg8[%c4, %c0_15, %c0_16], %32 {strides = array<i32>} : memref<8x8x512xf32, #tpu.memory_space<vmem>>, vector<1x8x512xf32>,
    %33 = vector.extract_strided_slice %7 {offsets = [0, 5, 0], sizes = [8, 1, 512], strides = [1, 1, 1]} : vector<8x8x512xf32> to vector<8x1x512xf32>
    %34 = vector.shape_cast %33 : vector<8x1x512xf32> to vector<8x512xf32>
    %c5 = arith.constant 5 : index
    %c0_17 = arith.constant 0 : index
    %c0_18 = arith.constant 0 : index
    %35 = vector.load %arg8[%c5, %c0_17, %c0_18] : memref<8x8x512xf32, #tpu.memory_space<vmem>>, vector<1x8x512xf32>
    %36 = vector.shape_cast %35 : vector<1x8x512xf32> to vector<8x512xf32>
    %37 = vector.shape_cast %34 : vector<8x512xf32> to vector<1x8x512xf32>
    tpu.vector_store %arg8[%c5, %c0_17, %c0_18], %37 {strides = array<i32>} : memref<8x8x512xf32, #tpu.memory_space<vmem>>, vector<1x8x512xf32>,
    %38 = vector.extract_strided_slice %7 {offsets = [0, 6, 0], sizes = [8, 1, 512], strides = [1, 1, 1]} : vector<8x8x512xf32> to vector<8x1x512xf32>
    %39 = vector.shape_cast %38 : vector<8x1x512xf32> to vector<8x512xf32>
    %c6 = arith.constant 6 : index
    %c0_19 = arith.constant 0 : index
    %c0_20 = arith.constant 0 : index
    %40 = vector.load %arg8[%c6, %c0_19, %c0_20] : memref<8x8x512xf32, #tpu.memory_space<vmem>>, vector<1x8x512xf32>
    %41 = vector.shape_cast %40 : vector<1x8x512xf32> to vector<8x512xf32>
    %42 = vector.shape_cast %39 : vector<8x512xf32> to vector<1x8x512xf32>
    tpu.vector_store %arg8[%c6, %c0_19, %c0_20], %42 {strides = array<i32>} : memref<8x8x512xf32, #tpu.memory_space<vmem>>, vector<1x8x512xf32>,
    %43 = vector.extract_strided_slice %7 {offsets = [0, 7, 0], sizes = [8, 1, 512], strides = [1, 1, 1]} : vector<8x8x512xf32> to vector<8x1x512xf32>
    %44 = vector.shape_cast %43 : vector<8x1x512xf32> to vector<8x512xf32>
    %c7 = arith.constant 7 : index
    %c0_21 = arith.constant 0 : index
    %c0_22 = arith.constant 0 : index
    %45 = vector.load %arg8[%c7, %c0_21, %c0_22] : memref<8x8x512xf32, #tpu.memory_space<vmem>>, vector<1x8x512xf32>
    %46 = vector.shape_cast %45 : vector<1x8x512xf32> to vector<8x512xf32>
    %47 = vector.shape_cast %44 : vector<8x512xf32> to vector<1x8x512xf32>
    tpu.vector_store %arg8[%c7, %c0_21, %c0_22], %47 {strides = array<i32>} : memref<8x8x512xf32, #tpu.memory_space<vmem>>, vector<1x8x512xf32>,
    %c0_23 = arith.constant 0 : index
    %c0_24 = arith.constant 0 : index
    %48 = vector.load %arg3[%c0_23, %c0_24] : memref<128x512xf32, #tpu.memory_space<vmem>>, vector<128x512xf32>
    %cst_25 = arith.constant 0.000000e+00 : f32
    %49 = vector.broadcast %cst_25 : f32 to vector<8x128xf32>
    %cst_26 = arith.constant 0.000000e+00 : f32
    %50 = vector.broadcast %cst_26 : f32 to vector<8x128xf32>
    %c0_i32 = arith.constant 0 : i32
    %51 = arith.index_cast %c0_i32 : i32 to index
    %c0_27 = arith.constant 0 : index
    %c0_28 = arith.constant 0 : index
    %52 = vector.load %arg8[%51, %c0_27, %c0_28] : memref<8x8x512xf32, #tpu.memory_space<vmem>>, vector<1x8x512xf32>
    %53 = vector.shape_cast %52 : vector<1x8x512xf32> to vector<8x512xf32>
    %cst_29 = arith.constant dense<0.000000e+00> : vector<8x512xf32>
    %54 = tpu.matmul %49, %48, %cst_29 {dimension_numbers = #tpu.dot_dimension_numbers<[1], [0], [0], [1], [0, 0, 1, 1], [], []>} : vector<8x128xf32>, vector<128x512xf32>, vector<8x512xf32> -> vector<8x512xf32>
    %55 = arith.addf %53, %54 : vector<8x512xf32>
    %56 = vector.extract_strided_slice %55 {offsets = [0, 0], sizes = [8, 128], strides = [1, 1]} : vector<8x512xf32> to vector<8x128xf32>
    %57 = arith.negf %56 : vector<8x128xf32>
    %58 = math.exp %57 : vector<8x128xf32>
    %cst_30 = arith.constant 1.000000e+00 : f32
    %59 = vector.broadcast %cst_30 : f32 to vector<8x128xf32>
    %60 = arith.addf %59, %58 : vector<8x128xf32>
    %61 = arith.divf %59, %60 : vector<8x128xf32>
    %62 = vector.extract_strided_slice %55 {offsets = [0, 128], sizes = [8, 128], strides = [1, 1]} : vector<8x512xf32> to vector<8x128xf32>
    %63 = arith.negf %62 : vector<8x128xf32>
    %64 = math.exp %63 : vector<8x128xf32>
    %cst_31 = arith.constant 1.000000e+00 : f32
    %65 = vector.broadcast %cst_31 : f32 to vector<8x128xf32>
    %66 = arith.addf %65, %64 : vector<8x128xf32>
    %67 = arith.divf %65, %66 : vector<8x128xf32>
    %68 = vector.extract_strided_slice %55 {offsets = [0, 256], sizes = [8, 128], strides = [1, 1]} : vector<8x512xf32> to vector<8x128xf32>
    %69 = math.tanh %68 : vector<8x128xf32>
    %70 = vector.extract_strided_slice %55 {offsets = [0, 384], sizes = [8, 128], strides = [1, 1]} : vector<8x512xf32> to vector<8x128xf32>
    %71 = arith.negf %70 : vector<8x128xf32>
    %72 = math.exp %71 : vector<8x128xf32>
    %cst_32 = arith.constant 1.000000e+00 : f32
    %73 = vector.broadcast %cst_32 : f32 to vector<8x128xf32>
    %74 = arith.addf %73, %72 : vector<8x128xf32>
    %75 = arith.divf %73, %74 : vector<8x128xf32>
    %76 = arith.mulf %67, %50 : vector<8x128xf32>
    %77 = arith.mulf %61, %69 : vector<8x128xf32>
    %78 = arith.addf %76, %77 : vector<8x128xf32>
    %79 = math.tanh %78 : vector<8x128xf32>
    %80 = arith.mulf %75, %79 : vector<8x128xf32>
    %c1_i32 = arith.constant 1 : i32
    %81 = arith.index_cast %c1_i32 : i32 to index
    %c0_33 = arith.constant 0 : index
    %c0_34 = arith.constant 0 : index
    %82 = vector.load %arg8[%81, %c0_33, %c0_34] : memref<8x8x512xf32, #tpu.memory_space<vmem>>, vector<1x8x512xf32>
    %83 = vector.shape_cast %82 : vector<1x8x512xf32> to vector<8x512xf32>
    %cst_35 = arith.constant dense<0.000000e+00> : vector<8x512xf32>
    %84 = tpu.matmul %80, %48, %cst_35 {dimension_numbers = #tpu.dot_dimension_numbers<[1], [0], [0], [1], [0, 0, 1, 1], [], []>} : vector<8x128xf32>, vector<128x512xf32>, vector<8x512xf32> -> vector<8x512xf32>
    %85 = arith.addf %83, %84 : vector<8x512xf32>
    %86 = vector.extract_strided_slice %85 {offsets = [0, 0], sizes = [8, 128], strides = [1, 1]} : vector<8x512xf32> to vector<8x128xf32>
    %87 = arith.negf %86 : vector<8x128xf32>
    %88 = math.exp %87 : vector<8x128xf32>
    %cst_36 = arith.constant 1.000000e+00 : f32
    %89 = vector.broadcast %cst_36 : f32 to vector<8x128xf32>
    %90 = arith.addf %89, %88 : vector<8x128xf32>
    %91 = arith.divf %89, %90 : vector<8x128xf32>
    %92 = vector.extract_strided_slice %85 {offsets = [0, 128], sizes = [8, 128], strides = [1, 1]} : vector<8x512xf32> to vector<8x128xf32>
    %93 = arith.negf %92 : vector<8x128xf32>
    %94 = math.exp %93 : vector<8x128xf32>
    %cst_37 = arith.constant 1.000000e+00 : f32
    %95 = vector.broadcast %cst_37 : f32 to vector<8x128xf32>
    %96 = arith.addf %95, %94 : vector<8x128xf32>
    %97 = arith.divf %95, %96 : vector<8x128xf32>
    %98 = vector.extract_strided_slice %85 {offsets = [0, 256], sizes = [8, 128], strides = [1, 1]} : vector<8x512xf32> to vector<8x128xf32>
    %99 = math.tanh %98 : vector<8x128xf32>
    %100 = vector.extract_strided_slice %85 {offsets = [0, 384], sizes = [8, 128], strides = [1, 1]} : vector<8x512xf32> to vector<8x128xf32>
    %101 = arith.negf %100 : vector<8x128xf32>
    %102 = math.exp %101 : vector<8x128xf32>
    %cst_38 = arith.constant 1.000000e+00 : f32
    %103 = vector.broadcast %cst_38 : f32 to vector<8x128xf32>
    %104 = arith.addf %103, %102 : vector<8x128xf32>
    %105 = arith.divf %103, %104 : vector<8x128xf32>
    %106 = arith.mulf %97, %78 : vector<8x128xf32>
    %107 = arith.mulf %91, %99 : vector<8x128xf32>
    %108 = arith.addf %106, %107 : vector<8x128xf32>
    %109 = math.tanh %108 : vector<8x128xf32>
    %110 = arith.mulf %105, %109 : vector<8x128xf32>
    %c2_i32 = arith.constant 2 : i32
    %111 = arith.index_cast %c2_i32 : i32 to index
    %c0_39 = arith.constant 0 : index
    %c0_40 = arith.constant 0 : index
    %112 = vector.load %arg8[%111, %c0_39, %c0_40] : memref<8x8x512xf32, #tpu.memory_space<vmem>>, vector<1x8x512xf32>
    %113 = vector.shape_cast %112 : vector<1x8x512xf32> to vector<8x512xf32>
    %cst_41 = arith.constant dense<0.000000e+00> : vector<8x512xf32>
    %114 = tpu.matmul %110, %48, %cst_41 {dimension_numbers = #tpu.dot_dimension_numbers<[1], [0], [0], [1], [0, 0, 1, 1], [], []>} : vector<8x128xf32>, vector<128x512xf32>, vector<8x512xf32> -> vector<8x512xf32>
    %115 = arith.addf %113, %114 : vector<8x512xf32>
    %116 = vector.extract_strided_slice %115 {offsets = [0, 0], sizes = [8, 128], strides = [1, 1]} : vector<8x512xf32> to vector<8x128xf32>
    %117 = arith.negf %116 : vector<8x128xf32>
    %118 = math.exp %117 : vector<8x128xf32>
    %cst_42 = arith.constant 1.000000e+00 : f32
    %119 = vector.broadcast %cst_42 : f32 to vector<8x128xf32>
    %120 = arith.addf %119, %118 : vector<8x128xf32>
    %121 = arith.divf %119, %120 : vector<8x128xf32>
    %122 = vector.extract_strided_slice %115 {offsets = [0, 128], sizes = [8, 128], strides = [1, 1]} : vector<8x512xf32> to vector<8x128xf32>
    %123 = arith.negf %122 : vector<8x128xf32>
    %124 = math.exp %123 : vector<8x128xf32>
    %cst_43 = arith.constant 1.000000e+00 : f32
    %125 = vector.broadcast %cst_43 : f32 to vector<8x128xf32>
    %126 = arith.addf %125, %124 : vector<8x128xf32>
    %127 = arith.divf %125, %126 : vector<8x128xf32>
    %128 = vector.extract_strided_slice %115 {offsets = [0, 256], sizes = [8, 128], strides = [1, 1]} : vector<8x512xf32> to vector<8x128xf32>
    %129 = math.tanh %128 : vector<8x128xf32>
    %130 = vector.extract_strided_slice %115 {offsets = [0, 384], sizes = [8, 128], strides = [1, 1]} : vector<8x512xf32> to vector<8x128xf32>
    %131 = arith.negf %130 : vector<8x128xf32>
    %132 = math.exp %131 : vector<8x128xf32>
    %cst_44 = arith.constant 1.000000e+00 : f32
    %133 = vector.broadcast %cst_44 : f32 to vector<8x128xf32>
    %134 = arith.addf %133, %132 : vector<8x128xf32>
    %135 = arith.divf %133, %134 : vector<8x128xf32>
    %136 = arith.mulf %127, %108 : vector<8x128xf32>
    %137 = arith.mulf %121, %129 : vector<8x128xf32>
    %138 = arith.addf %136, %137 : vector<8x128xf32>
    %139 = math.tanh %138 : vector<8x128xf32>
    %140 = arith.mulf %135, %139 : vector<8x128xf32>
    %c3_i32 = arith.constant 3 : i32
    %141 = arith.index_cast %c3_i32 : i32 to index
    %c0_45 = arith.constant 0 : index
    %c0_46 = arith.constant 0 : index
    %142 = vector.load %arg8[%141, %c0_45, %c0_46] : memref<8x8x512xf32, #tpu.memory_space<vmem>>, vector<1x8x512xf32>
    %143 = vector.shape_cast %142 : vector<1x8x512xf32> to vector<8x512xf32>
    %cst_47 = arith.constant dense<0.000000e+00> : vector<8x512xf32>
    %144 = tpu.matmul %140, %48, %cst_47 {dimension_numbers = #tpu.dot_dimension_numbers<[1], [0], [0], [1], [0, 0, 1, 1], [], []>} : vector<8x128xf32>, vector<128x512xf32>, vector<8x512xf32> -> vector<8x512xf32>
    %145 = arith.addf %143, %144 : vector<8x512xf32>
    %146 = vector.extract_strided_slice %145 {offsets = [0, 0], sizes = [8, 128], strides = [1, 1]} : vector<8x512xf32> to vector<8x128xf32>
    %147 = arith.negf %146 : vector<8x128xf32>
    %148 = math.exp %147 : vector<8x128xf32>
    %cst_48 = arith.constant 1.000000e+00 : f32
    %149 = vector.broadcast %cst_48 : f32 to vector<8x128xf32>
    %150 = arith.addf %149, %148 : vector<8x128xf32>
    %151 = arith.divf %149, %150 : vector<8x128xf32>
    %152 = vector.extract_strided_slice %145 {offsets = [0, 128], sizes = [8, 128], strides = [1, 1]} : vector<8x512xf32> to vector<8x128xf32>
    %153 = arith.negf %152 : vector<8x128xf32>
    %154 = math.exp %153 : vector<8x128xf32>
    %cst_49 = arith.constant 1.000000e+00 : f32
    %155 = vector.broadcast %cst_49 : f32 to vector<8x128xf32>
    %156 = arith.addf %155, %154 : vector<8x128xf32>
    %157 = arith.divf %155, %156 : vector<8x128xf32>
    %158 = vector.extract_strided_slice %145 {offsets = [0, 256], sizes = [8, 128], strides = [1, 1]} : vector<8x512xf32> to vector<8x128xf32>
    %159 = math.tanh %158 : vector<8x128xf32>
    %160 = vector.extract_strided_slice %145 {offsets = [0, 384], sizes = [8, 128], strides = [1, 1]} : vector<8x512xf32> to vector<8x128xf32>
    %161 = arith.negf %160 : vector<8x128xf32>
    %162 = math.exp %161 : vector<8x128xf32>
    %cst_50 = arith.constant 1.000000e+00 : f32
    %163 = vector.broadcast %cst_50 : f32 to vector<8x128xf32>
    %164 = arith.addf %163, %162 : vector<8x128xf32>
    %165 = arith.divf %163, %164 : vector<8x128xf32>
    %166 = arith.mulf %157, %138 : vector<8x128xf32>
    %167 = arith.mulf %151, %159 : vector<8x128xf32>
    %168 = arith.addf %166, %167 : vector<8x128xf32>
    %169 = math.tanh %168 : vector<8x128xf32>
    %170 = arith.mulf %165, %169 : vector<8x128xf32>
    %c4_i32 = arith.constant 4 : i32
    %171 = arith.index_cast %c4_i32 : i32 to index
    %c0_51 = arith.constant 0 : index
    %c0_52 = arith.constant 0 : index
    %172 = vector.load %arg8[%171, %c0_51, %c0_52] : memref<8x8x512xf32, #tpu.memory_space<vmem>>, vector<1x8x512xf32>
    %173 = vector.shape_cast %172 : vector<1x8x512xf32> to vector<8x512xf32>
    %cst_53 = arith.constant dense<0.000000e+00> : vector<8x512xf32>
    %174 = tpu.matmul %170, %48, %cst_53 {dimension_numbers = #tpu.dot_dimension_numbers<[1], [0], [0], [1], [0, 0, 1, 1], [], []>} : vector<8x128xf32>, vector<128x512xf32>, vector<8x512xf32> -> vector<8x512xf32>
    %175 = arith.addf %173, %174 : vector<8x512xf32>
    %176 = vector.extract_strided_slice %175 {offsets = [0, 0], sizes = [8, 128], strides = [1, 1]} : vector<8x512xf32> to vector<8x128xf32>
    %177 = arith.negf %176 : vector<8x128xf32>
    %178 = math.exp %177 : vector<8x128xf32>
    %cst_54 = arith.constant 1.000000e+00 : f32
    %179 = vector.broadcast %cst_54 : f32 to vector<8x128xf32>
    %180 = arith.addf %179, %178 : vector<8x128xf32>
    %181 = arith.divf %179, %180 : vector<8x128xf32>
    %182 = vector.extract_strided_slice %175 {offsets = [0, 128], sizes = [8, 128], strides = [1, 1]} : vector<8x512xf32> to vector<8x128xf32>
    %183 = arith.negf %182 : vector<8x128xf32>
    %184 = math.exp %183 : vector<8x128xf32>
    %cst_55 = arith.constant 1.000000e+00 : f32
    %185 = vector.broadcast %cst_55 : f32 to vector<8x128xf32>
    %186 = arith.addf %185, %184 : vector<8x128xf32>
    %187 = arith.divf %185, %186 : vector<8x128xf32>
    %188 = vector.extract_strided_slice %175 {offsets = [0, 256], sizes = [8, 128], strides = [1, 1]} : vector<8x512xf32> to vector<8x128xf32>
    %189 = math.tanh %188 : vector<8x128xf32>
    %190 = vector.extract_strided_slice %175 {offsets = [0, 384], sizes = [8, 128], strides = [1, 1]} : vector<8x512xf32> to vector<8x128xf32>
    %191 = arith.negf %190 : vector<8x128xf32>
    %192 = math.exp %191 : vector<8x128xf32>
    %cst_56 = arith.constant 1.000000e+00 : f32
    %193 = vector.broadcast %cst_56 : f32 to vector<8x128xf32>
    %194 = arith.addf %193, %192 : vector<8x128xf32>
    %195 = arith.divf %193, %194 : vector<8x128xf32>
    %196 = arith.mulf %187, %168 : vector<8x128xf32>
    %197 = arith.mulf %181, %189 : vector<8x128xf32>
    %198 = arith.addf %196, %197 : vector<8x128xf32>
    %199 = math.tanh %198 : vector<8x128xf32>
    %200 = arith.mulf %195, %199 : vector<8x128xf32>
    %c5_i32 = arith.constant 5 : i32
    %201 = arith.index_cast %c5_i32 : i32 to index
    %c0_57 = arith.constant 0 : index
    %c0_58 = arith.constant 0 : index
    %202 = vector.load %arg8[%201, %c0_57, %c0_58] : memref<8x8x512xf32, #tpu.memory_space<vmem>>, vector<1x8x512xf32>
    %203 = vector.shape_cast %202 : vector<1x8x512xf32> to vector<8x512xf32>
    %cst_59 = arith.constant dense<0.000000e+00> : vector<8x512xf32>
    %204 = tpu.matmul %200, %48, %cst_59 {dimension_numbers = #tpu.dot_dimension_numbers<[1], [0], [0], [1], [0, 0, 1, 1], [], []>} : vector<8x128xf32>, vector<128x512xf32>, vector<8x512xf32> -> vector<8x512xf32>
    %205 = arith.addf %203, %204 : vector<8x512xf32>
    %206 = vector.extract_strided_slice %205 {offsets = [0, 0], sizes = [8, 128], strides = [1, 1]} : vector<8x512xf32> to vector<8x128xf32>
    %207 = arith.negf %206 : vector<8x128xf32>
    %208 = math.exp %207 : vector<8x128xf32>
    %cst_60 = arith.constant 1.000000e+00 : f32
    %209 = vector.broadcast %cst_60 : f32 to vector<8x128xf32>
    %210 = arith.addf %209, %208 : vector<8x128xf32>
    %211 = arith.divf %209, %210 : vector<8x128xf32>
    %212 = vector.extract_strided_slice %205 {offsets = [0, 128], sizes = [8, 128], strides = [1, 1]} : vector<8x512xf32> to vector<8x128xf32>
    %213 = arith.negf %212 : vector<8x128xf32>
    %214 = math.exp %213 : vector<8x128xf32>
    %cst_61 = arith.constant 1.000000e+00 : f32
    %215 = vector.broadcast %cst_61 : f32 to vector<8x128xf32>
    %216 = arith.addf %215, %214 : vector<8x128xf32>
    %217 = arith.divf %215, %216 : vector<8x128xf32>
    %218 = vector.extract_strided_slice %205 {offsets = [0, 256], sizes = [8, 128], strides = [1, 1]} : vector<8x512xf32> to vector<8x128xf32>
    %219 = math.tanh %218 : vector<8x128xf32>
    %220 = vector.extract_strided_slice %205 {offsets = [0, 384], sizes = [8, 128], strides = [1, 1]} : vector<8x512xf32> to vector<8x128xf32>
    %221 = arith.negf %220 : vector<8x128xf32>
    %222 = math.exp %221 : vector<8x128xf32>
    %cst_62 = arith.constant 1.000000e+00 : f32
    %223 = vector.broadcast %cst_62 : f32 to vector<8x128xf32>
    %224 = arith.addf %223, %222 : vector<8x128xf32>
    %225 = arith.divf %223, %224 : vector<8x128xf32>
    %226 = arith.mulf %217, %198 : vector<8x128xf32>
    %227 = arith.mulf %211, %219 : vector<8x128xf32>
    %228 = arith.addf %226, %227 : vector<8x128xf32>
    %229 = math.tanh %228 : vector<8x128xf32>
    %230 = arith.mulf %225, %229 : vector<8x128xf32>
    %c6_i32 = arith.constant 6 : i32
    %231 = arith.index_cast %c6_i32 : i32 to index
    %c0_63 = arith.constant 0 : index
    %c0_64 = arith.constant 0 : index
    %232 = vector.load %arg8[%231, %c0_63, %c0_64] : memref<8x8x512xf32, #tpu.memory_space<vmem>>, vector<1x8x512xf32>
    %233 = vector.shape_cast %232 : vector<1x8x512xf32> to vector<8x512xf32>
    %cst_65 = arith.constant dense<0.000000e+00> : vector<8x512xf32>
    %234 = tpu.matmul %230, %48, %cst_65 {dimension_numbers = #tpu.dot_dimension_numbers<[1], [0], [0], [1], [0, 0, 1, 1], [], []>} : vector<8x128xf32>, vector<128x512xf32>, vector<8x512xf32> -> vector<8x512xf32>
    %235 = arith.addf %233, %234 : vector<8x512xf32>
    %236 = vector.extract_strided_slice %235 {offsets = [0, 0], sizes = [8, 128], strides = [1, 1]} : vector<8x512xf32> to vector<8x128xf32>
    %237 = arith.negf %236 : vector<8x128xf32>
    %238 = math.exp %237 : vector<8x128xf32>
    %cst_66 = arith.constant 1.000000e+00 : f32
    %239 = vector.broadcast %cst_66 : f32 to vector<8x128xf32>
    %240 = arith.addf %239, %238 : vector<8x128xf32>
    %241 = arith.divf %239, %240 : vector<8x128xf32>
    %242 = vector.extract_strided_slice %235 {offsets = [0, 128], sizes = [8, 128], strides = [1, 1]} : vector<8x512xf32> to vector<8x128xf32>
    %243 = arith.negf %242 : vector<8x128xf32>
    %244 = math.exp %243 : vector<8x128xf32>
    %cst_67 = arith.constant 1.000000e+00 : f32
    %245 = vector.broadcast %cst_67 : f32 to vector<8x128xf32>
    %246 = arith.addf %245, %244 : vector<8x128xf32>
    %247 = arith.divf %245, %246 : vector<8x128xf32>
    %248 = vector.extract_strided_slice %235 {offsets = [0, 256], sizes = [8, 128], strides = [1, 1]} : vector<8x512xf32> to vector<8x128xf32>
    %249 = math.tanh %248 : vector<8x128xf32>
    %250 = vector.extract_strided_slice %235 {offsets = [0, 384], sizes = [8, 128], strides = [1, 1]} : vector<8x512xf32> to vector<8x128xf32>
    %251 = arith.negf %250 : vector<8x128xf32>
    %252 = math.exp %251 : vector<8x128xf32>
    %cst_68 = arith.constant 1.000000e+00 : f32
    %253 = vector.broadcast %cst_68 : f32 to vector<8x128xf32>
    %254 = arith.addf %253, %252 : vector<8x128xf32>
    %255 = arith.divf %253, %254 : vector<8x128xf32>
    %256 = arith.mulf %247, %228 : vector<8x128xf32>
    %257 = arith.mulf %241, %249 : vector<8x128xf32>
    %258 = arith.addf %256, %257 : vector<8x128xf32>
    %259 = math.tanh %258 : vector<8x128xf32>
    %260 = arith.mulf %255, %259 : vector<8x128xf32>
    %c7_i32 = arith.constant 7 : i32
    %261 = arith.index_cast %c7_i32 : i32 to index
    %c0_69 = arith.constant 0 : index
    %c0_70 = arith.constant 0 : index
    %262 = vector.load %arg8[%261, %c0_69, %c0_70] : memref<8x8x512xf32, #tpu.memory_space<vmem>>, vector<1x8x512xf32>
    %263 = vector.shape_cast %262 : vector<1x8x512xf32> to vector<8x512xf32>
    %cst_71 = arith.constant dense<0.000000e+00> : vector<8x512xf32>
    %264 = tpu.matmul %260, %48, %cst_71 {dimension_numbers = #tpu.dot_dimension_numbers<[1], [0], [0], [1], [0, 0, 1, 1], [], []>} : vector<8x128xf32>, vector<128x512xf32>, vector<8x512xf32> -> vector<8x512xf32>
    %265 = arith.addf %263, %264 : vector<8x512xf32>
    %266 = vector.extract_strided_slice %265 {offsets = [0, 0], sizes = [8, 128], strides = [1, 1]} : vector<8x512xf32> to vector<8x128xf32>
    %267 = arith.negf %266 : vector<8x128xf32>
    %268 = math.exp %267 : vector<8x128xf32>
    %cst_72 = arith.constant 1.000000e+00 : f32
    %269 = vector.broadcast %cst_72 : f32 to vector<8x128xf32>
    %270 = arith.addf %269, %268 : vector<8x128xf32>
    %271 = arith.divf %269, %270 : vector<8x128xf32>
    %272 = vector.extract_strided_slice %265 {offsets = [0, 128], sizes = [8, 128], strides = [1, 1]} : vector<8x512xf32> to vector<8x128xf32>
    %273 = arith.negf %272 : vector<8x128xf32>
    %274 = math.exp %273 : vector<8x128xf32>
    %cst_73 = arith.constant 1.000000e+00 : f32
    %275 = vector.broadcast %cst_73 : f32 to vector<8x128xf32>
    %276 = arith.addf %275, %274 : vector<8x128xf32>
    %277 = arith.divf %275, %276 : vector<8x128xf32>
    %278 = vector.extract_strided_slice %265 {offsets = [0, 256], sizes = [8, 128], strides = [1, 1]} : vector<8x512xf32> to vector<8x128xf32>
    %279 = math.tanh %278 : vector<8x128xf32>
    %280 = vector.extract_strided_slice %265 {offsets = [0, 384], sizes = [8, 128], strides = [1, 1]} : vector<8x512xf32> to vector<8x128xf32>
    %281 = arith.negf %280 : vector<8x128xf32>
    %282 = math.exp %281 : vector<8x128xf32>
    %cst_74 = arith.constant 1.000000e+00 : f32
    %283 = vector.broadcast %cst_74 : f32 to vector<8x128xf32>
    %284 = arith.addf %283, %282 : vector<8x128xf32>
    %285 = arith.divf %283, %284 : vector<8x128xf32>
    %286 = arith.mulf %277, %258 : vector<8x128xf32>
    %287 = arith.mulf %271, %279 : vector<8x128xf32>
    %288 = arith.addf %286, %287 : vector<8x128xf32>
    %289 = math.tanh %288 : vector<8x128xf32>
    %290 = arith.mulf %285, %289 : vector<8x128xf32>
    %c8_i32 = arith.constant 8 : i32
    %c0_75 = arith.constant 0 : index
    %c0_76 = arith.constant 0 : index
    %291 = vector.load %arg5[%c0_75, %c0_76] : memref<128x128xf32, #tpu.memory_space<vmem>>, vector<128x128xf32>
    %cst_77 = arith.constant dense<0.000000e+00> : vector<8x128xf32>
    %292 = tpu.matmul %290, %291, %cst_77 {dimension_numbers = #tpu.dot_dimension_numbers<[1], [0], [0], [1], [0, 0, 1, 1], [], []>} : vector<8x128xf32>, vector<128x128xf32>, vector<8x128xf32> -> vector<8x128xf32>
    %c0_78 = arith.constant 0 : index
    %c0_79 = arith.constant 0 : index
    %293 = vector.load %arg6[%c0_78, %c0_79] : memref<1x128xf32, #tpu.memory_space<vmem>>, vector<1x128xf32>
    %294 = vector.broadcast %293 : vector<1x128xf32> to vector<8x128xf32>
    %295 = arith.addf %292, %294 : vector<8x128xf32>
    %c0_80 = arith.constant 0 : index
    %c0_81 = arith.constant 0 : index
    %296 = vector.load %arg7[%c0_80, %c0_81] : memref<8x128xf32, #tpu.memory_space<vmem>>, vector<8x128xf32>
    tpu.vector_store %arg7[%c0_80, %c0_81], %295 {strides = array<i32>} : memref<8x128xf32, #tpu.memory_space<vmem>>, vector<8x128xf32>,
    return
  }
  func.func @transform_0(%arg0: i32) -> (i32, i32, i32) {
    %c0_i32 = arith.constant 0 : i32
    %c0_i32_0 = arith.constant 0 : i32
    %c0_i32_1 = arith.constant 0 : i32
    return %arg0, %c0_i32, %c0_i32_0 : i32, i32, i32
  }
  func.func @transform_1(%arg0: i32) -> (i32, i32) {
    %c0_i32 = arith.constant 0 : i32
    %c0_i32_0 = arith.constant 0 : i32
    %c0_i32_1 = arith.constant 0 : i32
    return %c0_i32, %c0_i32_0 : i32, i32
  }
  func.func @transform_2(%arg0: i32) -> (i32, i32) {
    %c0_i32 = arith.constant 0 : i32
    %c0_i32_0 = arith.constant 0 : i32
    %c0_i32_1 = arith.constant 0 : i32
    return %c0_i32, %c0_i32_0 : i32, i32
  }
  func.func @transform_3(%arg0: i32) -> (i32, i32) {
    %c0_i32 = arith.constant 0 : i32
    %c0_i32_0 = arith.constant 0 : i32
    %c0_i32_1 = arith.constant 0 : i32
    return %c0_i32, %c0_i32_0 : i32, i32
  }
  func.func @transform_4(%arg0: i32) -> (i32, i32) {
    %c0_i32 = arith.constant 0 : i32
    %c0_i32_0 = arith.constant 0 : i32
    %c0_i32_1 = arith.constant 0 : i32
    return %c0_i32, %c0_i32_0 : i32, i32
  }
  func.func @transform_5(%arg0: i32) -> (i32, i32) {
    %c0_i32 = arith.constant 0 : i32
    %c0_i32_0 = arith.constant 0 : i32
    %c0_i32_1 = arith.constant 0 : i32
    return %c0_i32, %c0_i32_0 : i32, i32
  }
  func.func @transform_6(%arg0: i32) -> (i32, i32) {
    %c0_i32 = arith.constant 0 : i32
    %c0_i32_0 = arith.constant 0 : i32
    return %arg0, %c0_i32 : i32, i32
  }
}

</mosaic_0001>

<bundles_post_ra>
// kernel: tpu_custom_call.1
= control target key start
LH: loop header
LB: loop body
LE: loop exit
PB: predicated region body
PF: predicated region fallthrough
CT: control target
= control target key end

     0   :  { %11 = vsyncpa [#allocation4], 0  ;;  %s4082_s0 = inlined_call_operand.hbm [shape: f32[8,8,128], index: 0, kind: input, shape index: {}]   ;;  %s4083_s1 = inlined_call_operand.hbm [shape: f32[128,512], index: 1, kind: input, shape index: {}]   ;;  %s4084_s2 = inlined_call_operand.hbm [shape: f32[128,512], index: 2, kind: input, shape index: {}]   ;;  %s4085_s3 = inlined_call_operand.hbm [shape: f32[1,512], index: 3, kind: input, shape index: {}]   ;;  %s4086_s4 = inlined_call_operand.hbm [shape: f32[128,128], index: 4, kind: input, shape index: {}]   ;;  %s4087_s5 = inlined_call_operand.vmem [shape: f32[1,128], index: 5, kind: input, shape index: {}]   ;;  %s4088_s6 = inlined_call_operand.hbm [shape: f32[8,128], index: 6, kind: output, shape index: {}]  }
   0x1   :  { %12 = vsyncpa [#allocation7], 0 }
   0x2   :  { %13 = vsyncpa [#allocation10], 0  ;;  %s32_s23 = sshll.u32 %s4083_s1, 4  ;;  %s33_s23 = int_to_ptr.hbm [resolvable:$true] %s32_s23 }
   0x3   :  { %14 = vsyncpa [#allocation5], 0  ;;  %s2680_s24 = smov [#allocation6]   ;;  %s59_s28 = sshll.u32 %s4085_s3, 4  ;;  %s60_s28 = int_to_ptr.hbm [resolvable:$true] %s59_s28 }
   0x4   :  { %s34_s25 = sshll.u32 %s2680_s24, 4  ;;  %s2681_s29 = smov 512   ;;  %s35_s25 = int_to_ptr.vmem [resolvable:$true] %s34_s25 }
   0x5   :  { %s2682_s30 = smov 32   ;;  %s2683_s7 = smov [#allocation9]  }
   0x6   :  { %40 = dma.hbm_to_vmem [thread:$0]  %s33_s23, 8192, %s35_s25, [#allocation7], %s2681_s29, %s2681_s29, %s2682_s30  }
   0x7   :  { %s61_s8 = sshll.u32 %s2683_s7, 4  ;;  %s19_s11 = sshll.u32 %s4082_s0, 4  ;;  %s62_s8 = int_to_ptr.vmem [resolvable:$true] %s61_s8  ;;  %s20_s11 = int_to_ptr.hbm [resolvable:$true] %s19_s11 }
   0x8   :  { %64 = dma.hbm_to_vmem [thread:$0]  %s60_s28, 64, %s62_s8, [#allocation10]  }
   0x9   :  { %s2684_s1 = smov [#allocation3]   ;;  %s45_s3 = sshll.u32 %s4084_s2, 4  ;;  %s46_s3 = int_to_ptr.hbm [resolvable:$true] %s45_s3 }
   0xa   :  { %s21_s12 = sshll.u32 %s2684_s1, 4  ;;  %s2685_s15 = smov 128   ;;  %s22_s12 = int_to_ptr.vmem [resolvable:$true] %s21_s12 }
   0xb   :  { %s2686_s16 = smov 8   ;;  %s2687_s17 = smov [#allocation8]  }
   0xc   :  { %27 = dma.hbm_to_vmem [thread:$0]  %s20_s11, 1024, %s22_s12, [#allocation4], %s2685_s15, %s2685_s15, %s2686_s16  }
   0xd   :  { %s47_s18 = sshll.u32 %s2687_s17, 4  ;;  %s69_s0 = sshll.u32 %s4086_s4, 4  ;;  %s48_s18 = int_to_ptr.vmem [resolvable:$true] %s47_s18  ;;  %s70_s0 = int_to_ptr.hbm [resolvable:$true] %s69_s0 }
   0xe   :  { %53 = dma.hbm_to_vmem [thread:$0]  %s46_s3, 8192, %s48_s18, [#allocation7], %s2681_s29, %s2681_s29, %s2682_s30  }
   0xf   :  { %s2688_s21 = smov [#allocation11]  }
  0x10   :  { %s71_s22 = sshll.u32 %s2688_s21, 4  ;;  %s72_s22 = int_to_ptr.vmem [resolvable:$true] %s71_s22 }
  0x11   :  { %77 = dma.hbm_to_vmem [thread:$0]  %s70_s0, 2048, %s72_s22, [#allocation10], %s2685_s15, %s2685_s15, %s2686_s16  }
  0x12   :  { %2672 = dma.done.wait [#allocation4], 1024  }
  0x13   :  { %2673 = vsyncadd [#allocation4], 4294966272 }
  0x14   :  { %2674 = dma.done.wait [#allocation7], 16384  }
  0x15   :  { %2675 = vsyncadd [#allocation7], 4294950912 }
  0x16   :  { %2676 = dma.done.wait [#allocation10], 2112  }
  0x17   :  { %2677 = vsyncadd [#allocation10], 4294965184  ;;  %v168_v0 = vld [vmem:[#allocation6 + $0x1e0] sm:$0xff]  ;;  %v169_v1 = vld [vmem:[#allocation6 + $0x1e8] sm:$0xff]  ;;  %vm379_vm0 = vcmask 1041409   ;;  %vm382_vm1 = vcmask 1042434  }
  0x18   :  { %v170_v2 = vld [vmem:[#allocation6 + $0x1f0] sm:$0xff]  ;;  %182 = vmatpush.msra.mxu0 %v168_v0  ;;  %223 = vmatpush.msra.mxu1 %v169_v1  ;;  %v171_v3 = vld [vmem:[#allocation6 + $0x1f8] sm:$0xff]  ;;  %v164_v4 = vld [vmem:[#allocation6 + $0x1c0] sm:$0xff]  ;;  %vm385_vm2 = vcmask 1043459   ;;  %vm388_vm3 = vcmask 1044484   ;;  %vm391_vm4 = vcmask 1045509  }
  0x19   :  { %v165_v5 = vld [vmem:[#allocation6 + $0x1c8] sm:$0xff]  ;;  %264 = vmatpush.msra.mxu2 %v170_v2  ;;  %305 = vmatpush.msra.mxu3 %v171_v3  ;;  %v166_v6 = vld [vmem:[#allocation6 + $0x1d0] sm:$0xff]  ;;  %v167_v7 = vld [vmem:[#allocation6 + $0x1d8] sm:$0xff]  ;;  %vm394_vm5 = vcmask 1046534   ;;  %vm397_vm6 = vcmask 1047559   ;;  %s2690_s23 = smov [#allocation12]  }
  0x1a   :  { %v160_v8 = vld [vmem:[#allocation6 + $0x1a0] sm:$0xff]  ;;  %183 = vmatpush.msra.mxu0 %v164_v4  ;;  %224 = vmatpush.msra.mxu1 %v165_v5  ;;  %v161_v9 = vld [vmem:[#allocation6 + $0x1a8] sm:$0xff]  ;;  %v162_v10 = vld [vmem:[#allocation6 + $0x1b0] sm:$0xff]  ;;  %s2222_s24 = sshll.u32 %s2690_s23, 4  ;;  %s2224_s27 = sshll.u32 %s4088_s6, 4  ;;  %s2223_s24 = int_to_ptr.vmem [resolvable:$true] %s2222_s24  ;;  %s2225_s27 = int_to_ptr.hbm [resolvable:$true] %s2224_s27 }
  0x1b   :  { %v163_v11 = vld [vmem:[#allocation6 + $0x1b8] sm:$0xff]  ;;  %265 = vmatpush.msra.mxu2 %v166_v6  ;;  %306 = vmatpush.msra.mxu3 %v167_v7  ;;  %v156_v12 = vld [vmem:[#allocation6 + $0x180] sm:$0xff]  ;;  %v157_v13 = vld [vmem:[#allocation6 + $0x188] sm:$0xff] }
  0x1c   :  { %184 = vmatpush.msra.mxu0 %v160_v8  ;;  %225 = vmatpush.msra.mxu1 %v161_v9  ;;  %v158_v14 = vld [vmem:[#allocation6 + $0x190] sm:$0xff]  ;;  %v159_v15 = vld [vmem:[#allocation6 + $0x198] sm:$0xff]  ;;  %v152_v16 = vld [vmem:[#allocation6 + $0x160] sm:$0xff] }
  0x1d   :  { %266 = vmatpush.msra.mxu2 %v162_v10  ;;  %307 = vmatpush.msra.mxu3 %v163_v11  ;;  %v153_v17 = vld [vmem:[#allocation6 + $0x168] sm:$0xff]  ;;  %v154_v18 = vld [vmem:[#allocation6 + $0x170] sm:$0xff]  ;;  %v155_v19 = vld [vmem:[#allocation6 + $0x178] sm:$0xff] }
  0x1e   :  { %185 = vmatpush.msra.mxu0 %v156_v12  ;;  %226 = vmatpush.msra.mxu1 %v157_v13  ;;  %v148_v20 = vld [vmem:[#allocation6 + $0x140] sm:$0xff]  ;;  %v149_v21 = vld [vmem:[#allocation6 + $0x148] sm:$0xff]  ;;  %v150_v22 = vld [vmem:[#allocation6 + $0x150] sm:$0xff] }
  0x1f   :  { %267 = vmatpush.msra.mxu2 %v158_v14  ;;  %308 = vmatpush.msra.mxu3 %v159_v15  ;;  %v151_v23 = vld [vmem:[#allocation6 + $0x158] sm:$0xff]  ;;  %v144_v24 = vld [vmem:[#allocation6 + $0x120] sm:$0xff]  ;;  %v145_v25 = vld [vmem:[#allocation6 + $0x128] sm:$0xff] }
  0x20   :  { %186 = vmatpush.msra.mxu0 %v152_v16  ;;  %227 = vmatpush.msra.mxu1 %v153_v17  ;;  %v146_v26 = vld [vmem:[#allocation6 + $0x130] sm:$0xff]  ;;  %v147_v27 = vld [vmem:[#allocation6 + $0x138] sm:$0xff]  ;;  %v140_v28 = vld [vmem:[#allocation6 + $0x100] sm:$0xff] }
  0x21   :  { %268 = vmatpush.msra.mxu2 %v154_v18  ;;  %309 = vmatpush.msra.mxu3 %v155_v19  ;;  %v141_v29 = vld [vmem:[#allocation6 + $0x108] sm:$0xff]  ;;  %v142_v30 = vld [vmem:[#allocation6 + $0x110] sm:$0xff]  ;;  %v143_v31 = vld [vmem:[#allocation6 + $0x118] sm:$0xff] }
  0x22   :  { %187 = vmatpush.msra.mxu0 %v148_v20  ;;  %228 = vmatpush.msra.mxu1 %v149_v21  ;;  %v136_v32 = vld [vmem:[#allocation6 + $0xe0] sm:$0xff]  ;;  %v137_v33 = vld [vmem:[#allocation6 + $0xe8] sm:$0xff]  ;;  %v138_v34 = vld [vmem:[#allocation6 + $0xf0] sm:$0xff] }
  0x23   :  { %269 = vmatpush.msra.mxu2 %v150_v22  ;;  %310 = vmatpush.msra.mxu3 %v151_v23  ;;  %v139_v35 = vld [vmem:[#allocation6 + $0xf8] sm:$0xff]  ;;  %v132_v36 = vld [vmem:[#allocation6 + $0xc0] sm:$0xff]  ;;  %v133_v37 = vld [vmem:[#allocation6 + $0xc8] sm:$0xff] }
  0x24   :  { %188 = vmatpush.msra.mxu0 %v144_v24  ;;  %229 = vmatpush.msra.mxu1 %v145_v25  ;;  %v134_v38 = vld [vmem:[#allocation6 + $0xd0] sm:$0xff]  ;;  %v135_v39 = vld [vmem:[#allocation6 + $0xd8] sm:$0xff]  ;;  %v128_v40 = vld [vmem:[#allocation6 + $0xa0] sm:$0xff] }
  0x25   :  { %270 = vmatpush.msra.mxu2 %v146_v26  ;;  %311 = vmatpush.msra.mxu3 %v147_v27  ;;  %v129_v41 = vld [vmem:[#allocation6 + $0xa8] sm:$0xff]  ;;  %v130_v42 = vld [vmem:[#allocation6 + $0xb0] sm:$0xff]  ;;  %v131_v43 = vld [vmem:[#allocation6 + $0xb8] sm:$0xff] }
  0x26   :  { %189 = vmatpush.msra.mxu0 %v140_v28  ;;  %230 = vmatpush.msra.mxu1 %v141_v29  ;;  %v124_v44 = vld [vmem:[#allocation6 + $0x80] sm:$0xff]  ;;  %v125_v45 = vld [vmem:[#allocation6 + $0x88] sm:$0xff]  ;;  %v126_v46 = vld [vmem:[#allocation6 + $0x90] sm:$0xff] }
  0x27   :  { %271 = vmatpush.msra.mxu2 %v142_v30  ;;  %312 = vmatpush.msra.mxu3 %v143_v31  ;;  %v127_v47 = vld [vmem:[#allocation6 + $0x98] sm:$0xff]  ;;  %v120_v48 = vld [vmem:[#allocation6 + $0x60] sm:$0xff]  ;;  %v121_v49 = vld [vmem:[#allocation6 + $0x68] sm:$0xff] }
  0x28   :  { %190 = vmatpush.msra.mxu0 %v136_v32  ;;  %231 = vmatpush.msra.mxu1 %v137_v33  ;;  %v122_v50 = vld [vmem:[#allocation6 + $0x70] sm:$0xff]  ;;  %v123_v51 = vld [vmem:[#allocation6 + $0x78] sm:$0xff]  ;;  %v116_v52 = vld [vmem:[#allocation6 + $0x40] sm:$0xff] }
  0x29   :  { %272 = vmatpush.msra.mxu2 %v138_v34  ;;  %313 = vmatpush.msra.mxu3 %v139_v35  ;;  %v117_v53 = vld [vmem:[#allocation6 + $0x48] sm:$0xff]  ;;  %v118_v54 = vld [vmem:[#allocation6 + $0x50] sm:$0xff]  ;;  %v119_v55 = vld [vmem:[#allocation6 + $0x58] sm:$0xff] }
  0x2a   :  { %191 = vmatpush.msra.mxu0 %v132_v36  ;;  %232 = vmatpush.msra.mxu1 %v133_v37  ;;  %v112_v56 = vld [vmem:[#allocation6 + $0x20] sm:$0xff]  ;;  %v113_v57 = vld [vmem:[#allocation6 + $0x28] sm:$0xff]  ;;  %v114_v58 = vld [vmem:[#allocation6 + $0x30] sm:$0xff] }
  0x2b   :  { %273 = vmatpush.msra.mxu2 %v134_v38  ;;  %314 = vmatpush.msra.mxu3 %v135_v39  ;;  %v115_v59 = vld [vmem:[#allocation6 + $0x38] sm:$0xff]  ;;  %v108_v60 = vld [vmem:[#allocation6] sm:$0xff]  ;;  %v109_v61 = vld [vmem:[#allocation6 + $0x8] sm:$0xff] }
  0x2c   :  { %192 = vmatpush.msra.mxu0 %v128_v40  ;;  %233 = vmatpush.msra.mxu1 %v129_v41  ;;  %v110_v62 = vld [vmem:[#allocation6 + $0x10] sm:$0xff]  ;;  %v111_v63 = vld [vmem:[#allocation6 + $0x18] sm:$0xff]  ;;  %v100_v0 = vld [vmem:[#allocation3] sm:$0xff] }
  0x2d   :  { %274 = vmatpush.msra.mxu2 %v130_v42  ;;  %315 = vmatpush.msra.mxu3 %v131_v43  ;;  %v2741_v1 = vld [vmem:[#allocation8 + $0x1e0] sm:$0xff]  ;;  %v2743_v2 = vld [vmem:[#allocation8 + $0x1e8] sm:$0xff]  ;;  %v2745_v3 = vld [vmem:[#allocation8 + $0x1f8] sm:$0xff] }
  0x2e   :  { %193 = vmatpush.msra.mxu0 %v124_v44  ;;  %234 = vmatpush.msra.mxu1 %v125_v45  ;;  %v2747_v4 = vld [vmem:[#allocation8 + $0x1f0] sm:$0xff]  ;;  %v2749_v5 = vld [vmem:[#allocation8 + $0x1c0] sm:$0xff]  ;;  %v2751_v6 = vld [vmem:[#allocation8 + $0x1c8] sm:$0xff] }
  0x2f   :  { %275 = vmatpush.msra.mxu2 %v126_v46  ;;  %316 = vmatpush.msra.mxu3 %v127_v47  ;;  %v2755_v7 = vld [vmem:[#allocation8 + $0x1d8] sm:$0xff]  ;;  %v2757_v8 = vld [vmem:[#allocation8 + $0x1d0] sm:$0xff]  ;;  %v2760_v9 = vld [vmem:[#allocation8 + $0x1a0] sm:$0xff] }
  0x30   :  { %194 = vmatpush.msra.mxu0 %v120_v48  ;;  %235 = vmatpush.msra.mxu1 %v121_v49  ;;  %v2762_v10 = vld [vmem:[#allocation8 + $0x1a8] sm:$0xff]  ;;  %v2767_v11 = vld [vmem:[#allocation8 + $0x1b8] sm:$0xff]  ;;  %v2769_v12 = vld [vmem:[#allocation8 + $0x1b0] sm:$0xff] }
  0x31   :  { %276 = vmatpush.msra.mxu2 %v122_v50  ;;  %317 = vmatpush.msra.mxu3 %v123_v51  ;;  %v101_v13 = vld [vmem:[#allocation3 + $0x8] sm:$0xff]  ;;  %v2775_v14 = vld [vmem:[#allocation8 + $0x180] sm:$0xff]  ;;  %v2781_v16 = vld [vmem:[#allocation8 + $0x198] sm:$0xff] }
  0x32   :  { %195 = vmatpush.msra.mxu0 %v116_v52  ;;  %236 = vmatpush.msra.mxu1 %v117_v53  ;;  %v2777_v15 = vld [vmem:[#allocation8 + $0x188] sm:$0xff]  ;;  %v2783_v17 = vld [vmem:[#allocation8 + $0x190] sm:$0xff]  ;;  %v2785_v18 = vld [vmem:[#allocation8 + $0x160] sm:$0xff] }
  0x33   :  { %277 = vmatpush.msra.mxu2 %v118_v54  ;;  %318 = vmatpush.msra.mxu3 %v119_v55  ;;  %v2787_v19 = vld [vmem:[#allocation8 + $0x168] sm:$0xff]  ;;  %v2791_v20 = vld [vmem:[#allocation8 + $0x178] sm:$0xff]  ;;  %v2793_v21 = vld [vmem:[#allocation8 + $0x170] sm:$0xff] }
  0x34   :  { %196 = vmatpush.msra.mxu0 %v112_v56  ;;  %237 = vmatpush.msra.mxu1 %v113_v57  ;;  %v2796_v22 = vld [vmem:[#allocation8 + $0x140] sm:$0xff]  ;;  %v2798_v23 = vld [vmem:[#allocation8 + $0x148] sm:$0xff]  ;;  %v2803_v24 = vld [vmem:[#allocation8 + $0x158] sm:$0xff] }
  0x35   :  { %278 = vmatpush.msra.mxu2 %v114_v58  ;;  %319 = vmatpush.msra.mxu3 %v115_v59  ;;  %4286 = vst [vmem:[#allocation17_spill] sm:$0xff] %v2803_v24  ;;  %v2805_v25 = vld [vmem:[#allocation8 + $0x150] sm:$0xff]  ;;  %v2811_v27 = vld [vmem:[#allocation8 + $0x120] sm:$0xff]  ;;  %v2813_v28 = vld [vmem:[#allocation8 + $0x128] sm:$0xff] }
  0x36   :  { %197 = vmatpush.msra.mxu0 %v108_v60  ;;  %238 = vmatpush.msra.mxu1 %v109_v61  ;;  %4287 = vst [vmem:[#allocation18_spill] sm:$0xff] %v2805_v25  ;;  %v102_v26 = vld [vmem:[#allocation3 + $0x10] sm:$0xff]  ;;  %v2817_v29 = vld [vmem:[#allocation8 + $0x138] sm:$0xff]  ;;  %v2821_v31 = vld [vmem:[#allocation8 + $0x100] sm:$0xff] }
  0x37   :  { %279 = vmatpush.msra.mxu2 %v110_v62  ;;  %320 = vmatpush.msra.mxu3 %v111_v63  ;;  %4288 = vst [vmem:[#allocation19_spill] sm:$0xff] %v2811_v27  ;;  %v2819_v30 = vld [vmem:[#allocation8 + $0x130] sm:$0xff]  ;;  %v2823_v32 = vld [vmem:[#allocation8 + $0x108] sm:$0xff]  ;;  %v2827_v33 = vld [vmem:[#allocation8 + $0x118] sm:$0xff] }
  0x38   :  { %198 = vmatmul.f32.vlgmr.msra.gmra.mxu0 %v100_v0  ;;  %239 = vmatmul.f32.vlgmr.msra.gmra.mxu1 %v100_v0  ;;  %4289 = vst [vmem:[#allocation20_spill] sm:$0xff] %v2813_v28  ;;  %v2829_v34 = vld [vmem:[#allocation8 + $0x110] sm:$0xff]  ;;  %v2832_v35 = vld [vmem:[#allocation8 + $0xe0] sm:$0xff]  ;;  %v2834_v36 = vld [vmem:[#allocation8 + $0xe8] sm:$0xff] }
  0x39   :  { %280 = vmatmul.f32.vlgmr.msra.gmra.mxu2 %v100_v0  ;;  %321 = vmatmul.f32.vlgmr.msra.gmra.mxu3 %v100_v0  ;;  %4290 = vst [vmem:[#allocation21_spill] sm:$0xff] %v2817_v29  ;;  %v2839_v37 = vld [vmem:[#allocation8 + $0xf8] sm:$0xff]  ;;  %v2841_v38 = vld [vmem:[#allocation8 + $0xf0] sm:$0xff]  ;;  %v2847_v40 = vld [vmem:[#allocation8 + $0xc0] sm:$0xff] }
  0x3a   :  { %972 = vmatpush.msrb.mxu0 %v2741_v1  ;;  %992 = vmatpush.msrb.mxu1 %v2743_v2  ;;  %4291 = vst [vmem:[#allocation22_spill] sm:$0xff] %v2819_v30  ;;  %v103_v39 = vld [vmem:[#allocation3 + $0x18] sm:$0xff]  ;;  %v2849_v41 = vld [vmem:[#allocation8 + $0xc8] sm:$0xff]  ;;  %v2855_v43 = vld [vmem:[#allocation8 + $0xd0] sm:$0xff] }
  0x3b   :  { %1032 = vmatpush.msrb.mxu3 %v2745_v3  ;;  %1012 = vmatpush.msrb.mxu2 %v2747_v4  ;;  %4292 = vst [vmem:[#allocation23_spill] sm:$0xff] %v2821_v31  ;;  %v2853_v42 = vld [vmem:[#allocation8 + $0xd8] sm:$0xff]  ;;  %v2857_v44 = vld [vmem:[#allocation8 + $0xa0] sm:$0xff]  ;;  %v2859_v45 = vld [vmem:[#allocation8 + $0xa8] sm:$0xff] }
  0x3c   :  { %973 = vmatpush.msrb.mxu0 %v2749_v5  ;;  %993 = vmatpush.msrb.mxu1 %v2751_v6  ;;  %4293 = vst [vmem:[#allocation24_spill] sm:$0xff] %v2823_v32  ;;  %v2863_v46 = vld [vmem:[#allocation8 + $0xb8] sm:$0xff]  ;;  %v2865_v47 = vld [vmem:[#allocation8 + $0xb0] sm:$0xff]  ;;  %v2868_v48 = vld [vmem:[#allocation8 + $0x80] sm:$0xff] }
  0x3d   :  { %1033 = vmatpush.msrb.mxu3 %v2755_v7  ;;  %1013 = vmatpush.msrb.mxu2 %v2757_v8  ;;  %4294 = vst [vmem:[#allocation25_spill] sm:$0xff] %v2827_v33  ;;  %v2870_v49 = vld [vmem:[#allocation8 + $0x88] sm:$0xff]  ;;  %v2875_v50 = vld [vmem:[#allocation8 + $0x98] sm:$0xff]  ;;  %v2877_v51 = vld [vmem:[#allocation8 + $0x90] sm:$0xff] }
  0x3e   :  { %974 = vmatpush.msrb.mxu0 %v2760_v9  ;;  %994 = vmatpush.msrb.mxu1 %v2762_v10  ;;  %4295 = vst [vmem:[#allocation26_spill] sm:$0xff] %v2829_v34  ;;  %v104_v52 = vld [vmem:[#allocation3 + $0x20] sm:$0xff]  ;;  %v2885_v54 = vld [vmem:[#allocation8 + $0x68] sm:$0xff]  ;;  %v2889_v55 = vld [vmem:[#allocation8 + $0x78] sm:$0xff] }
  0x3f   :  { %1034 = vmatpush.msrb.mxu3 %v2767_v11  ;;  %1014 = vmatpush.msrb.mxu2 %v2769_v12  ;;  %4296 = vst [vmem:[#allocation27_spill] sm:$0xff] %v2832_v35  ;;  %v2883_v53 = vld [vmem:[#allocation8 + $0x60] sm:$0xff]  ;;  %v2891_v56 = vld [vmem:[#allocation8 + $0x70] sm:$0xff]  ;;  %v2895_v58 = vld [vmem:[#allocation8 + $0x48] sm:$0xff] }
  0x40   :  { %201 = vmatmul.f32.gmra.mxu0 %v101_v13  ;;  %242 = vmatmul.f32.gmra.mxu1 %v101_v13  ;;  %4297 = vst [vmem:[#allocation28_spill] sm:$0xff] %v2834_v36  ;;  %v2893_v57 = vld [vmem:[#allocation8 + $0x40] sm:$0xff]  ;;  %v2899_v59 = vld [vmem:[#allocation8 + $0x58] sm:$0xff]  ;;  %v2901_v60 = vld [vmem:[#allocation8 + $0x50] sm:$0xff] }
  0x41   :  { %283 = vmatmul.f32.gmra.mxu2 %v101_v13  ;;  %324 = vmatmul.f32.gmra.mxu3 %v101_v13  ;;  %4298 = vst [vmem:[#allocation29_spill] sm:$0xff] %v2839_v37  ;;  %v2904_v61 = vld [vmem:[#allocation8 + $0x20] sm:$0xff]  ;;  %v2906_v62 = vld [vmem:[#allocation8 + $0x28] sm:$0xff]  ;;  %v2911_v63 = vld [vmem:[#allocation8 + $0x30] sm:$0xff] }
  0x42   :  { %975 = vmatpush.msrb.mxu0 %v2775_v14  ;;  %995 = vmatpush.msrb.mxu1 %v2777_v15  ;;  %4299 = vst [vmem:[#allocation30_spill] sm:$0xff] %v2841_v38  ;;  %v2913_v0 = vld [vmem:[#allocation8 + $0x38] sm:$0xff]  ;;  %v105_v13 = vld [vmem:[#allocation3 + $0x28] sm:$0xff] }
  0x43   :  { %1035 = vmatpush.msrb.mxu3 %v2781_v16  ;;  %1015 = vmatpush.msrb.mxu2 %v2783_v17  ;;  %4300 = vst [vmem:[#allocation31_spill] sm:$0xff] %v2847_v40 }
  0x44   :  { %976 = vmatpush.msrb.mxu0 %v2785_v18  ;;  %996 = vmatpush.msrb.mxu1 %v2787_v19  ;;  %4301 = vst [vmem:[#allocation32_spill] sm:$0xff] %v2849_v41 }
  0x45   :  { %1036 = vmatpush.msrb.mxu3 %v2791_v20  ;;  %1016 = vmatpush.msrb.mxu2 %v2793_v21  ;;  %4302 = vst [vmem:[#allocation33_spill] sm:$0xff] %v2853_v42 }
  0x46   :  { %977 = vmatpush.msrb.mxu0 %v2796_v22  ;;  %997 = vmatpush.msrb.mxu1 %v2798_v23  ;;  %4303 = vst [vmem:[#allocation34_spill] sm:$0xff] %v2855_v43 }
  0x47   :  { %1037 = vmatpush.msrb.mxu3 %v2803_v24  ;;  %1017 = vmatpush.msrb.mxu2 %v2805_v25  ;;  %4304 = vst [vmem:[#allocation35_spill] sm:$0xff] %v2857_v44 }
  0x48   :  { %204 = vmatmul.f32.gmra.mxu0 %v102_v26  ;;  %245 = vmatmul.f32.gmra.mxu1 %v102_v26  ;;  %4305 = vst [vmem:[#allocation36_spill] sm:$0xff] %v2859_v45 }
  0x49   :  { %286 = vmatmul.f32.gmra.mxu2 %v102_v26  ;;  %327 = vmatmul.f32.gmra.mxu3 %v102_v26  ;;  %4306 = vst [vmem:[#allocation37_spill] sm:$0xff] %v2863_v46  ;;  %v2919_v26 = vld [vmem:[#allocation8] sm:$0xff] }
  0x4a   :  { %978 = vmatpush.msrb.mxu0 %v2811_v27  ;;  %998 = vmatpush.msrb.mxu1 %v2813_v28  ;;  %4307 = vst [vmem:[#allocation38_spill] sm:$0xff] %v2865_v47 }
  0x4b   :  { %1038 = vmatpush.msrb.mxu3 %v2817_v29  ;;  %1018 = vmatpush.msrb.mxu2 %v2819_v30  ;;  %4308 = vst [vmem:[#allocation39_spill] sm:$0xff] %v2868_v48 }
  0x4c   :  { %979 = vmatpush.msrb.mxu0 %v2821_v31  ;;  %999 = vmatpush.msrb.mxu1 %v2823_v32  ;;  %4309 = vst [vmem:[#allocation40_spill] sm:$0xff] %v2870_v49 }
  0x4d   :  { %1039 = vmatpush.msrb.mxu3 %v2827_v33  ;;  %1019 = vmatpush.msrb.mxu2 %v2829_v34  ;;  %4310 = vst [vmem:[#allocation41_spill] sm:$0xff] %v2875_v50 }
  0x4e   :  { %980 = vmatpush.msrb.mxu0 %v2832_v35  ;;  %1000 = vmatpush.msrb.mxu1 %v2834_v36  ;;  %4311 = vst [vmem:[#allocation42_spill] sm:$0xff] %v2877_v51 }
  0x4f   :  { %1040 = vmatpush.msrb.mxu3 %v2839_v37  ;;  %1020 = vmatpush.msrb.mxu2 %v2841_v38  ;;  %4312 = vst [vmem:[#allocation43_spill] sm:$0xff] %v2883_v53 }
  0x50   :  { %207 = vmatmul.f32.gmra.mxu0 %v103_v39  ;;  %248 = vmatmul.f32.gmra.mxu1 %v103_v39  ;;  %4313 = vst [vmem:[#allocation44_spill] sm:$0xff] %v2885_v54 }
  0x51   :  { %289 = vmatmul.f32.gmra.mxu2 %v103_v39  ;;  %330 = vmatmul.f32.gmra.mxu3 %v103_v39  ;;  %4314 = vst [vmem:[#allocation45_spill] sm:$0xff] %v2889_v55  ;;  %v2921_v39 = vld [vmem:[#allocation8 + $0x8] sm:$0xff] }
  0x52   :  { %981 = vmatpush.msrb.mxu0 %v2847_v40  ;;  %1001 = vmatpush.msrb.mxu1 %v2849_v41  ;;  %4315 = vst [vmem:[#allocation46_spill] sm:$0xff] %v2891_v56 }
  0x53   :  { %1041 = vmatpush.msrb.mxu3 %v2853_v42  ;;  %1021 = vmatpush.msrb.mxu2 %v2855_v43  ;;  %4316 = vst [vmem:[#allocation47_spill] sm:$0xff] %v2893_v57 }
  0x54   :  { %982 = vmatpush.msrb.mxu0 %v2857_v44  ;;  %1002 = vmatpush.msrb.mxu1 %v2859_v45  ;;  %4317 = vst [vmem:[#allocation48_spill] sm:$0xff] %v2895_v58 }
  0x55   :  { %1042 = vmatpush.msrb.mxu3 %v2863_v46  ;;  %1022 = vmatpush.msrb.mxu2 %v2865_v47  ;;  %4318 = vst [vmem:[#allocation49_spill] sm:$0xff] %v2899_v59 }
  0x56   :  { %983 = vmatpush.msrb.mxu0 %v2868_v48  ;;  %1003 = vmatpush.msrb.mxu1 %v2870_v49  ;;  %4319 = vst [vmem:[#allocation50_spill] sm:$0xff] %v2901_v60 }
  0x57   :  { %1043 = vmatpush.msrb.mxu3 %v2875_v50  ;;  %1023 = vmatpush.msrb.mxu2 %v2877_v51  ;;  %4320 = vst [vmem:[#allocation51_spill] sm:$0xff] %v2904_v61 }
  0x58   :  { %210 = vmatmul.f32.gmra.mxu0 %v104_v52  ;;  %251 = vmatmul.f32.gmra.mxu1 %v104_v52  ;;  %4321 = vst [vmem:[#allocation52_spill] sm:$0xff] %v2906_v62 }
  0x59   :  { %292 = vmatmul.f32.gmra.mxu2 %v104_v52  ;;  %333 = vmatmul.f32.gmra.mxu3 %v104_v52  ;;  %4322 = vst [vmem:[#allocation53_spill] sm:$0xff] %v2911_v63  ;;  %v2925_v52 = vld [vmem:[#allocation8 + $0x10] sm:$0xff] }
  0x5a   :  { %984 = vmatpush.msrb.mxu0 %v2883_v53  ;;  %1004 = vmatpush.msrb.mxu1 %v2885_v54  ;;  %4323 = vst [vmem:[#allocation54_spill] sm:$0xff] %v2913_v0 }
  0x5b   :  { %1044 = vmatpush.msrb.mxu3 %v2889_v55  ;;  %1024 = vmatpush.msrb.mxu2 %v2891_v56  ;;  %4324 = vst [vmem:[#allocation55_spill] sm:$0xff] %v2919_v26 }
  0x5c   :  { %985 = vmatpush.msrb.mxu0 %v2893_v57  ;;  %1005 = vmatpush.msrb.mxu1 %v2895_v58  ;;  %4325 = vst [vmem:[#allocation56_spill] sm:$0xff] %v2921_v39  ;;  %v2927_v58 = vld [vmem:[#allocation8 + $0x18] sm:$0xff] }
  0x5d   :  { %1045 = vmatpush.msrb.mxu3 %v2899_v59  ;;  %1025 = vmatpush.msrb.mxu2 %v2901_v60  ;;  %4326 = vst [vmem:[#allocation57_spill] sm:$0xff] %v2925_v52 }
  0x5e   :  { %986 = vmatpush.msrb.mxu0 %v2904_v61  ;;  %1006 = vmatpush.msrb.mxu1 %v2906_v62  ;;  %4327 = vst [vmem:[#allocation58_spill] sm:$0xff] %v2927_v58 }
  0x5f   :  { %1026 = vmatpush.msrb.mxu2 %v2911_v63  ;;  %1046 = vmatpush.msrb.mxu3 %v2913_v0  ;;  %v106_v0 = vld [vmem:[#allocation3 + $0x30] sm:$0xff] }
  0x60   :  { %213 = vmatmul.f32.gmra.mxu0 %v105_v13  ;;  %254 = vmatmul.f32.gmra.mxu1 %v105_v13 }
  0x61   :  { %295 = vmatmul.f32.gmra.mxu2 %v105_v13  ;;  %336 = vmatmul.f32.gmra.mxu3 %v105_v13  ;;  %v107_v13 = vld [vmem:[#allocation3 + $0x38] sm:$0xff] }
  0x62   :  { %987 = vmatpush.msrb.mxu0 %v2919_v26  ;;  %1007 = vmatpush.msrb.mxu1 %v2921_v39 }
  0x63   :  { %1027 = vmatpush.msrb.mxu2 %v2925_v52  ;;  %1047 = vmatpush.msrb.mxu3 %v2927_v58 }
  0x64   :  { %1123 = vmatpush.msra.mxu0 %v2741_v1  ;;  %1143 = vmatpush.msra.mxu1 %v2743_v2 }
  0x65   :  { %1163 = vmatpush.msra.mxu2 %v2747_v4  ;;  %1183 = vmatpush.msra.mxu3 %v2745_v3 }
  0x66   :  { %1124 = vmatpush.msra.mxu0 %v2749_v5  ;;  %1144 = vmatpush.msra.mxu1 %v2751_v6 }
  0x67   :  { %1164 = vmatpush.msra.mxu2 %v2757_v8  ;;  %1184 = vmatpush.msra.mxu3 %v2755_v7 }
  0x68   :  { %216 = vmatmul.f32.gmra.mxu0 %v106_v0  ;;  %257 = vmatmul.f32.gmra.mxu1 %v106_v0 }
  0x69   :  { %298 = vmatmul.f32.gmra.mxu2 %v106_v0  ;;  %339 = vmatmul.f32.gmra.mxu3 %v106_v0  ;;  %v2689_v0 = vmov 0.0  }
  0x6a   :  { %1125 = vmatpush.msra.mxu0 %v2760_v9  ;;  %1145 = vmatpush.msra.mxu1 %v2762_v10 }
  0x6b   :  { %1165 = vmatpush.msra.mxu2 %v2769_v12  ;;  %1185 = vmatpush.msra.mxu3 %v2767_v11 }
  0x6c   :  { %1126 = vmatpush.msra.mxu0 %v2775_v14  ;;  %1146 = vmatpush.msra.mxu1 %v2777_v15 }
  0x6d   :  { %1166 = vmatpush.msra.mxu2 %v2783_v17  ;;  %1186 = vmatpush.msra.mxu3 %v2781_v16 }
  0x6e   :  { %1127 = vmatpush.msra.mxu0 %v2785_v18  ;;  %1147 = vmatpush.msra.mxu1 %v2787_v19 }
  0x6f   :  { %1167 = vmatpush.msra.mxu2 %v2793_v21  ;;  %1187 = vmatpush.msra.mxu3 %v2791_v20 }
  0x70   :  { %219 = vmatmul.f32.gmra.mxu0 %v107_v13  ;;  %260 = vmatmul.f32.gmra.mxu1 %v107_v13 }
  0x71   :  { %301 = vmatmul.f32.gmra.mxu2 %v107_v13  ;;  %342 = vmatmul.f32.gmra.mxu3 %v107_v13  ;;  %v4328_v13 = vld [vmem:[#allocation48_spill] sm:$0xff] }
  0x72   :  { %1128 = vmatpush.msra.mxu0 %v2796_v22  ;;  %1148 = vmatpush.msra.mxu1 %v2798_v23 }
  0x73   :  { %1168 = vmatpush.msra.mxu2 %v2805_v25  ;;  %1188 = vmatpush.msra.mxu3 %v2803_v24 }
  0x74   :  { %1129 = vmatpush.msra.mxu0 %v2811_v27  ;;  %1149 = vmatpush.msra.mxu1 %v2813_v28 }
  0x75   :  { %1169 = vmatpush.msra.mxu2 %v2819_v30  ;;  %1189 = vmatpush.msra.mxu3 %v2817_v29 }
  0x76   :  { %1130 = vmatpush.msra.mxu0 %v2821_v31  ;;  %1150 = vmatpush.msra.mxu1 %v2823_v32 }
  0x77   :  { %1170 = vmatpush.msra.mxu2 %v2829_v34  ;;  %1190 = vmatpush.msra.mxu3 %v2827_v33 }
  0x78   :  { %988 = vmatmul.f32.vlgmr.msrb.gmra.mxu0 %v2689_v0  ;;  %1008 = vmatmul.f32.vlgmr.msrb.gmra.mxu1 %v2689_v0 }
  0x79   :  { %1028 = vmatmul.f32.vlgmr.msrb.gmra.mxu2 %v2689_v0  ;;  %1048 = vmatmul.f32.vlgmr.msrb.gmra.mxu3 %v2689_v0  ;;  %v4329_v0 = vld [vmem:[#allocation54_spill] sm:$0xff] }
  0x7a   :  { %1131 = vmatpush.msra.mxu0 %v2832_v35  ;;  %1151 = vmatpush.msra.mxu1 %v2834_v36 }
  0x7b   :  { %1171 = vmatpush.msra.mxu2 %v2841_v38  ;;  %1191 = vmatpush.msra.mxu3 %v2839_v37 }
  0x7c   :  { %1132 = vmatpush.msra.mxu0 %v2847_v40  ;;  %1152 = vmatpush.msra.mxu1 %v2849_v41 }
  0x7d   :  { %1172 = vmatpush.msra.mxu2 %v2855_v43  ;;  %1192 = vmatpush.msra.mxu3 %v2853_v42 }
  0x7e   :  { %1133 = vmatpush.msra.mxu0 %v2857_v44  ;;  %1153 = vmatpush.msra.mxu1 %v2859_v45 }
  0x7f   :  { %1173 = vmatpush.msra.mxu2 %v2865_v47  ;;  %1193 = vmatpush.msra.mxu3 %v2863_v46 }
  0x80   :  { %1134 = vmatpush.msra.mxu0 %v2868_v48  ;;  %1154 = vmatpush.msra.mxu1 %v2870_v49 }
  0x81   :  { %1174 = vmatpush.msra.mxu2 %v2877_v51  ;;  %1194 = vmatpush.msra.mxu3 %v2875_v50 }
  0x82   :  { %1135 = vmatpush.msra.mxu0 %v2883_v53  ;;  %1155 = vmatpush.msra.mxu1 %v2885_v54 }
  0x83   :  { %1175 = vmatpush.msra.mxu2 %v2891_v56  ;;  %1195 = vmatpush.msra.mxu3 %v2889_v55 }
  0x84   :  { %1136 = vmatpush.msra.mxu0 %v2893_v57  ;;  %1156 = vmatpush.msra.mxu1 %v4328_v13 }
  0x85   :  { %1176 = vmatpush.msra.mxu2 %v2901_v60  ;;  %1196 = vmatpush.msra.mxu3 %v2899_v59 }
  0x86   :  { %1137 = vmatpush.msra.mxu0 %v2904_v61  ;;  %1157 = vmatpush.msra.mxu1 %v2906_v62 }
  0x87   :  { %1177 = vmatpush.msra.mxu2 %v2911_v63  ;;  %1197 = vmatpush.msra.mxu3 %v4329_v0 }
  0x88   :  { %1138 = vmatpush.msra.mxu0 %v2919_v26  ;;  %1158 = vmatpush.msra.mxu1 %v2921_v39 }
  0x89   :  { %1178 = vmatpush.msra.mxu2 %v2925_v52  ;;  %1198 = vmatpush.msra.mxu3 %v2927_v58 }
  0x8a   :  { %1274 = vmatpush.msrb.mxu0 %v2741_v1  ;;  %1294 = vmatpush.msrb.mxu1 %v2743_v2 }
  0x8b   :  { %1314 = vmatpush.msrb.mxu2 %v2747_v4  ;;  %1334 = vmatpush.msrb.mxu3 %v2745_v3 }
  0x8c   :  { %1275 = vmatpush.msrb.mxu0 %v2749_v5  ;;  %1295 = vmatpush.msrb.mxu1 %v2751_v6 }
  0x8d   :  { %1315 = vmatpush.msrb.mxu2 %v2757_v8  ;;  %1335 = vmatpush.msrb.mxu3 %v2755_v7 }
  0x8e   :  { %1276 = vmatpush.msrb.mxu0 %v2760_v9  ;;  %1296 = vmatpush.msrb.mxu1 %v2762_v10 }
  0x8f   :  { %1316 = vmatpush.msrb.mxu2 %v2769_v12  ;;  %1336 = vmatpush.msrb.mxu3 %v2767_v11 }
  0x90   :  { %1277 = vmatpush.msrb.mxu0 %v2775_v14  ;;  %1297 = vmatpush.msrb.mxu1 %v2777_v15 }
  0x91   :  { %1317 = vmatpush.msrb.mxu2 %v2783_v17  ;;  %1337 = vmatpush.msrb.mxu3 %v2781_v16 }
  0x92   :  { %1278 = vmatpush.msrb.mxu0 %v2785_v18  ;;  %1298 = vmatpush.msrb.mxu1 %v2787_v19 }
  0x93   :  { %1318 = vmatpush.msrb.mxu2 %v2793_v21  ;;  %1338 = vmatpush.msrb.mxu3 %v2791_v20 }
  0x94   :  { %1279 = vmatpush.msrb.mxu0 %v2796_v22  ;;  %1299 = vmatpush.msrb.mxu1 %v2798_v23 }
  0x95   :  { %1319 = vmatpush.msrb.mxu2 %v2805_v25  ;;  %1339 = vmatpush.msrb.mxu3 %v2803_v24 }
  0x96   :  { %1280 = vmatpush.msrb.mxu0 %v2811_v27  ;;  %1300 = vmatpush.msrb.mxu1 %v2813_v28 }
  0x97   :  { %1320 = vmatpush.msrb.mxu2 %v2819_v30  ;;  %1340 = vmatpush.msrb.mxu3 %v2817_v29 }
  0x98   :  { %1281 = vmatpush.msrb.mxu0 %v2821_v31  ;;  %1301 = vmatpush.msrb.mxu1 %v2823_v32 }
  0x99   :  { %1321 = vmatpush.msrb.mxu2 %v2829_v34  ;;  %1341 = vmatpush.msrb.mxu3 %v2827_v33 }
  0x9a   :  { %1282 = vmatpush.msrb.mxu0 %v2832_v35  ;;  %1302 = vmatpush.msrb.mxu1 %v2834_v36 }
  0x9b   :  { %1322 = vmatpush.msrb.mxu2 %v2841_v38  ;;  %1342 = vmatpush.msrb.mxu3 %v2839_v37 }
  0x9c   :  { %1283 = vmatpush.msrb.mxu0 %v2847_v40  ;;  %1303 = vmatpush.msrb.mxu1 %v2849_v41 }
  0x9d   :  { %1323 = vmatpush.msrb.mxu2 %v2855_v43  ;;  %1343 = vmatpush.msrb.mxu3 %v2853_v42 }
  0x9e   :  { %1284 = vmatpush.msrb.mxu0 %v2857_v44  ;;  %1304 = vmatpush.msrb.mxu1 %v2859_v45  ;;  %v172_v45 = vld [vmem:[#allocation9] sm:$0xf] }
  0x9f   :  { %1324 = vmatpush.msrb.mxu2 %v2865_v47  ;;  %1344 = vmatpush.msrb.mxu3 %v2863_v46  ;;  %v174_v44 = vperm.slane %v172_v45, 0  ;;  %v175_v42 = vperm.slane %v172_v45, 1  ;;  %v3077_v35 = vperm.slane %v172_v45, 2  ;;  %v3079_v33 = vperm.slane %v172_v45, 3 }
  0xa0   :  { %1285 = vmatpush.msrb.mxu0 %v2868_v48  ;;  %1305 = vmatpush.msrb.mxu1 %v2870_v49 }
  0xa1   :  { %1325 = vmatpush.msrb.mxu2 %v2877_v51  ;;  %1345 = vmatpush.msrb.mxu3 %v2875_v50 }
  0xa2   :  { %1286 = vmatpush.msrb.mxu0 %v2883_v53  ;;  %1306 = vmatpush.msrb.mxu1 %v2885_v54 }
  0xa3   :  { %1326 = vmatpush.msrb.mxu2 %v2891_v56  ;;  %1346 = vmatpush.msrb.mxu3 %v2889_v55 }
  0xa4   :  { %1287 = vmatpush.msrb.mxu0 %v2893_v57  ;;  %1307 = vmatpush.msrb.mxu1 %v4328_v13 }
  0xa5   :  { %1327 = vmatpush.msrb.mxu2 %v2901_v60  ;;  %1347 = vmatpush.msrb.mxu3 %v2899_v59 }
  0xa6   :  { %1288 = vmatpush.msrb.mxu0 %v2904_v61  ;;  %1308 = vmatpush.msrb.mxu1 %v2906_v62 }
  0xa7   :  { %1328 = vmatpush.msrb.mxu2 %v2911_v63  ;;  %1348 = vmatpush.msrb.mxu3 %v4329_v0 }
  0xa8   :  { %1289 = vmatpush.msrb.mxu0 %v2919_v26  ;;  %1309 = vmatpush.msrb.mxu1 %v2921_v39 }
  0xa9   :  { %1329 = vmatpush.msrb.mxu2 %v2925_v52  ;;  %1349 = vmatpush.msrb.mxu3 %v2927_v58 }
  0xb5   :  { %v199_v13 = vpop.f32.mrf.mxu0  ;;  %v240_v60 = vpop.f32.mrf.mxu1 }
  0xb6   :  { %v3083_v32 = vadd.f32 %v199_v13, %v174_v44 }
  0xb8   :  { %4334 = vst [vmem:[#allocation63_spill] sm:$0xff] %v3083_v32 }
  0xbc   :  { %v3061_v57 = vpop.f32.mrf.mxu2  ;;  %v322_v59 = vpop.f32.mrf.mxu3 }
  0xbd   :  { %v202_v61 = vpop.f32.mrf.mxu0  ;;  %v243_v55 = vpop.f32.mrf.mxu1  ;;  %v3100_v13 = vadd.f32 %v322_v59, %v3079_v33 }
  0xbe   :  { %v3071_v43 = vadd.f32 %v202_v61, %v174_v44  ;;  %v3073_v40 = vadd.f32 %v243_v55, %v175_v42  ;;  %v3085_v61 = vadd.f32 %v240_v60, %v175_v42 }
  0xc0   :  { %4330 = vst [vmem:[#allocation59_spill] sm:$0xff] %v3071_v43  ;;  %v399_v30 = vrot.slane %v3073_v40, 7 }
  0xc1   :  { %4331 = vst [vmem:[#allocation60_spill] sm:$0xff] %v3073_v40 }
  0xc2   :  { %4335 = vst [vmem:[#allocation64_spill] sm:$0xff] %v3085_v61 }
  0xc4   :  { %v3063_v62 = vpop.f32.mrf.mxu2  ;;  %v325_v63 = vpop.f32.mrf.mxu3 }
  0xc5   :  { %v205_v56 = vpop.f32.mrf.mxu0  ;;  %v246_v0 = vpop.f32.mrf.mxu1  ;;  %v3093_v29 = vadd.f32 %v325_v63, %v3079_v33 }
  0xc6   :  { %v3075_v37 = vadd.f32 %v205_v56, %v174_v44  ;;  %v3081_v34 = vadd.f32 %v246_v0, %v175_v42  ;;  %v378_v56 = vrot.slane %v3071_v43, 7 }
  0xc7   :  { %4337 = vst [vmem:[#allocation66_spill] sm:$0xff] %v3093_v29 }
  0xc8   :  { %4332 = vst [vmem:[#allocation61_spill] sm:$0xff] %v3075_v37  ;;  %v381_v0 = vrot.slane %v3075_v37, 6  ;;  %v380_v59 = vsel %vm379_vm0, %v378_v56, %v3083_v32 }
  0xc9   :  { %4333 = vst [vmem:[#allocation62_spill] sm:$0xff] %v3081_v34 }
  0xcc   :  { %v3065_v54 = vpop.f32.mrf.mxu2  ;;  %v328_v26 = vpop.f32.mrf.mxu3 }
  0xcd   :  { %v208_v39 = vpop.f32.mrf.mxu0  ;;  %v249_v53 = vpop.f32.mrf.mxu1 }
  0xce   :  { %v3087_v31 = vadd.f32 %v208_v39, %v174_v44  ;;  %v3095_v45 = vadd.f32 %v249_v53, %v175_v42  ;;  %v401_v53 = vrot.slane %v3081_v34, 6 }
  0xd0   :  { %4336 = vst [vmem:[#allocation65_spill] sm:$0xff] %v3087_v31  ;;  %v403_v24 = vrot.slane %v3095_v45, 5 }
  0xd1   :  { %4338 = vst [vmem:[#allocation67_spill] sm:$0xff] %v3095_v45 }
  0xd4   :  { %v3067_v52 = vpop.f32.mrf.mxu2  ;;  %v331_v58 = vpop.f32.mrf.mxu3 }
  0xd5   :  { %v211_v50 = vpop.f32.mrf.mxu0  ;;  %v252_v51 = vpop.f32.mrf.mxu1  ;;  %v3136_v45 = vadd.f32 %v331_v58, %v3079_v33 }
  0xd6   :  { %v3102_v60 = vadd.f32 %v211_v50, %v174_v44  ;;  %v3104_v39 = vadd.f32 %v252_v51, %v175_v42  ;;  %v384_v50 = vrot.slane %v3087_v31, 5  ;;  %v3130_v31 = vadd.f32 %v328_v26, %v3079_v33 }
  0xd8   :  { %4339 = vst [vmem:[#allocation68_spill] sm:$0xff] %v3102_v60  ;;  %v387_v25 = vrot.slane %v3102_v60, 4  ;;  %v405_v56 = vrot.slane %v3104_v39, 4 }
  0xd9   :  { %4340 = vst [vmem:[#allocation69_spill] sm:$0xff] %v3104_v39 }
  0xdc   :  { %v334_v49 = vpop.f32.mrf.mxu3  ;;  %v3069_v47 = vpop.f32.mrf.mxu2 }
  0xdd   :  { %v214_v48 = vpop.f32.mrf.mxu0  ;;  %v255_v46 = vpop.f32.mrf.mxu1 }
  0xde   :  { %v3106_v28 = vadd.f32 %v214_v48, %v174_v44  ;;  %v3108_v43 = vadd.f32 %v255_v46, %v175_v42  ;;  %v383_v48 = vsel %vm382_vm1, %v381_v0, %v380_v59  ;;  %v400_v46 = vsel %vm379_vm0, %v399_v30, %v3085_v61 }
  0xdf   :  { %v402_v59 = vsel %vm382_vm1, %v401_v53, %v400_v46 }
  0xe0   :  { %4341 = vst [vmem:[#allocation70_spill] sm:$0xff] %v3106_v28  ;;  %v390_v0 = vrot.slane %v3106_v28, 3  ;;  %v407_v30 = vrot.slane %v3108_v43, 3 }
  0xe1   :  { %4342 = vst [vmem:[#allocation71_spill] sm:$0xff] %v3108_v43 }
  0xe4   :  { %v337_v41 = vpop.f32.mrf.mxu3  ;;  %v3089_v55 = vpop.f32.mrf.mxu2 }
  0xe5   :  { %v217_v38 = vpop.f32.mrf.mxu0  ;;  %v258_v36 = vpop.f32.mrf.mxu1  ;;  %v3148_v46 = vadd.f32 %v337_v41, %v3079_v33 }
  0xe6   :  { %v3111_v63 = vadd.f32 %v217_v38, %v174_v44  ;;  %v3113_v37 = vadd.f32 %v258_v36, %v175_v42  ;;  %v427_v38 = vrot.slane %v3093_v29, 7  ;;  %v404_v29 = vsel %vm385_vm2, %v403_v24, %v402_v59 }
  0xe7   :  { %v429_v24 = vrot.slane %v3130_v31, 6 }
  0xe8   :  { %4343 = vst [vmem:[#allocation72_spill] sm:$0xff] %v3111_v63 }
  0xe9   :  { %4344 = vst [vmem:[#allocation73_spill] sm:$0xff] %v3113_v37 }
  0xec   :  { %v340_v40 = vpop.f32.mrf.mxu3  ;;  %v299_v58 = vpop.f32.mrf.mxu2 }
  0xed   :  { %v220_v51 = vpop.f32.mrf.mxu0  ;;  %v261_v27 = vpop.f32.mrf.mxu1 }
  0xee   :  { %v3123_v34 = vadd.f32 %v220_v51, %v174_v44  ;;  %v3125_v36 = vadd.f32 %v261_v27, %v175_v42  ;;  %v386_v44 = vsel %vm385_vm2, %v384_v50, %v383_v48  ;;  %v393_v27 = vrot.slane %v3111_v63, 2 }
  0xef   :  { %v409_v42 = vrot.slane %v3113_v37, 2  ;;  %v3142_v51 = vadd.f32 %v334_v49, %v3079_v33  ;;  %v389_v43 = vsel %vm388_vm3, %v387_v25, %v386_v44  ;;  %v406_v50 = vsel %vm388_vm3, %v405_v56, %v404_v29 }
  0xf0   :  { %4345 = vst [vmem:[#allocation74_spill] sm:$0xff] %v3123_v34  ;;  %v396_v26 = vrot.slane %v3123_v34, 1  ;;  %v411_v53 = vrot.slane %v3125_v36, 1  ;;  %v3153_v48 = vadd.f32 %v340_v40, %v3079_v33  ;;  %v392_v49 = vsel %vm391_vm4, %v390_v0, %v389_v43 }
  0xf1   :  { %4346 = vst [vmem:[#allocation75_spill] sm:$0xff] %v3125_v36  ;;  %v408_v34 = vsel %vm391_vm4, %v407_v30, %v406_v50  ;;  %v395_v36 = vsel %vm394_vm5, %v393_v27, %v392_v49  ;;  %v431_v25 = vrot.slane %v3136_v45, 5  ;;  %v433_v0 = vrot.slane %v3142_v51, 4 }
  0xf2   :  { %v410_v41 = vsel %vm394_vm5, %v409_v42, %v408_v34  ;;  %v398_v29 = vsel %vm397_vm6, %v396_v26, %v395_v36  ;;  %v428_v27 = vsel %vm379_vm0, %v427_v38, %v3100_v13  ;;  %v435_v34 = vrot.slane %v3148_v46, 3 }
  0xf3   :  { %v412_v43 = vsel %vm397_vm6, %v411_v53, %v410_v41  ;;  %v430_v42 = vsel %vm382_vm1, %v429_v24, %v428_v27  ;;  %v3177_v41 = vadd.f32 %v3063_v62, %v3077_v35  ;;  %v3182_v24 = vadd.f32 %v3065_v54, %v3077_v35 }
  0xf4   :  { %v343_v59 = vpop.f32.mrf.mxu3  ;;  %v432_v36 = vsel %vm385_vm2, %v431_v25, %v430_v42  ;;  %v3187_v25 = vadd.f32 %v3067_v52, %v3077_v35  ;;  %v3192_v62 = vadd.f32 %v3069_v47, %v3077_v35  ;;  %v3196_v54 = vadd.f32 %v3061_v57, %v3077_v35 }
  0xf5   :  { %v3162_v44 = vadd.f32 %v343_v59, %v3079_v33  ;;  %v989_v40 = vpop.f32.mrf.mxu0  ;;  %v1009_v56 = vpop.f32.mrf.mxu1  ;;  %v437_v33 = vrot.slane %v3153_v48, 2  ;;  %v434_v53 = vsel %vm388_vm3, %v433_v0, %v432_v36  ;;  %4347 = vst [vmem:[#allocation76_spill] sm:$0xff] %v3177_v41  ;;  %v413_v52 = vrot.slane %v3177_v41, 7 }
  0xf6   :  { %v1052_v30 = vadd.f32 %v989_v40, %v398_v29  ;;  %v1053_v50 = vadd.f32 %v1009_v56, %v412_v43  ;;  %v436_v38 = vsel %vm391_vm4, %v435_v34, %v434_v53  ;;  %4348 = vst [vmem:[#allocation77_spill] sm:$0xff] %v3182_v24  ;;  %v302_v40 = vpop.f32.mrf.mxu2  ;;  %v415_v27 = vrot.slane %v3182_v24, 6 }
  0xf7   :  { %v439_v26 = vrot.slane %v3162_v44, 1  ;;  %v438_v29 = vsel %vm394_vm5, %v437_v33, %v436_v38  ;;  %4349 = vst [vmem:[#allocation78_spill] sm:$0xff] %v3187_v25  ;;  %v3208_v47 = vadd.f32 %v302_v40, %v3077_v35  ;;  %v417_v33 = vrot.slane %v3187_v25, 5 }
  0xf8   :  { %v2236_v49 = vmul.f32 -1.442695, %v1052_v30  ;;  %v2237_v59 = vmul.f32 -1.442695, %v1053_v50  ;;  %4350 = vst [vmem:[#allocation79_spill] sm:$0xff] %v3192_v62  ;;  %v3200_v30 = vadd.f32 %v3089_v55, %v3077_v35  ;;  %v3204_v50 = vadd.f32 %v299_v58, %v3077_v35 }
  0xf9   :  { %v440_v43 = vsel %vm397_vm6, %v439_v26, %v438_v29  ;;  %4351 = vst [vmem:[#allocation80_spill] sm:$0xff] %v3196_v54  ;;  %v414_v36 = vsel %vm379_vm0, %v413_v52, %v3196_v54  ;;  %v425_v38 = vrot.slane %v3208_v47, 1 }
  0xfa   :  { %2272 = vpow2.f32 %v2236_v49  ;;  %4352 = vst [vmem:[#allocation81_spill] sm:$0xff] %v3200_v30  ;;  %v421_v58 = vrot.slane %v3200_v30, 3  ;;  %v416_v26 = vsel %vm382_vm1, %v415_v27, %v414_v36  ;;  %v423_v53 = vrot.slane %v3204_v50, 2 }
  0xfb   :  { %2274 = vpow2.f32 %v2237_v59  ;;  %4353 = vst [vmem:[#allocation82_spill] sm:$0xff] %v3204_v50  ;;  %v419_v59 = vrot.slane %v3192_v62, 4  ;;  %v418_v35 = vsel %vm385_vm2, %v417_v33, %v416_v26 }
  0xfc   :  { %v1049_v56 = vpop.f32.mrf.mxu3  ;;  %4354 = vst [vmem:[#allocation83_spill] sm:$0xff] %v3208_v47 }
  0xfd   :  { %v1055_v0 = vadd.f32 %v1049_v56, %v440_v43  ;;  %v420_v29 = vsel %vm388_vm3, %v419_v59, %v418_v35 }
  0xfe   :  { %v422_v40 = vsel %vm391_vm4, %v421_v58, %v420_v29  ;;  %v1029_v43 = vpop.f32.mrf.mxu2 }
  0xff   :  { %v2238_v34 = vmul.f32 -1.442695, %v1055_v0  ;;  %v424_v0 = vsel %vm394_vm5, %v423_v53, %v422_v40 }
 0x100   :  { %v2273_v42 = vpop.eup %2272  ;;  %v426_v52 = vsel %vm397_vm6, %v425_v38, %v424_v0 }
 0x101   :  { %v2275_v57 = vpop.eup %2274  ;;  %v1059_v49 = vadd.f32 1.0, %v2273_v42  ;;  %2276 = vpow2.f32 %v2238_v34  ;;  %v1054_v27 = vadd.f32 %v1029_v43, %v426_v52 }
 0x102   :  { %v1078_v55 = vadd.f32 1.0, %v2275_v57 }
 0x103   :  { %2278 = vrcp.f32 %v1059_v49  ;;  %v1071_v47 = vand.u32 2147483648, %v1059_v49  ;;  %v1069_v58 = vand.u32 2147483647, %v1059_v49  ;;  %vm1065_vm9 = vweird.f32 %v1059_v49 }
 0x104   :  { %2280 = vrcp.f32 %v1078_v55  ;;  %v1090_v59 = vand.u32 2147483648, %v1078_v55  ;;  %v1088_v53 = vand.u32 2147483647, %v1078_v55  ;;  %vm1084_vm10 = vweird.f32 %v1078_v55 }
 0x105   :  { %v1072_v43 = vor.u32 1.1754944e-38, %v1071_v47  ;;  %vm1070_vm12 = vcmp.eq.f32.partialorder %v1069_v58, 8.507059e+37 }
 0x106   :  { %v1091_v52 = vor.u32 1.1754944e-38, %v1090_v59  ;;  %vm1089_vm14 = vcmp.eq.f32.partialorder %v1088_v53, 8.507059e+37  ;;  %v4382_v53 = vld [vmem:[#allocation44_spill] sm:$0xff] }
 0x107   :  { %v2277_v56 = vpop.eup %2276 }
 0x108   :  { %v1098_v34 = vadd.f32 1.0, %v2277_v56 }
 0x109   :  { %v2279_v42 = vpop.eup %2278 }
 0x10a   :  { %v2281_v57 = vpop.eup %2280  ;;  %v1061_v36 = vmul.f32 %v2279_v42, %v1059_v49  ;;  %2282 = vrcp.f32 %v1098_v34  ;;  %vm1066_vm7 = vweird.f32 %v2279_v42  ;;  %v1110_v47 = vand.u32 2147483648, %v1098_v34 }
 0x10b   :  { %v1080_v50 = vmul.f32 %v2281_v57, %v1078_v55  ;;  %2284 = vtanh.f32 %v1054_v27  ;;  %vm1085_vm8 = vweird.f32 %v2281_v57  ;;  %vm1067_vm11 = vmor %vm1065_vm9, %vm1066_vm7  ;;  %vm1104_vm7 = vweird.f32 %v1098_v34 }
 0x10c   :  { %v1062_v33 = vsub.f32 1.0, %v1061_v36  ;;  %vm1086_vm13 = vmor %vm1084_vm10, %vm1085_vm8  ;;  %v1108_v55 = vand.u32 2147483647, %v1098_v34  ;;  %v1111_v59 = vor.u32 1.1754944e-38, %v1110_v47  ;;  %v4395_v47 = vld [vmem:[#allocation57_spill] sm:$0xff] }
 0x10d   :  { %v1081_v26 = vsub.f32 1.0, %v1080_v50 }
 0x10e   :  { %v1063_v35 = vmul.f32 %v2279_v42, %v1062_v33  ;;  %vm1109_vm8 = vcmp.eq.f32.partialorder %v1108_v55, 8.507059e+37  ;;  %v4396_v55 = vld [vmem:[#allocation58_spill] sm:$0xff] }
 0x10f   :  { %v1082_v29 = vmul.f32 %v2281_v57, %v1081_v26 }
 0x110   :  { %v2283_v40 = vpop.eup %2282  ;;  %v1064_v38 = vadd.f32 %v2279_v42, %v1063_v35 }
 0x111   :  { %v1083_v56 = vadd.f32 %v2281_v57, %v1082_v29  ;;  %v1100_v0 = vmul.f32 %v2283_v40, %v1098_v34  ;;  %v2285_v50 = vpop.eup %2284  ;;  %vm1105_vm15 = vweird.f32 %v2283_v40  ;;  %v4381_v34 = vld [vmem:[#allocation43_spill] sm:$0xff] }
 0x112   :  { %v1068_v36 = vsel %vm1067_vm11, %v2279_v42, %v1064_v38  ;;  %vm1106_vm9 = vmor %vm1104_vm7, %vm1105_vm15  ;;  %v4384_v38 = vld [vmem:[#allocation45_spill] sm:$0xff] }
 0x113   :  { %v1073_v27 = vsel %vm1070_vm12, %v1072_v43, %v1068_v36  ;;  %v1087_v33 = vsel %vm1086_vm13, %v2281_v57, %v1083_v56  ;;  %v1101_v30 = vsub.f32 1.0, %v1100_v0  ;;  %v4385_v43 = vld [vmem:[#allocation47_spill] sm:$0xff]  ;;  %v4386_v56 = vld [vmem:[#allocation48_spill] sm:$0xff]  ;;  %v4387_v0 = vld [vmem:[#allocation50_spill] sm:$0xff] }
 0x114   :  { %v1092_v26 = vsel %vm1089_vm14, %v1091_v52, %v1087_v33  ;;  %v1115_v62 = vmul.f32 %v2285_v50, %v1073_v27  ;;  %v4388_v52 = vld [vmem:[#allocation49_spill] sm:$0xff]  ;;  %v4389_v36 = vld [vmem:[#allocation51_spill] sm:$0xff]  ;;  %v4390_v50 = vld [vmem:[#allocation52_spill] sm:$0xff] }
 0x115   :  { %v1114_v25 = vmul.f32 0.0, %v1092_v26  ;;  %v1102_v41 = vmul.f32 %v2283_v40, %v1101_v30  ;;  %v4380_v30 = vld [vmem:[#allocation41_spill] sm:$0xff]  ;;  %v4392_v33 = vld [vmem:[#allocation54_spill] sm:$0xff]  ;;  %v4393_v26 = vld [vmem:[#allocation55_spill] sm:$0xff] }
 0x116   :  { %v4391_v27 = vld [vmem:[#allocation53_spill] sm:$0xff] }
 0x117   :  { %v3223_v35 = vadd.f32 %v1115_v62, %v1114_v25  ;;  %v1103_v49 = vadd.f32 %v2283_v40, %v1102_v41  ;;  %v4377_v41 = vld [vmem:[#allocation39_spill] sm:$0xff]  ;;  %v4378_v25 = vld [vmem:[#allocation40_spill] sm:$0xff]  ;;  %v4379_v62 = vld [vmem:[#allocation42_spill] sm:$0xff] }
 0x119   :  { %2286 = vtanh.f32 %v3223_v35  ;;  %v1107_v42 = vsel %vm1106_vm9, %v2283_v40, %v1103_v49  ;;  %v4383_v40 = vld [vmem:[#allocation46_spill] sm:$0xff]  ;;  %v4394_v49 = vld [vmem:[#allocation56_spill] sm:$0xff] }
 0x11a   :  { %v1112_v58 = vsel %vm1109_vm8, %v1111_v59, %v1107_v42  ;;  %v4397_v42 = vld [vmem:[#allocation61_spill] sm:$0xff] }
 0x11b   :  { %v451_v59 = vrot.slane %v4397_v42, 7 }
 0x11f   :  { %v2287_v57 = vpop.eup %2286 }
 0x120   :  { %v1118_v29 = vmul.f32 %v2287_v57, %v1112_v58  ;;  %v4398_v57 = vld [vmem:[#allocation62_spill] sm:$0xff] }
 0x121   :  { %v465_v58 = vrot.slane %v4398_v57, 7 }
 0x122   :  { %1139 = vmatmul.f32.vlgmr.msra.gmra.mxu0 %v1118_v29  ;;  %1159 = vmatmul.f32.vlgmr.msra.gmra.mxu1 %v1118_v29 }
 0x123   :  { %1179 = vmatmul.f32.vlgmr.msra.gmra.mxu2 %v1118_v29  ;;  %1199 = vmatmul.f32.vlgmr.msra.gmra.mxu3 %v1118_v29  ;;  %v449_v29 = vrot.slane %v3083_v32, 1 }
 0x124   :  { %1425 = vmatpush.msra.mxu0 %v2741_v1  ;;  %1445 = vmatpush.msra.mxu1 %v2743_v2  ;;  %v4355_v1 = vld [vmem:[#allocation18_spill] sm:$0xff]  ;;  %v4356_v2 = vld [vmem:[#allocation17_spill] sm:$0xff] }
 0x125   :  { %1465 = vmatpush.msra.mxu2 %v2747_v4  ;;  %1485 = vmatpush.msra.mxu3 %v2745_v3  ;;  %v4357_v3 = vld [vmem:[#allocation19_spill] sm:$0xff]  ;;  %v4358_v4 = vld [vmem:[#allocation20_spill] sm:$0xff] }
 0x126   :  { %1426 = vmatpush.msra.mxu0 %v2749_v5  ;;  %1446 = vmatpush.msra.mxu1 %v2751_v6  ;;  %v4359_v5 = vld [vmem:[#allocation22_spill] sm:$0xff]  ;;  %v4360_v6 = vld [vmem:[#allocation21_spill] sm:$0xff] }
 0x127   :  { %1466 = vmatpush.msra.mxu2 %v2757_v8  ;;  %1486 = vmatpush.msra.mxu3 %v2755_v7  ;;  %v4361_v7 = vld [vmem:[#allocation23_spill] sm:$0xff]  ;;  %v4362_v8 = vld [vmem:[#allocation24_spill] sm:$0xff] }
 0x128   :  { %1427 = vmatpush.msra.mxu0 %v2760_v9  ;;  %1447 = vmatpush.msra.mxu1 %v2762_v10  ;;  %v4363_v9 = vld [vmem:[#allocation26_spill] sm:$0xff]  ;;  %v4364_v10 = vld [vmem:[#allocation25_spill] sm:$0xff] }
 0x129   :  { %1467 = vmatpush.msra.mxu2 %v2769_v12  ;;  %1487 = vmatpush.msra.mxu3 %v2767_v11  ;;  %v4365_v11 = vld [vmem:[#allocation27_spill] sm:$0xff]  ;;  %v4366_v12 = vld [vmem:[#allocation28_spill] sm:$0xff] }
 0x12a   :  { %1428 = vmatpush.msra.mxu0 %v2775_v14  ;;  %1448 = vmatpush.msra.mxu1 %v2777_v15  ;;  %v4367_v14 = vld [vmem:[#allocation30_spill] sm:$0xff]  ;;  %v4368_v15 = vld [vmem:[#allocation29_spill] sm:$0xff] }
 0x12b   :  { %1468 = vmatpush.msra.mxu2 %v2783_v17  ;;  %1488 = vmatpush.msra.mxu3 %v2781_v16  ;;  %v4369_v16 = vld [vmem:[#allocation31_spill] sm:$0xff]  ;;  %v4370_v17 = vld [vmem:[#allocation32_spill] sm:$0xff] }
 0x12c   :  { %1429 = vmatpush.msra.mxu0 %v2785_v18  ;;  %1449 = vmatpush.msra.mxu1 %v2787_v19  ;;  %v4371_v18 = vld [vmem:[#allocation34_spill] sm:$0xff]  ;;  %v4372_v19 = vld [vmem:[#allocation33_spill] sm:$0xff] }
 0x12d   :  { %1469 = vmatpush.msra.mxu2 %v2793_v21  ;;  %1489 = vmatpush.msra.mxu3 %v2791_v20  ;;  %v4373_v20 = vld [vmem:[#allocation35_spill] sm:$0xff]  ;;  %v4374_v21 = vld [vmem:[#allocation36_spill] sm:$0xff] }
 0x12e   :  { %1430 = vmatpush.msra.mxu0 %v2796_v22  ;;  %1450 = vmatpush.msra.mxu1 %v2798_v23  ;;  %v4375_v22 = vld [vmem:[#allocation38_spill] sm:$0xff]  ;;  %v4376_v23 = vld [vmem:[#allocation37_spill] sm:$0xff] }
 0x12f   :  { %1470 = vmatpush.msra.mxu2 %v4355_v1  ;;  %1490 = vmatpush.msra.mxu3 %v4356_v2  ;;  %v4399_v1 = vld [vmem:[#allocation65_spill] sm:$0xff] }
 0x130   :  { %1431 = vmatpush.msra.mxu0 %v4357_v3  ;;  %1451 = vmatpush.msra.mxu1 %v4358_v4  ;;  %v453_v2 = vrot.slane %v4399_v1, 6  ;;  %v463_v3 = vrot.slane %v3085_v61, 1  ;;  %v4400_v4 = vld [vmem:[#allocation67_spill] sm:$0xff] }
 0x131   :  { %1471 = vmatpush.msra.mxu2 %v4359_v5  ;;  %1491 = vmatpush.msra.mxu3 %v4360_v6  ;;  %v467_v5 = vrot.slane %v4400_v4, 6  ;;  %v455_v6 = vrot.slane %v3102_v60, 5 }
 0x132   :  { %1432 = vmatpush.msra.mxu0 %v4361_v7  ;;  %1452 = vmatpush.msra.mxu1 %v4362_v8  ;;  %v469_v7 = vrot.slane %v3104_v39, 5  ;;  %v4401_v8 = vld [vmem:[#allocation59_spill] sm:$0xff] }
 0x133   :  { %1472 = vmatpush.msra.mxu2 %v4363_v9  ;;  %1492 = vmatpush.msra.mxu3 %v4364_v10  ;;  %v450_v9 = vsel %vm379_vm0, %v4401_v8, %v449_v29  ;;  %v457_v10 = vrot.slane %v3106_v28, 4  ;;  %v501_v29 = vrot.slane %v3153_v48, 3 }
 0x134   :  { %1433 = vmatpush.msra.mxu0 %v4365_v11  ;;  %1453 = vmatpush.msra.mxu1 %v4366_v12  ;;  %v4402_v11 = vld [vmem:[#allocation60_spill] sm:$0xff] }
 0x135   :  { %1473 = vmatpush.msra.mxu2 %v4367_v14  ;;  %1493 = vmatpush.msra.mxu3 %v4368_v15  ;;  %v464_v12 = vsel %vm379_vm0, %v4402_v11, %v463_v3  ;;  %v4403_v14 = vld [vmem:[#allocation71_spill] sm:$0xff] }
 0x136   :  { %1434 = vmatpush.msra.mxu0 %v4369_v16  ;;  %1454 = vmatpush.msra.mxu1 %v4370_v17  ;;  %v471_v15 = vrot.slane %v4403_v14, 4  ;;  %v452_v16 = vsel %vm382_vm1, %v451_v59, %v450_v9  ;;  %v459_v17 = vrot.slane %v3111_v63, 3  ;;  %v499_v59 = vrot.slane %v3148_v46, 4 }
 0x137   :  { %1474 = vmatpush.msra.mxu2 %v4371_v18  ;;  %1494 = vmatpush.msra.mxu3 %v4372_v19  ;;  %v466_v18 = vsel %vm382_vm1, %v465_v58, %v464_v12  ;;  %v473_v19 = vrot.slane %v3113_v37, 3  ;;  %v477_v12 = vrot.slane %v3196_v54, 1 }
 0x138   :  { %1435 = vmatpush.msra.mxu0 %v4373_v20  ;;  %1455 = vmatpush.msra.mxu1 %v4374_v21  ;;  %v454_v20 = vsel %vm385_vm2, %v453_v2, %v452_v16  ;;  %v4404_v21 = vld [vmem:[#allocation74_spill] sm:$0xff] }
 0x139   :  { %1475 = vmatpush.msra.mxu2 %v4375_v22  ;;  %1495 = vmatpush.msra.mxu3 %v4376_v23  ;;  %v461_v22 = vrot.slane %v4404_v21, 2  ;;  %v468_v23 = vsel %vm385_vm2, %v467_v5, %v466_v18  ;;  %v479_v18 = vrot.slane %v3182_v24, 7 }
 0x13a   :  { %1436 = vmatpush.msra.mxu0 %v4377_v41  ;;  %1456 = vmatpush.msra.mxu1 %v4378_v25  ;;  %v4405_v41 = vld [vmem:[#allocation75_spill] sm:$0xff] }
 0x13b   :  { %1476 = vmatpush.msra.mxu2 %v4379_v62  ;;  %1496 = vmatpush.msra.mxu3 %v4380_v30  ;;  %v475_v25 = vrot.slane %v4405_v41, 2  ;;  %v456_v62 = vsel %vm388_vm3, %v455_v6, %v454_v20  ;;  %v470_v30 = vsel %vm388_vm3, %v469_v7, %v468_v23  ;;  %v503_v6 = vrot.slane %v3162_v44, 2 }
 0x13c   :  { %1437 = vmatpush.msra.mxu0 %v4381_v34  ;;  %1457 = vmatpush.msra.mxu1 %v4382_v53  ;;  %v491_v34 = vrot.slane %v3100_v13, 1  ;;  %v458_v53 = vsel %vm391_vm4, %v457_v10, %v456_v62 }
 0x13d   :  { %1477 = vmatpush.msra.mxu2 %v4383_v40  ;;  %1497 = vmatpush.msra.mxu3 %v4384_v38  ;;  %v472_v40 = vsel %vm391_vm4, %v471_v15, %v470_v30  ;;  %v493_v38 = vrot.slane %v3130_v31, 7 }
 0x13e   :  { %1438 = vmatpush.msra.mxu0 %v4385_v43  ;;  %1458 = vmatpush.msra.mxu1 %v4386_v56  ;;  %v460_v43 = vsel %vm394_vm5, %v459_v17, %v458_v53  ;;  %v474_v56 = vsel %vm394_vm5, %v473_v19, %v472_v40  ;;  %v4409_v53 = vld [vmem:[#allocation79_spill] sm:$0xff] }
 0x13f   :  { %1478 = vmatpush.msra.mxu2 %v4387_v0  ;;  %1498 = vmatpush.msra.mxu3 %v4388_v52  ;;  %v495_v0 = vrot.slane %v3136_v45, 6  ;;  %v462_v52 = vsel %vm397_vm6, %v461_v22, %v460_v43  ;;  %v4407_v22 = vld [vmem:[#allocation76_spill] sm:$0xff]  ;;  %v483_v40 = vrot.slane %v4409_v53, 5  ;;  %v4410_v43 = vld [vmem:[#allocation81_spill] sm:$0xff] }
 0x140   :  { %1439 = vmatpush.msra.mxu0 %v4389_v36  ;;  %1459 = vmatpush.msra.mxu1 %v4390_v50  ;;  %v476_v50 = vsel %vm397_vm6, %v475_v25, %v474_v56  ;;  %v478_v23 = vsel %vm379_vm0, %v4407_v22, %v477_v12  ;;  %v4408_v25 = vld [vmem:[#allocation78_spill] sm:$0xff]  ;;  %v485_v56 = vrot.slane %v4410_v43, 4 }
 0x141   :  { %1479 = vmatpush.msra.mxu2 %v4391_v27  ;;  %1499 = vmatpush.msra.mxu3 %v4392_v33  ;;  %v497_v33 = vrot.slane %v3142_v51, 5  ;;  %v481_v62 = vrot.slane %v4408_v25, 6 }
 0x142   :  { %1440 = vmatpush.msra.mxu0 %v4393_v26  ;;  %1460 = vmatpush.msra.mxu1 %v4394_v49 }
 0x143   :  { %1480 = vmatpush.msra.mxu2 %v4395_v47  ;;  %1500 = vmatpush.msra.mxu3 %v4396_v55  ;;  %v4406_v47 = vld [vmem:[#allocation66_spill] sm:$0xff] }
 0x144   :  { %v492_v55 = vsel %vm379_vm0, %v4406_v47, %v491_v34 }
 0x145   :  { %v494_v58 = vsel %vm382_vm1, %v493_v38, %v492_v55 }
 0x146   :  { %v496_v5 = vsel %vm385_vm2, %v495_v0, %v494_v58  ;;  %v480_v0 = vsel %vm382_vm1, %v479_v18, %v478_v23 }
 0x147   :  { %v498_v7 = vsel %vm388_vm3, %v497_v33, %v496_v5 }
 0x148   :  { %v500_v9 = vsel %vm391_vm4, %v499_v59, %v498_v7 }
 0x149   :  { %v502_v10 = vsel %vm394_vm5, %v501_v29, %v500_v9 }
 0x14a   :  { %v504_v15 = vsel %vm397_vm6, %v503_v6, %v502_v10 }
 0x19f   :  { %v1140_v36 = vpop.f32.mrf.mxu0  ;;  %v1160_v27 = vpop.f32.mrf.mxu1 }
 0x1a0   :  { %v1203_v26 = vadd.f32 %v1140_v36, %v462_v52  ;;  %v1204_v49 = vadd.f32 %v1160_v27, %v476_v50  ;;  %v4411_v52 = vld [vmem:[#allocation82_spill] sm:$0xff]  ;;  %v482_v50 = vsel %vm385_vm2, %v481_v62, %v480_v0  ;;  %v4412_v27 = vld [vmem:[#allocation83_spill] sm:$0xff] }
 0x1a1   :  { %v487_v36 = vrot.slane %v4411_v52, 3  ;;  %v489_v33 = vrot.slane %v4412_v27, 2 }
 0x1a2   :  { %v2239_v2 = vmul.f32 -1.442695, %v1203_v26  ;;  %v2240_v3 = vmul.f32 -1.442695, %v1204_v49  ;;  %v484_v26 = vsel %vm388_vm3, %v483_v40, %v482_v50 }
 0x1a3   :  { %v486_v49 = vsel %vm391_vm4, %v485_v56, %v484_v26 }
 0x1a4   :  { %2288 = vpow2.f32 %v2239_v2  ;;  %v488_v58 = vsel %vm394_vm5, %v487_v36, %v486_v49 }
 0x1a5   :  { %2290 = vpow2.f32 %v2240_v3  ;;  %v490_v29 = vsel %vm397_vm6, %v489_v33, %v488_v58 }
 0x1a6   :  { %v1200_v16 = vpop.f32.mrf.mxu3  ;;  %v1180_v55 = vpop.f32.mrf.mxu2 }
 0x1a7   :  { %v1206_v17 = vadd.f32 %v1200_v16, %v504_v15  ;;  %v1205_v5 = vadd.f32 %v1180_v55, %v490_v29 }
 0x1a9   :  { %v2241_v19 = vmul.f32 -1.442695, %v1206_v17 }
 0x1aa   :  { %v2289_v20 = vpop.eup %2288 }
 0x1ab   :  { %v2291_v30 = vpop.eup %2290  ;;  %v1210_v34 = vadd.f32 1.0, %v2289_v20  ;;  %2292 = vpow2.f32 %v2241_v19 }
 0x1ac   :  { %v1229_v38 = vadd.f32 1.0, %v2291_v30 }
 0x1ad   :  { %2294 = vrcp.f32 %v1210_v34  ;;  %v1222_v15 = vand.u32 2147483648, %v1210_v34  ;;  %v1220_v18 = vand.u32 2147483647, %v1210_v34  ;;  %vm1216_vm12 = vweird.f32 %v1210_v34 }
 0x1ae   :  { %2296 = vrcp.f32 %v1229_v38  ;;  %v1241_v16 = vand.u32 2147483648, %v1229_v38  ;;  %v1239_v20 = vand.u32 2147483647, %v1229_v38  ;;  %vm1235_vm13 = vweird.f32 %v1229_v38 }
 0x1af   :  { %v1223_v30 = vor.u32 1.1754944e-38, %v1222_v15  ;;  %vm1221_vm7 = vcmp.eq.f32.partialorder %v1220_v18, 8.507059e+37  ;;  %v3357_v15 = vld [vmem:[#allocation8 + $0x1e8] sm:$0xff] }
 0x1b0   :  { %v1242_v0 = vor.u32 1.1754944e-38, %v1241_v16  ;;  %vm1240_vm9 = vcmp.eq.f32.partialorder %v1239_v20, 8.507059e+37  ;;  %v3363_v16 = vld [vmem:[#allocation8 + $0x1f8] sm:$0xff]  ;;  %v3369_v18 = vld [vmem:[#allocation8 + $0x1c8] sm:$0xff] }
 0x1b1   :  { %v2293_v59 = vpop.eup %2292  ;;  %v3375_v20 = vld [vmem:[#allocation8 + $0x1d8] sm:$0xff] }
 0x1b2   :  { %v1249_v2 = vadd.f32 1.0, %v2293_v59 }
 0x1b3   :  { %v2295_v3 = vpop.eup %2294 }
 0x1b4   :  { %v2297_v6 = vpop.eup %2296  ;;  %v1212_v7 = vmul.f32 %v2295_v3, %v1210_v34  ;;  %2298 = vrcp.f32 %v1249_v2  ;;  %vm1217_vm10 = vweird.f32 %v2295_v3 }
 0x1b5   :  { %v1231_v9 = vmul.f32 %v2297_v6, %v1229_v38  ;;  %2300 = vtanh.f32 %v1205_v5  ;;  %vm1236_vm11 = vweird.f32 %v2297_v6  ;;  %vm1218_vm14 = vmor %vm1216_vm12, %vm1217_vm10  ;;  %v1261_v5 = vand.u32 2147483648, %v1249_v2 }
 0x1b6   :  { %v1213_v10 = vsub.f32 1.0, %v1212_v7  ;;  %vm1237_vm15 = vmor %vm1235_vm13, %vm1236_vm11  ;;  %vm1255_vm10 = vweird.f32 %v1249_v2 }
 0x1b7   :  { %v1232_v12 = vsub.f32 1.0, %v1231_v9  ;;  %v1262_v9 = vor.u32 1.1754944e-38, %v1261_v5  ;;  %v3426_v5 = vld [vmem:[#allocation8 + $0x120] sm:$0xff] }
 0x1b8   :  { %v1214_v17 = vmul.f32 %v2295_v3, %v1213_v10  ;;  %4416 = vst [vmem:[#allocation20_spill] sm:$0xff] %v3426_v5 }
 0x1b9   :  { %v1233_v19 = vmul.f32 %v2297_v6, %v1232_v12 }
 0x1ba   :  { %v2299_v23 = vpop.eup %2298  ;;  %v1215_v62 = vadd.f32 %v2295_v3, %v1214_v17  ;;  %v3366_v17 = vld [vmem:[#allocation8 + $0x1c0] sm:$0xff] }
 0x1bb   :  { %v1234_v40 = vadd.f32 %v2297_v6, %v1233_v19  ;;  %v1251_v56 = vmul.f32 %v2299_v23, %v1249_v2  ;;  %v2301_v50 = vpop.eup %2300  ;;  %vm1256_vm8 = vweird.f32 %v2299_v23  ;;  %v3372_v19 = vld [vmem:[#allocation8 + $0x1d0] sm:$0xff] }
 0x1bc   :  { %v1219_v36 = vsel %vm1218_vm14, %v2295_v3, %v1215_v62  ;;  %v1259_v3 = vand.u32 2147483647, %v1249_v2  ;;  %vm1257_vm11 = vmor %vm1255_vm10, %vm1256_vm8  ;;  %v3360_v2 = vld [vmem:[#allocation8 + $0x1f0] sm:$0xff]  ;;  %v3381_v62 = vld [vmem:[#allocation8 + $0x1a8] sm:$0xff] }
 0x1bd   :  { %v1224_v33 = vsel %vm1221_vm7, %v1223_v30, %v1219_v36  ;;  %v1238_v26 = vsel %vm1237_vm15, %v2297_v6, %v1234_v40  ;;  %v1252_v49 = vsub.f32 1.0, %v1251_v56  ;;  %v3384_v30 = vld [vmem:[#allocation8 + $0x1b0] sm:$0xff]  ;;  %v3387_v40 = vld [vmem:[#allocation8 + $0x1b8] sm:$0xff]  ;;  %v3390_v56 = vld [vmem:[#allocation8 + $0x180] sm:$0xff] }
 0x1be   :  { %v1243_v55 = vsel %vm1240_vm9, %v1242_v0, %v1238_v26  ;;  %v1266_v59 = vmul.f32 %v2301_v50, %v1224_v33  ;;  %vm1260_vm12 = vcmp.eq.f32.partialorder %v1259_v3, 8.507059e+37  ;;  %v3393_v0 = vld [vmem:[#allocation8 + $0x188] sm:$0xff]  ;;  %v3396_v36 = vld [vmem:[#allocation8 + $0x190] sm:$0xff]  ;;  %v3399_v50 = vld [vmem:[#allocation8 + $0x198] sm:$0xff] }
 0x1bf   :  { %v1265_v58 = vmul.f32 %v1243_v55, %v3223_v35  ;;  %v1253_v29 = vmul.f32 %v2299_v23, %v1252_v49  ;;  %v3354_v35 = vld [vmem:[#allocation8 + $0x1e0] sm:$0xff]  ;;  %v3405_v26 = vld [vmem:[#allocation8 + $0x168] sm:$0xff]  ;;  %v3408_v49 = vld [vmem:[#allocation8 + $0x170] sm:$0xff] }
 0x1c0   :  { %v3402_v33 = vld [vmem:[#allocation8 + $0x160] sm:$0xff]  ;;  %v3411_v55 = vld [vmem:[#allocation8 + $0x178] sm:$0xff]  ;;  %v3429_v3 = vld [vmem:[#allocation8 + $0x128] sm:$0xff] }
 0x1c1   :  { %v3351_v34 = vadd.f32 %v1266_v59, %v1265_v58  ;;  %v1254_v38 = vadd.f32 %v2299_v23, %v1253_v29  ;;  %v3414_v59 = vld [vmem:[#allocation8 + $0x140] sm:$0xff]  ;;  %v3417_v58 = vld [vmem:[#allocation8 + $0x148] sm:$0xff]  ;;  %v3420_v29 = vld [vmem:[#allocation8 + $0x150] sm:$0xff]  ;;  %4417 = vst [vmem:[#allocation22_spill] sm:$0xff] %v3429_v3 }
 0x1c2   :  { %4413 = vst [vmem:[#allocation18_spill] sm:$0xff] %v3417_v58 }
 0x1c3   :  { %2302 = vtanh.f32 %v3351_v34  ;;  %v1258_v7 = vsel %vm1257_vm11, %v2299_v23, %v1254_v38  ;;  %v3378_v23 = vld [vmem:[#allocation8 + $0x1a0] sm:$0xff]  ;;  %4414 = vst [vmem:[#allocation17_spill] sm:$0xff] %v3420_v29  ;;  %v3423_v38 = vld [vmem:[#allocation8 + $0x158] sm:$0xff] }
 0x1c4   :  { %v1263_v10 = vsel %vm1260_vm12, %v1262_v9, %v1258_v7  ;;  %4415 = vst [vmem:[#allocation19_spill] sm:$0xff] %v3423_v38  ;;  %v3432_v7 = vld [vmem:[#allocation8 + $0x130] sm:$0xff]  ;;  %v3435_v9 = vld [vmem:[#allocation8 + $0x138] sm:$0xff] }
 0x1c5   :  { %4418 = vst [vmem:[#allocation21_spill] sm:$0xff] %v3432_v7 }
 0x1c6   :  { %4419 = vst [vmem:[#allocation23_spill] sm:$0xff] %v3435_v9 }
 0x1c9   :  { %v2303_v6 = vpop.eup %2302 }
 0x1ca   :  { %v1269_v12 = vmul.f32 %v2303_v6, %v1263_v10  ;;  %v3438_v6 = vld [vmem:[#allocation8 + $0x100] sm:$0xff]  ;;  %v3441_v10 = vld [vmem:[#allocation8 + $0x108] sm:$0xff] }
 0x1cb   :  { %4420 = vst [vmem:[#allocation24_spill] sm:$0xff] %v3438_v6 }
 0x1cc   :  { %1290 = vmatmul.f32.vlgmr.msrb.gmra.mxu0 %v1269_v12  ;;  %1310 = vmatmul.f32.vlgmr.msrb.gmra.mxu1 %v1269_v12  ;;  %4421 = vst [vmem:[#allocation26_spill] sm:$0xff] %v3441_v10 }
 0x1cd   :  { %1330 = vmatmul.f32.vlgmr.msrb.gmra.mxu2 %v1269_v12  ;;  %1350 = vmatmul.f32.vlgmr.msrb.gmra.mxu3 %v1269_v12  ;;  %v3444_v12 = vld [vmem:[#allocation8 + $0x110] sm:$0xff] }
 0x1ce   :  { %1576 = vmatpush.msrb.mxu0 %v3354_v35  ;;  %1596 = vmatpush.msrb.mxu1 %v3357_v15  ;;  %4422 = vst [vmem:[#allocation25_spill] sm:$0xff] %v3444_v12 }
 0x1cf   :  { %1616 = vmatpush.msrb.mxu2 %v3360_v2  ;;  %1636 = vmatpush.msrb.mxu3 %v3363_v16 }
 0x1d0   :  { %1577 = vmatpush.msrb.mxu0 %v3366_v17  ;;  %1597 = vmatpush.msrb.mxu1 %v3369_v18 }
 0x1d1   :  { %1617 = vmatpush.msrb.mxu2 %v3372_v19  ;;  %1637 = vmatpush.msrb.mxu3 %v3375_v20 }
 0x1d2   :  { %1578 = vmatpush.msrb.mxu0 %v3378_v23  ;;  %1598 = vmatpush.msrb.mxu1 %v3381_v62 }
 0x1d3   :  { %1618 = vmatpush.msrb.mxu2 %v3384_v30  ;;  %1638 = vmatpush.msrb.mxu3 %v3387_v40 }
 0x1d4   :  { %1579 = vmatpush.msrb.mxu0 %v3390_v56  ;;  %1599 = vmatpush.msrb.mxu1 %v3393_v0 }
 0x1d5   :  { %1619 = vmatpush.msrb.mxu2 %v3396_v36  ;;  %1639 = vmatpush.msrb.mxu3 %v3399_v50 }
 0x1d6   :  { %1580 = vmatpush.msrb.mxu0 %v3402_v33  ;;  %1600 = vmatpush.msrb.mxu1 %v3405_v26 }
 0x1d7   :  { %1620 = vmatpush.msrb.mxu2 %v3408_v49  ;;  %1640 = vmatpush.msrb.mxu3 %v3411_v55 }
 0x1d8   :  { %1581 = vmatpush.msrb.mxu0 %v3414_v59  ;;  %1601 = vmatpush.msrb.mxu1 %v3417_v58 }
 0x1d9   :  { %1621 = vmatpush.msrb.mxu2 %v3420_v29  ;;  %1641 = vmatpush.msrb.mxu3 %v3423_v38  ;;  %v528_v38 = vrot.slane %v3085_v61, 2  ;;  %v520_v29 = vrot.slane %v3102_v60, 6  ;;  %v538_v60 = vrot.slane %v3113_v37, 4 }
 0x1da   :  { %1582 = vmatpush.msrb.mxu0 %v3426_v5  ;;  %1602 = vmatpush.msrb.mxu1 %v3429_v3  ;;  %v3447_v3 = vld [vmem:[#allocation8 + $0x118] sm:$0xff]  ;;  %v514_v5 = vrot.slane %v3083_v32, 2 }
 0x1db   :  { %1622 = vmatpush.msrb.mxu2 %v3432_v7  ;;  %1642 = vmatpush.msrb.mxu3 %v3435_v9  ;;  %4423 = vst [vmem:[#allocation27_spill] sm:$0xff] %v3447_v3  ;;  %v3450_v7 = vld [vmem:[#allocation8 + $0xe0] sm:$0xff]  ;;  %v3453_v9 = vld [vmem:[#allocation8 + $0xe8] sm:$0xff] }
 0x1dc   :  { %1583 = vmatpush.msrb.mxu0 %v3438_v6  ;;  %1603 = vmatpush.msrb.mxu1 %v3441_v10  ;;  %4424 = vst [vmem:[#allocation28_spill] sm:$0xff] %v3450_v7  ;;  %v3456_v6 = vld [vmem:[#allocation8 + $0xf0] sm:$0xff]  ;;  %v3459_v10 = vld [vmem:[#allocation8 + $0xf8] sm:$0xff] }
 0x1dd   :  { %1623 = vmatpush.msrb.mxu2 %v3444_v12  ;;  %1643 = vmatpush.msrb.mxu3 %v3447_v3  ;;  %4425 = vst [vmem:[#allocation30_spill] sm:$0xff] %v3453_v9  ;;  %v3462_v12 = vld [vmem:[#allocation8 + $0xc0] sm:$0xff]  ;;  %v3465_v3 = vld [vmem:[#allocation8 + $0xc8] sm:$0xff] }
 0x1de   :  { %1584 = vmatpush.msrb.mxu0 %v3450_v7  ;;  %1604 = vmatpush.msrb.mxu1 %v3453_v9  ;;  %4426 = vst [vmem:[#allocation29_spill] sm:$0xff] %v3456_v6  ;;  %v3468_v7 = vld [vmem:[#allocation8 + $0xd0] sm:$0xff]  ;;  %v3471_v9 = vld [vmem:[#allocation8 + $0xd8] sm:$0xff] }
 0x1df   :  { %1624 = vmatpush.msrb.mxu2 %v3456_v6  ;;  %4427 = vst [vmem:[#allocation31_spill] sm:$0xff] %v3459_v10  ;;  %1644 = vmatpush.msrb.mxu3 %v3459_v10  ;;  %v3474_v6 = vld [vmem:[#allocation8 + $0xa0] sm:$0xff]  ;;  %v3477_v10 = vld [vmem:[#allocation8 + $0xa8] sm:$0xff] }
 0x1e0   :  { %4428 = vst [vmem:[#allocation32_spill] sm:$0xff] %v3462_v12  ;;  %1585 = vmatpush.msrb.mxu0 %v3462_v12  ;;  %1605 = vmatpush.msrb.mxu1 %v3465_v3  ;;  %v3480_v12 = vld [vmem:[#allocation8 + $0xb0] sm:$0xff] }
 0x1e1   :  { %4429 = vst [vmem:[#allocation34_spill] sm:$0xff] %v3465_v3  ;;  %1625 = vmatpush.msrb.mxu2 %v3468_v7  ;;  %1645 = vmatpush.msrb.mxu3 %v3471_v9  ;;  %v3483_v3 = vld [vmem:[#allocation8 + $0xb8] sm:$0xff] }
 0x1e2   :  { %4430 = vst [vmem:[#allocation33_spill] sm:$0xff] %v3468_v7  ;;  %1586 = vmatpush.msrb.mxu0 %v3474_v6  ;;  %1606 = vmatpush.msrb.mxu1 %v3477_v10  ;;  %v3486_v7 = vld [vmem:[#allocation8 + $0x80] sm:$0xff] }
 0x1e3   :  { %4431 = vst [vmem:[#allocation35_spill] sm:$0xff] %v3471_v9  ;;  %1626 = vmatpush.msrb.mxu2 %v3480_v12  ;;  %1646 = vmatpush.msrb.mxu3 %v3483_v3  ;;  %v3489_v9 = vld [vmem:[#allocation8 + $0x88] sm:$0xff] }
 0x1e4   :  { %4432 = vst [vmem:[#allocation36_spill] sm:$0xff] %v3474_v6  ;;  %1587 = vmatpush.msrb.mxu0 %v3486_v7  ;;  %1607 = vmatpush.msrb.mxu1 %v3489_v9  ;;  %v3492_v6 = vld [vmem:[#allocation8 + $0x90] sm:$0xff] }
 0x1e5   :  { %4433 = vst [vmem:[#allocation38_spill] sm:$0xff] %v3477_v10  ;;  %1627 = vmatpush.msrb.mxu2 %v3492_v6  ;;  %v3495_v10 = vld [vmem:[#allocation8 + $0x98] sm:$0xff] }
 0x1e6   :  { %4434 = vst [vmem:[#allocation37_spill] sm:$0xff] %v3480_v12  ;;  %1647 = vmatpush.msrb.mxu3 %v3495_v10  ;;  %v3498_v12 = vld [vmem:[#allocation8 + $0x60] sm:$0xff] }
 0x1e7   :  { %4435 = vst [vmem:[#allocation39_spill] sm:$0xff] %v3483_v3  ;;  %1588 = vmatpush.msrb.mxu0 %v3498_v12  ;;  %v3501_v3 = vld [vmem:[#allocation8 + $0x68] sm:$0xff] }
 0x1e8   :  { %4436 = vst [vmem:[#allocation40_spill] sm:$0xff] %v3486_v7  ;;  %1608 = vmatpush.msrb.mxu1 %v3501_v3  ;;  %v3504_v7 = vld [vmem:[#allocation8 + $0x70] sm:$0xff] }
 0x1e9   :  { %4437 = vst [vmem:[#allocation42_spill] sm:$0xff] %v3489_v9  ;;  %1628 = vmatpush.msrb.mxu2 %v3504_v7  ;;  %v3507_v9 = vld [vmem:[#allocation8 + $0x78] sm:$0xff] }
 0x1ea   :  { %4438 = vst [vmem:[#allocation41_spill] sm:$0xff] %v3492_v6  ;;  %1648 = vmatpush.msrb.mxu3 %v3507_v9  ;;  %v3510_v6 = vld [vmem:[#allocation8 + $0x40] sm:$0xff] }
 0x1eb   :  { %4439 = vst [vmem:[#allocation43_spill] sm:$0xff] %v3495_v10  ;;  %1589 = vmatpush.msrb.mxu0 %v3510_v6  ;;  %v3513_v10 = vld [vmem:[#allocation8 + $0x48] sm:$0xff] }
 0x1ec   :  { %4440 = vst [vmem:[#allocation44_spill] sm:$0xff] %v3498_v12  ;;  %1609 = vmatpush.msrb.mxu1 %v3513_v10  ;;  %v3516_v12 = vld [vmem:[#allocation8 + $0x50] sm:$0xff] }
 0x1ed   :  { %4441 = vst [vmem:[#allocation46_spill] sm:$0xff] %v3501_v3  ;;  %1629 = vmatpush.msrb.mxu2 %v3516_v12  ;;  %v3519_v3 = vld [vmem:[#allocation8 + $0x58] sm:$0xff] }
 0x1ee   :  { %4442 = vst [vmem:[#allocation45_spill] sm:$0xff] %v3504_v7  ;;  %1649 = vmatpush.msrb.mxu3 %v3519_v3  ;;  %v3522_v7 = vld [vmem:[#allocation8 + $0x20] sm:$0xff] }
 0x1ef   :  { %4443 = vst [vmem:[#allocation47_spill] sm:$0xff] %v3507_v9  ;;  %1590 = vmatpush.msrb.mxu0 %v3522_v7  ;;  %v3525_v9 = vld [vmem:[#allocation8 + $0x28] sm:$0xff] }
 0x1f0   :  { %4444 = vst [vmem:[#allocation48_spill] sm:$0xff] %v3510_v6  ;;  %1610 = vmatpush.msrb.mxu1 %v3525_v9  ;;  %v3528_v6 = vld [vmem:[#allocation8 + $0x30] sm:$0xff] }
 0x1f1   :  { %4445 = vst [vmem:[#allocation50_spill] sm:$0xff] %v3513_v10  ;;  %1630 = vmatpush.msrb.mxu2 %v3528_v6  ;;  %v3531_v10 = vld [vmem:[#allocation8 + $0x38] sm:$0xff] }
 0x1f2   :  { %4446 = vst [vmem:[#allocation49_spill] sm:$0xff] %v3516_v12  ;;  %1650 = vmatpush.msrb.mxu3 %v3531_v10  ;;  %v3534_v12 = vld [vmem:[#allocation8] sm:$0xff] }
 0x1f3   :  { %4447 = vst [vmem:[#allocation51_spill] sm:$0xff] %v3519_v3  ;;  %1591 = vmatpush.msrb.mxu0 %v3534_v12  ;;  %v3537_v3 = vld [vmem:[#allocation8 + $0x8] sm:$0xff] }
 0x1f4   :  { %4448 = vst [vmem:[#allocation52_spill] sm:$0xff] %v3522_v7  ;;  %1611 = vmatpush.msrb.mxu1 %v3537_v3  ;;  %v3540_v7 = vld [vmem:[#allocation8 + $0x10] sm:$0xff] }
 0x1f5   :  { %4449 = vst [vmem:[#allocation53_spill] sm:$0xff] %v3525_v9  ;;  %1631 = vmatpush.msrb.mxu2 %v3540_v7  ;;  %v3543_v9 = vld [vmem:[#allocation8 + $0x18] sm:$0xff] }
 0x1f6   :  { %4450 = vst [vmem:[#allocation54_spill] sm:$0xff] %v3528_v6  ;;  %1651 = vmatpush.msrb.mxu3 %v3543_v9  ;;  %v515_v6 = vrot.slane %v4401_v8, 1 }
 0x1f7   :  { %4451 = vst [vmem:[#allocation55_spill] sm:$0xff] %v3531_v10  ;;  %v529_v10 = vrot.slane %v4402_v11, 1  ;;  %v536_v11 = vrot.slane %v4403_v14, 5 }
 0x1f8   :  { %4452 = vst [vmem:[#allocation56_spill] sm:$0xff] %v3534_v12  ;;  %v518_v12 = vrot.slane %v4399_v1, 7  ;;  %v516_v58 = vsel %vm379_vm0, %v515_v6, %v514_v5  ;;  %v524_v1 = vrot.slane %v3111_v63, 4  ;;  %v526_v5 = vrot.slane %v4404_v21, 3 }
 0x1f9   :  { %4453 = vst [vmem:[#allocation57_spill] sm:$0xff] %v3537_v3  ;;  %v532_v3 = vrot.slane %v4400_v4, 7  ;;  %v530_v8 = vsel %vm379_vm0, %v529_v10, %v528_v38  ;;  %v517_v32 = vsel %vm382_vm1, %v4397_v42, %v516_v58  ;;  %v540_v38 = vrot.slane %v4405_v41, 3 }
 0x1fa   :  { %4454 = vst [vmem:[#allocation58_spill] sm:$0xff] %v3540_v7  ;;  %v534_v7 = vrot.slane %v3104_v39, 6  ;;  %v531_v4 = vsel %vm382_vm1, %v4398_v57, %v530_v8  ;;  %v519_v39 = vsel %vm385_vm2, %v518_v12, %v517_v32  ;;  %v557_v58 = vrot.slane %v4406_v47, 1 }
 0x1fb   :  { %4455 = vst [vmem:[#allocation66_spill] sm:$0xff] %v3543_v9  ;;  %v522_v9 = vrot.slane %v3106_v28, 5  ;;  %v533_v6 = vsel %vm385_vm2, %v532_v3, %v531_v4  ;;  %v521_v10 = vsel %vm388_vm3, %v520_v29, %v519_v39  ;;  %v556_v12 = vrot.slane %v3100_v13, 2 }
 0x1fc   :  { %v535_v14 = vsel %vm388_vm3, %v534_v7, %v533_v6  ;;  %v560_v4 = vrot.slane %v3136_v45, 7  ;;  %v562_v7 = vrot.slane %v3142_v51, 6 }
 0x1fd   :  { %v523_v63 = vsel %vm391_vm4, %v522_v9, %v521_v10  ;;  %v537_v8 = vsel %vm391_vm4, %v536_v11, %v535_v14  ;;  %v558_v11 = vsel %vm379_vm0, %v557_v58, %v556_v12 }
 0x1fe   :  { %v525_v37 = vsel %vm394_vm5, %v524_v1, %v523_v63  ;;  %v539_v32 = vsel %vm394_vm5, %v538_v60, %v537_v8  ;;  %v564_v63 = vrot.slane %v3148_v46, 5  ;;  %v559_v60 = vsel %vm382_vm1, %v3130_v31, %v558_v11 }
 0x1ff   :  { %v527_v3 = vsel %vm397_vm6, %v526_v5, %v525_v37  ;;  %v541_v39 = vsel %vm397_vm6, %v540_v38, %v539_v32  ;;  %v566_v1 = vrot.slane %v3153_v48, 4  ;;  %v561_v37 = vsel %vm385_vm2, %v560_v4, %v559_v60 }
 0x200   :  { %v568_v5 = vrot.slane %v3162_v44, 3  ;;  %v563_v38 = vsel %vm388_vm3, %v562_v7, %v561_v37  ;;  %v542_v8 = vrot.slane %v3196_v54, 2  ;;  %v543_v32 = vrot.slane %v4407_v22, 1 }
 0x201   :  { %v546_v7 = vrot.slane %v4408_v25, 7 }
 0x249   :  { %v1291_v41 = vpop.f32.mrf.mxu0  ;;  %v1311_v29 = vpop.f32.mrf.mxu1 }
 0x24a   :  { %v1354_v6 = vadd.f32 %v1291_v41, %v527_v3  ;;  %v1355_v9 = vadd.f32 %v1311_v29, %v541_v39  ;;  %v565_v41 = vsel %vm391_vm4, %v564_v63, %v563_v38  ;;  %v548_v63 = vrot.slane %v4409_v53, 6 }
 0x24b   :  { %v567_v58 = vsel %vm394_vm5, %v566_v1, %v565_v41  ;;  %v550_v1 = vrot.slane %v4410_v43, 5 }
 0x24c   :  { %v2242_v14 = vmul.f32 -1.442695, %v1354_v6  ;;  %v2243_v10 = vmul.f32 -1.442695, %v1355_v9  ;;  %v569_v12 = vsel %vm397_vm6, %v568_v5, %v567_v58  ;;  %v544_v6 = vsel %vm379_vm0, %v543_v32, %v542_v8 }
 0x24d   :  { %v554_v5 = vrot.slane %v4412_v27, 3 }
 0x24e   :  { %2304 = vpow2.f32 %v2242_v14  ;;  %v545_v14 = vsel %vm382_vm1, %v3182_v24, %v544_v6 }
 0x24f   :  { %2306 = vpow2.f32 %v2243_v10  ;;  %v552_v10 = vrot.slane %v4411_v52, 4  ;;  %v547_v37 = vsel %vm385_vm2, %v546_v7, %v545_v14 }
 0x250   :  { %v1351_v3 = vpop.f32.mrf.mxu3  ;;  %v549_v38 = vsel %vm388_vm3, %v548_v63, %v547_v37  ;;  %v1331_v58 = vpop.f32.mrf.mxu2 }
 0x251   :  { %v1357_v39 = vadd.f32 %v1351_v3, %v569_v12  ;;  %v551_v41 = vsel %vm391_vm4, %v550_v1, %v549_v38 }
 0x252   :  { %v553_v32 = vsel %vm394_vm5, %v552_v10, %v551_v41 }
 0x253   :  { %v2244_v29 = vmul.f32 -1.442695, %v1357_v39  ;;  %v555_v12 = vsel %vm397_vm6, %v554_v5, %v553_v32 }
 0x254   :  { %v2305_v4 = vpop.eup %2304 }
 0x255   :  { %v2307_v9 = vpop.eup %2306  ;;  %v1361_v11 = vadd.f32 1.0, %v2305_v4  ;;  %2308 = vpow2.f32 %v2244_v29  ;;  %v1356_v29 = vadd.f32 %v1331_v58, %v555_v12 }
 0x256   :  { %v1380_v60 = vadd.f32 1.0, %v2307_v9 }
 0x257   :  { %2310 = vrcp.f32 %v1361_v11  ;;  %v1373_v27 = vand.u32 2147483648, %v1361_v11  ;;  %v1371_v1 = vand.u32 2147483647, %v1361_v11  ;;  %vm1367_vm15 = vweird.f32 %v1361_v11 }
 0x258   :  { %2312 = vrcp.f32 %v1380_v60  ;;  %v1392_v63 = vand.u32 2147483648, %v1380_v60  ;;  %v1390_v10 = vand.u32 2147483647, %v1380_v60  ;;  %vm1386_vm7 = vweird.f32 %v1380_v60 }
 0x259   :  { %v1374_v58 = vor.u32 1.1754944e-38, %v1373_v27  ;;  %vm1372_vm10 = vcmp.eq.f32.partialorder %v1371_v1, 8.507059e+37 }
 0x25a   :  { %v1393_v12 = vor.u32 1.1754944e-38, %v1392_v63  ;;  %vm1391_vm11 = vcmp.eq.f32.partialorder %v1390_v10, 8.507059e+37 }
 0x25b   :  { %v2309_v8 = vpop.eup %2308 }
 0x25c   :  { %v1400_v3 = vadd.f32 1.0, %v2309_v8 }
 0x25d   :  { %v2311_v39 = vpop.eup %2310 }
 0x25e   :  { %v2313_v4 = vpop.eup %2312  ;;  %v1363_v6 = vmul.f32 %v2311_v39, %v1361_v11  ;;  %2314 = vrcp.f32 %v1400_v3  ;;  %vm1368_vm13 = vweird.f32 %v2311_v39  ;;  %v1412_v27 = vand.u32 2147483648, %v1400_v3 }
 0x25f   :  { %v1382_v9 = vmul.f32 %v2313_v4, %v1380_v60  ;;  %2316 = vtanh.f32 %v1356_v29  ;;  %vm1387_vm14 = vweird.f32 %v2313_v4  ;;  %vm1369_vm9 = vmor %vm1367_vm15, %vm1368_vm13  ;;  %vm1406_vm13 = vweird.f32 %v1400_v3 }
 0x260   :  { %v1364_v7 = vsub.f32 1.0, %v1363_v6  ;;  %vm1388_vm8 = vmor %vm1386_vm7, %vm1387_vm14  ;;  %v1413_v1 = vor.u32 1.1754944e-38, %v1412_v27  ;;  %v4474_v27 = vld [vmem:[#allocation35_spill] sm:$0xff] }
 0x261   :  { %v1383_v14 = vsub.f32 1.0, %v1382_v9 }
 0x262   :  { %v1365_v37 = vmul.f32 %v2311_v39, %v1364_v7 }
 0x263   :  { %v1384_v38 = vmul.f32 %v2313_v4, %v1383_v14 }
 0x264   :  { %v2315_v41 = vpop.eup %2314  ;;  %v1366_v5 = vadd.f32 %v2311_v39, %v1365_v37 }
 0x265   :  { %v1385_v8 = vadd.f32 %v2313_v4, %v1384_v38  ;;  %v1402_v32 = vmul.f32 %v2315_v41, %v1400_v3  ;;  %v2317_v29 = vpop.eup %2316  ;;  %vm1407_vm12 = vweird.f32 %v2315_v41 }
 0x266   :  { %v1370_v6 = vsel %vm1369_vm9, %v2311_v39, %v1366_v5  ;;  %v1410_v39 = vand.u32 2147483647, %v1400_v3  ;;  %vm1408_vm14 = vmor %vm1406_vm13, %vm1407_vm12  ;;  %v4460_v3 = vld [vmem:[#allocation22_spill] sm:$0xff]  ;;  %v4462_v5 = vld [vmem:[#allocation23_spill] sm:$0xff] }
 0x267   :  { %v1375_v9 = vsel %vm1372_vm10, %v1374_v58, %v1370_v6  ;;  %v1389_v7 = vsel %vm1388_vm8, %v2313_v4, %v1385_v8  ;;  %v1403_v25 = vsub.f32 1.0, %v1402_v32  ;;  %v4463_v58 = vld [vmem:[#allocation24_spill] sm:$0xff]  ;;  %v4464_v8 = vld [vmem:[#allocation26_spill] sm:$0xff]  ;;  %v4465_v32 = vld [vmem:[#allocation25_spill] sm:$0xff] }
 0x268   :  { %v1394_v14 = vsel %vm1391_vm11, %v1393_v12, %v1389_v7  ;;  %v1417_v52 = vmul.f32 %v2317_v29, %v1375_v9  ;;  %vm1411_vm15 = vcmp.eq.f32.partialorder %v1410_v39, 8.507059e+37  ;;  %v4466_v12 = vld [vmem:[#allocation27_spill] sm:$0xff]  ;;  %v4467_v6 = vld [vmem:[#allocation28_spill] sm:$0xff]  ;;  %v4468_v29 = vld [vmem:[#allocation30_spill] sm:$0xff] }
 0x269   :  { %v1416_v43 = vmul.f32 %v1394_v14, %v3351_v34  ;;  %v1404_v37 = vmul.f32 %v2315_v41, %v1403_v25  ;;  %v4456_v25 = vld [vmem:[#allocation18_spill] sm:$0xff]  ;;  %v4459_v34 = vld [vmem:[#allocation20_spill] sm:$0xff]  ;;  %v4469_v9 = vld [vmem:[#allocation29_spill] sm:$0xff] }
 0x26a   :  { %v4470_v7 = vld [vmem:[#allocation31_spill] sm:$0xff]  ;;  %v4471_v14 = vld [vmem:[#allocation32_spill] sm:$0xff] }
 0x26b   :  { %v3607_v11 = vadd.f32 %v1417_v52, %v1416_v43  ;;  %v1405_v60 = vadd.f32 %v2315_v41, %v1404_v37  ;;  %v4457_v43 = vld [vmem:[#allocation17_spill] sm:$0xff]  ;;  %v4458_v52 = vld [vmem:[#allocation19_spill] sm:$0xff]  ;;  %v4472_v37 = vld [vmem:[#allocation34_spill] sm:$0xff] }
 0x26c   :  { %v4475_v39 = vld [vmem:[#allocation36_spill] sm:$0xff] }
 0x26d   :  { %2318 = vtanh.f32 %v3607_v11  ;;  %v1409_v63 = vsel %vm1408_vm14, %v2315_v41, %v1405_v60  ;;  %v4461_v41 = vld [vmem:[#allocation21_spill] sm:$0xff] }
 0x26e   :  { %v1414_v38 = vsel %vm1411_vm15, %v1413_v1, %v1409_v63  ;;  %v4473_v60 = vld [vmem:[#allocation33_spill] sm:$0xff]  ;;  %v4476_v63 = vld [vmem:[#allocation38_spill] sm:$0xff] }
 0x26f   :  { %v4477_v1 = vld [vmem:[#allocation37_spill] sm:$0xff] }
 0x273   :  { %v2319_v4 = vpop.eup %2318 }
 0x274   :  { %v1420_v10 = vmul.f32 %v2319_v4, %v1414_v38  ;;  %v4478_v4 = vld [vmem:[#allocation39_spill] sm:$0xff]  ;;  %v4479_v38 = vld [vmem:[#allocation40_spill] sm:$0xff] }
 0x276   :  { %1441 = vmatmul.f32.vlgmr.msra.gmra.mxu0 %v1420_v10  ;;  %1461 = vmatmul.f32.vlgmr.msra.gmra.mxu1 %v1420_v10 }
 0x277   :  { %1481 = vmatmul.f32.vlgmr.msra.gmra.mxu2 %v1420_v10  ;;  %1501 = vmatmul.f32.vlgmr.msra.gmra.mxu3 %v1420_v10  ;;  %v4480_v10 = vld [vmem:[#allocation42_spill] sm:$0xff] }
 0x278   :  { %1727 = vmatpush.msra.mxu0 %v3354_v35  ;;  %1747 = vmatpush.msra.mxu1 %v3357_v15 }
 0x279   :  { %1767 = vmatpush.msra.mxu2 %v3360_v2  ;;  %1787 = vmatpush.msra.mxu3 %v3363_v16 }
 0x27a   :  { %1728 = vmatpush.msra.mxu0 %v3366_v17  ;;  %1748 = vmatpush.msra.mxu1 %v3369_v18 }
 0x27b   :  { %1768 = vmatpush.msra.mxu2 %v3372_v19  ;;  %1788 = vmatpush.msra.mxu3 %v3375_v20 }
 0x27c   :  { %1729 = vmatpush.msra.mxu0 %v3378_v23  ;;  %1749 = vmatpush.msra.mxu1 %v3381_v62 }
 0x27d   :  { %1769 = vmatpush.msra.mxu2 %v3384_v30  ;;  %1789 = vmatpush.msra.mxu3 %v3387_v40 }
 0x27e   :  { %1730 = vmatpush.msra.mxu0 %v3390_v56  ;;  %1750 = vmatpush.msra.mxu1 %v3393_v0 }
 0x27f   :  { %1770 = vmatpush.msra.mxu2 %v3396_v36  ;;  %1790 = vmatpush.msra.mxu3 %v3399_v50 }
 0x280   :  { %1731 = vmatpush.msra.mxu0 %v3402_v33  ;;  %1751 = vmatpush.msra.mxu1 %v3405_v26 }
 0x281   :  { %1771 = vmatpush.msra.mxu2 %v3408_v49  ;;  %1791 = vmatpush.msra.mxu3 %v3411_v55 }
 0x282   :  { %1732 = vmatpush.msra.mxu0 %v3414_v59  ;;  %1752 = vmatpush.msra.mxu1 %v4456_v25 }
 0x283   :  { %1772 = vmatpush.msra.mxu2 %v4457_v43  ;;  %1792 = vmatpush.msra.mxu3 %v4458_v52 }
 0x284   :  { %1733 = vmatpush.msra.mxu0 %v4459_v34  ;;  %1753 = vmatpush.msra.mxu1 %v4460_v3 }
 0x285   :  { %1773 = vmatpush.msra.mxu2 %v4461_v41  ;;  %1793 = vmatpush.msra.mxu3 %v4462_v5  ;;  %v4507_v5 = vld [vmem:[#allocation65_spill] sm:$0xff] }
 0x286   :  { %1734 = vmatpush.msra.mxu0 %v4463_v58  ;;  %1754 = vmatpush.msra.mxu1 %v4464_v8  ;;  %v4505_v8 = vld [vmem:[#allocation72_spill] sm:$0xff]  ;;  %v4506_v58 = vld [vmem:[#allocation73_spill] sm:$0xff] }
 0x287   :  { %1774 = vmatpush.msra.mxu2 %v4465_v32  ;;  %1794 = vmatpush.msra.mxu3 %v4466_v12  ;;  %v4503_v12 = vld [vmem:[#allocation69_spill] sm:$0xff]  ;;  %v4504_v32 = vld [vmem:[#allocation71_spill] sm:$0xff] }
 0x288   :  { %1735 = vmatpush.msra.mxu0 %v4467_v6  ;;  %1755 = vmatpush.msra.mxu1 %v4468_v29  ;;  %v4501_v29 = vld [vmem:[#allocation63_spill] sm:$0xff]  ;;  %v4502_v6 = vld [vmem:[#allocation68_spill] sm:$0xff] }
 0x289   :  { %1775 = vmatpush.msra.mxu2 %v4469_v9  ;;  %1795 = vmatpush.msra.mxu3 %v4470_v7  ;;  %v4481_v7 = vld [vmem:[#allocation41_spill] sm:$0xff]  ;;  %v4500_v9 = vld [vmem:[#allocation60_spill] sm:$0xff] }
 0x28a   :  { %1736 = vmatpush.msra.mxu0 %v4471_v14  ;;  %1756 = vmatpush.msra.mxu1 %v4472_v37  ;;  %v4482_v14 = vld [vmem:[#allocation43_spill] sm:$0xff]  ;;  %v4483_v37 = vld [vmem:[#allocation44_spill] sm:$0xff] }
 0x28b   :  { %1776 = vmatpush.msra.mxu2 %v4473_v60  ;;  %1796 = vmatpush.msra.mxu3 %v4474_v27  ;;  %v4484_v60 = vld [vmem:[#allocation46_spill] sm:$0xff]  ;;  %v4485_v27 = vld [vmem:[#allocation45_spill] sm:$0xff] }
 0x28c   :  { %1737 = vmatpush.msra.mxu0 %v4475_v39  ;;  %1757 = vmatpush.msra.mxu1 %v4476_v63  ;;  %v4486_v39 = vld [vmem:[#allocation47_spill] sm:$0xff]  ;;  %v4487_v63 = vld [vmem:[#allocation48_spill] sm:$0xff] }
 0x28d   :  { %1777 = vmatpush.msra.mxu2 %v4477_v1  ;;  %1797 = vmatpush.msra.mxu3 %v4478_v4  ;;  %v4488_v1 = vld [vmem:[#allocation50_spill] sm:$0xff]  ;;  %v4489_v4 = vld [vmem:[#allocation49_spill] sm:$0xff] }
 0x28e   :  { %1738 = vmatpush.msra.mxu0 %v4479_v38  ;;  %1758 = vmatpush.msra.mxu1 %v4480_v10  ;;  %v4490_v38 = vld [vmem:[#allocation51_spill] sm:$0xff]  ;;  %v4491_v10 = vld [vmem:[#allocation52_spill] sm:$0xff] }
 0x28f   :  { %1778 = vmatpush.msra.mxu2 %v4481_v7  ;;  %1798 = vmatpush.msra.mxu3 %v4482_v14  ;;  %v4492_v7 = vld [vmem:[#allocation53_spill] sm:$0xff]  ;;  %v4493_v14 = vld [vmem:[#allocation54_spill] sm:$0xff] }
 0x290   :  { %1739 = vmatpush.msra.mxu0 %v4483_v37  ;;  %1759 = vmatpush.msra.mxu1 %v4484_v60  ;;  %v4494_v37 = vld [vmem:[#allocation55_spill] sm:$0xff]  ;;  %v4495_v60 = vld [vmem:[#allocation56_spill] sm:$0xff] }
 0x291   :  { %1779 = vmatpush.msra.mxu2 %v4485_v27  ;;  %1799 = vmatpush.msra.mxu3 %v4486_v39  ;;  %v4496_v27 = vld [vmem:[#allocation57_spill] sm:$0xff]  ;;  %v4497_v39 = vld [vmem:[#allocation58_spill] sm:$0xff] }
 0x292   :  { %1740 = vmatpush.msra.mxu0 %v4487_v63  ;;  %1760 = vmatpush.msra.mxu1 %v4488_v1  ;;  %v4498_v63 = vld [vmem:[#allocation66_spill] sm:$0xff]  ;;  %v4499_v1 = vld [vmem:[#allocation59_spill] sm:$0xff] }
 0x293   :  { %1780 = vmatpush.msra.mxu2 %v4489_v4  ;;  %1800 = vmatpush.msra.mxu3 %v4490_v38  ;;  %v580_v4 = vrot.slane %v4499_v1, 2  ;;  %v594_v38 = vrot.slane %v4500_v9, 2  ;;  %v601_v9 = vrot.slane %v4504_v32, 6 }
 0x294   :  { %1741 = vmatpush.msra.mxu0 %v4491_v10  ;;  %1761 = vmatpush.msra.mxu1 %v4492_v7  ;;  %v582_v10 = vrot.slane %v4397_v42, 1  ;;  %v596_v7 = vrot.slane %v4398_v57, 1  ;;  %v589_v57 = vrot.slane %v4505_v8, 5 }
 0x295   :  { %1781 = vmatpush.msra.mxu2 %v4493_v14  ;;  %1801 = vmatpush.msra.mxu3 %v4494_v37  ;;  %v579_v14 = vrot.slane %v4501_v29, 3  ;;  %v593_v37 = vrot.slane %v3085_v61, 3  ;;  %v603_v61 = vrot.slane %v4506_v58, 5  ;;  %v624_v58 = vrot.slane %v3130_v31, 1 }
 0x296   :  { %1742 = vmatpush.msra.mxu0 %v4495_v60  ;;  %1762 = vmatpush.msra.mxu1 %v4496_v27  ;;  %v585_v60 = vrot.slane %v4502_v6, 7  ;;  %v599_v27 = vrot.slane %v4503_v12, 7  ;;  %v591_v12 = vrot.slane %v4404_v21, 4 }
 0x297   :  { %1782 = vmatpush.msra.mxu2 %v4497_v39  ;;  %1802 = vmatpush.msra.mxu3 %v4498_v63  ;;  %v581_v39 = vsel %vm379_vm0, %v580_v4, %v579_v14  ;;  %v587_v63 = vrot.slane %v3106_v28, 6  ;;  %v595_v1 = vsel %vm379_vm0, %v594_v38, %v593_v37  ;;  %v4508_v14 = vld [vmem:[#allocation67_spill] sm:$0xff] }
 0x298   :  { %v583_v42 = vsel %vm382_vm1, %v582_v10, %v581_v39  ;;  %v597_v29 = vsel %vm382_vm1, %v596_v7, %v595_v1  ;;  %v4509_v28 = vld [vmem:[#allocation75_spill] sm:$0xff]  ;;  %v622_v10 = vrot.slane %v4406_v47, 2 }
 0x299   :  { %v584_v6 = vsel %vm385_vm2, %v4507_v5, %v583_v42  ;;  %v598_v4 = vsel %vm385_vm2, %v4508_v14, %v597_v29  ;;  %v605_v37 = vrot.slane %v4509_v28, 4  ;;  %v621_v29 = vrot.slane %v3100_v13, 3 }
 0x29a   :  { %v586_v38 = vsel %vm388_vm3, %v585_v60, %v584_v6  ;;  %v600_v39 = vsel %vm388_vm3, %v599_v27, %v598_v4  ;;  %v627_v27 = vrot.slane %v3142_v51, 7 }
 0x29b   :  { %v588_v7 = vsel %vm391_vm4, %v587_v63, %v586_v38  ;;  %v602_v1 = vsel %vm391_vm4, %v601_v9, %v600_v39  ;;  %v623_v9 = vsel %vm379_vm0, %v622_v10, %v621_v29  ;;  %v629_v38 = vrot.slane %v3148_v46, 6 }
 0x29c   :  { %v590_v42 = vsel %vm394_vm5, %v589_v57, %v588_v7  ;;  %v604_v21 = vsel %vm394_vm5, %v603_v61, %v602_v1  ;;  %v625_v57 = vsel %vm382_vm1, %v624_v58, %v623_v9  ;;  %v631_v61 = vrot.slane %v3153_v48, 5 }
 0x29d   :  { %v592_v28 = vsel %vm397_vm6, %v591_v12, %v590_v42  ;;  %v606_v6 = vsel %vm397_vm6, %v605_v37, %v604_v21  ;;  %v626_v12 = vsel %vm385_vm2, %v3136_v45, %v625_v57  ;;  %v633_v21 = vrot.slane %v3162_v44, 4 }
 0x29e   :  { %v628_v37 = vsel %vm388_vm3, %v627_v27, %v626_v12  ;;  %v607_v10 = vrot.slane %v3196_v54, 3  ;;  %v608_v58 = vrot.slane %v4407_v22, 2  ;;  %v4511_v12 = vld [vmem:[#allocation82_spill] sm:$0xff] }
 0x2a0   :  { %v609_v27 = vsel %vm379_vm0, %v608_v58, %v607_v10 }
 0x2f3   :  { %v1442_v8 = vpop.f32.mrf.mxu0  ;;  %v1462_v60 = vpop.f32.mrf.mxu1 }
 0x2f4   :  { %v1505_v4 = vadd.f32 %v1442_v8, %v592_v28  ;;  %v1506_v63 = vadd.f32 %v1462_v60, %v606_v6  ;;  %v630_v28 = vsel %vm391_vm4, %v629_v38, %v628_v37  ;;  %v610_v6 = vrot.slane %v3182_v24, 1  ;;  %v4512_v37 = vld [vmem:[#allocation78_spill] sm:$0xff] }
 0x2f5   :  { %v632_v8 = vsel %vm394_vm5, %v631_v61, %v630_v28  ;;  %v613_v38 = vrot.slane %v4409_v53, 7  ;;  %v4510_v61 = vld [vmem:[#allocation81_spill] sm:$0xff] }
 0x2f6   :  { %v2245_v39 = vmul.f32 -1.442695, %v1505_v4  ;;  %v2246_v7 = vmul.f32 -1.442695, %v1506_v63  ;;  %v634_v1 = vsel %vm397_vm6, %v633_v21, %v632_v8  ;;  %v617_v21 = vrot.slane %v4511_v12, 5  ;;  %v4513_v8 = vld [vmem:[#allocation83_spill] sm:$0xff] }
 0x2f8   :  { %2320 = vpow2.f32 %v2245_v39  ;;  %v615_v39 = vrot.slane %v4510_v61, 6 }
 0x2f9   :  { %2322 = vpow2.f32 %v2246_v7  ;;  %v611_v7 = vsel %vm382_vm1, %v610_v6, %v609_v27 }
 0x2fa   :  { %v1502_v42 = vpop.f32.mrf.mxu3  ;;  %v612_v28 = vsel %vm385_vm2, %v4512_v37, %v611_v7 }
 0x2fb   :  { %v1508_v29 = vadd.f32 %v1502_v42, %v634_v1  ;;  %v619_v1 = vrot.slane %v4513_v8, 4  ;;  %v614_v10 = vsel %vm388_vm3, %v613_v38, %v612_v28  ;;  %v1482_v42 = vpop.f32.mrf.mxu2 }
 0x2fc   :  { %v616_v58 = vsel %vm391_vm4, %v615_v39, %v614_v10 }
 0x2fd   :  { %v2247_v60 = vmul.f32 -1.442695, %v1508_v29 }
 0x2fe   :  { %v2321_v4 = vpop.eup %2320 }
 0x2ff   :  { %v2323_v63 = vpop.eup %2322  ;;  %v1512_v9 = vadd.f32 1.0, %v2321_v4  ;;  %2324 = vpow2.f32 %v2247_v60  ;;  %v618_v60 = vsel %vm394_vm5, %v617_v21, %v616_v58 }
 0x300   :  { %v1531_v57 = vadd.f32 1.0, %v2323_v63  ;;  %v620_v4 = vsel %vm397_vm6, %v619_v1, %v618_v60 }
 0x301   :  { %2326 = vrcp.f32 %v1512_v9  ;;  %v1507_v27 = vadd.f32 %v1482_v42, %v620_v4  ;;  %v1524_v8 = vand.u32 2147483648, %v1512_v9  ;;  %v1522_v39 = vand.u32 2147483647, %v1512_v9 }
 0x302   :  { %2328 = vrcp.f32 %v1531_v57  ;;  %v1543_v38 = vand.u32 2147483648, %v1531_v57  ;;  %v1541_v21 = vand.u32 2147483647, %v1531_v57  ;;  %vm1518_vm8 = vweird.f32 %v1512_v9 }
 0x303   :  { %vm1537_vm10 = vweird.f32 %v1531_v57  ;;  %v1525_v42 = vor.u32 1.1754944e-38, %v1524_v8  ;;  %vm1523_vm13 = vcmp.eq.f32.partialorder %v1522_v39, 8.507059e+37 }
 0x304   :  { %vm1542_vm14 = vcmp.eq.f32.partialorder %v1541_v21, 8.507059e+37 }
 0x305   :  { %v2325_v29 = vpop.eup %2324 }
 0x306   :  { %v1551_v63 = vadd.f32 1.0, %v2325_v29 }
 0x307   :  { %v2327_v6 = vpop.eup %2326 }
 0x308   :  { %v2329_v53 = vpop.eup %2328  ;;  %v1514_v12 = vmul.f32 %v2327_v6, %v1512_v9  ;;  %2330 = vrcp.f32 %v1551_v63  ;;  %vm1519_vm7 = vweird.f32 %v2327_v6  ;;  %v1563_v8 = vand.u32 2147483648, %v1551_v63 }
 0x309   :  { %v1533_v61 = vmul.f32 %v2329_v53, %v1531_v57  ;;  %2332 = vtanh.f32 %v1507_v27  ;;  %vm1538_vm9 = vweird.f32 %v2329_v53  ;;  %vm1520_vm11 = vmor %vm1518_vm8, %vm1519_vm7  ;;  %vm1557_vm7 = vweird.f32 %v1551_v63 }
 0x30a   :  { %v1515_v7 = vsub.f32 1.0, %v1514_v12  ;;  %vm1539_vm12 = vmor %vm1537_vm10, %vm1538_vm9  ;;  %v1544_v12 = vor.u32 1.1754944e-38, %v1543_v38  ;;  %v1564_v39 = vor.u32 1.1754944e-38, %v1563_v8  ;;  %v4555_v8 = vld [vmem:[#allocation63_spill] sm:$0xff] }
 0x30b   :  { %v1534_v37 = vsub.f32 1.0, %v1533_v61 }
 0x30c   :  { %v1516_v28 = vmul.f32 %v2327_v6, %v1515_v7 }
 0x30d   :  { %v1535_v10 = vmul.f32 %v2329_v53, %v1534_v37 }
 0x30e   :  { %v2331_v58 = vpop.eup %2330  ;;  %v1517_v1 = vadd.f32 %v2327_v6, %v1516_v28 }
 0x30f   :  { %v1536_v29 = vadd.f32 %v2329_v53, %v1535_v10  ;;  %v1553_v60 = vmul.f32 %v2331_v58, %v1551_v63  ;;  %v2333_v4 = vpop.eup %2332  ;;  %vm1558_vm15 = vweird.f32 %v2331_v58 }
 0x310   :  { %v1521_v61 = vsel %vm1520_vm11, %v2327_v6, %v1517_v1  ;;  %v1561_v6 = vand.u32 2147483647, %v1551_v63  ;;  %vm1559_vm9 = vmor %vm1557_vm7, %vm1558_vm15  ;;  %v4545_v63 = vld [vmem:[#allocation54_spill] sm:$0xff]  ;;  %v4547_v1 = vld [vmem:[#allocation56_spill] sm:$0xff] }
 0x311   :  { %v1526_v27 = vsel %vm1523_vm13, %v1525_v42, %v1521_v61  ;;  %v1540_v7 = vsel %vm1539_vm12, %v2329_v53, %v1536_v29  ;;  %v1554_v24 = vsub.f32 1.0, %v1553_v60  ;;  %v4548_v42 = vld [vmem:[#allocation57_spill] sm:$0xff]  ;;  %v4549_v29 = vld [vmem:[#allocation58_spill] sm:$0xff] }
 0x312   :  { %v1545_v37 = vsel %vm1542_vm14, %v1544_v12, %v1540_v7  ;;  %v1568_v22 = vmul.f32 %v2333_v4, %v1526_v27  ;;  %vm1562_vm8 = vcmp.eq.f32.partialorder %v1561_v6, 8.507059e+37  ;;  %v4550_v60 = vld [vmem:[#allocation66_spill] sm:$0xff]  ;;  %v4551_v12 = vld [vmem:[#allocation59_spill] sm:$0xff]  ;;  %v4552_v4 = vld [vmem:[#allocation60_spill] sm:$0xff]  ;;  %v644_v6 = vrot.slane %v4555_v8, 4 }
 0x313   :  { %v1567_v54 = vmul.f32 %v1545_v37, %v3607_v11  ;;  %v1555_v28 = vmul.f32 %v2331_v58, %v1554_v24  ;;  %v4514_v24 = vld [vmem:[#allocation23_spill] sm:$0xff]  ;;  %v645_v61 = vrot.slane %v4551_v12, 3  ;;  %v659_v27 = vrot.slane %v4552_v4, 3  ;;  %v4553_v7 = vld [vmem:[#allocation61_spill] sm:$0xff] }
 0x314   :  { %v4538_v11 = vld [vmem:[#allocation47_spill] sm:$0xff]  ;;  %v647_v37 = vrot.slane %v4553_v7, 2 }
 0x315   :  { %v3735_v9 = vadd.f32 %v1568_v22, %v1567_v54  ;;  %v1556_v57 = vadd.f32 %v2331_v58, %v1555_v28  ;;  %v4515_v54 = vld [vmem:[#allocation24_spill] sm:$0xff]  ;;  %v4516_v22 = vld [vmem:[#allocation26_spill] sm:$0xff] }
 0x316   :  { %v4554_v28 = vld [vmem:[#allocation62_spill] sm:$0xff] }
 0x317   :  { %2334 = vtanh.f32 %v3735_v9  ;;  %v1560_v38 = vsel %vm1559_vm9, %v2331_v58, %v1556_v57  ;;  %v4546_v58 = vld [vmem:[#allocation55_spill] sm:$0xff]  ;;  %v661_v57 = vrot.slane %v4554_v28, 2 }
 0x318   :  { %v1565_v10 = vsel %vm1562_vm8, %v1564_v39, %v1560_v38  ;;  %v649_v38 = vrot.slane %v4507_v5, 1  ;;  %v4556_v39 = vld [vmem:[#allocation64_spill] sm:$0xff] }
 0x31d   :  { %v2335_v53 = vpop.eup %2334 }
 0x31e   :  { %v1571_v21 = vmul.f32 %v2335_v53, %v1565_v10  ;;  %v658_v53 = vrot.slane %v4556_v39, 4  ;;  %v663_v10 = vrot.slane %v4508_v14, 1 }
 0x320   :  { %1592 = vmatmul.f32.vlgmr.msrb.gmra.mxu0 %v1571_v21  ;;  %1612 = vmatmul.f32.vlgmr.msrb.gmra.mxu1 %v1571_v21 }
 0x321   :  { %1632 = vmatmul.f32.vlgmr.msrb.gmra.mxu2 %v1571_v21  ;;  %1652 = vmatmul.f32.vlgmr.msrb.gmra.mxu3 %v1571_v21  ;;  %v646_v21 = vsel %vm379_vm0, %v645_v61, %v644_v6  ;;  %v696_v61 = vrot.slane %v3153_v48, 6  ;;  %v698_v6 = vrot.slane %v3162_v44, 5 }
 0x322   :  { %1878 = vmatpush.msrb.mxu0 %v3354_v35  ;;  %1898 = vmatpush.msrb.mxu1 %v3357_v15  ;;  %v4517_v35 = vld [vmem:[#allocation25_spill] sm:$0xff]  ;;  %v4518_v15 = vld [vmem:[#allocation27_spill] sm:$0xff] }
 0x323   :  { %1918 = vmatpush.msrb.mxu2 %v3360_v2  ;;  %1938 = vmatpush.msrb.mxu3 %v3363_v16  ;;  %v4519_v2 = vld [vmem:[#allocation28_spill] sm:$0xff]  ;;  %v4520_v16 = vld [vmem:[#allocation30_spill] sm:$0xff] }
 0x324   :  { %1879 = vmatpush.msrb.mxu0 %v3366_v17  ;;  %1899 = vmatpush.msrb.mxu1 %v3369_v18  ;;  %v4521_v17 = vld [vmem:[#allocation29_spill] sm:$0xff]  ;;  %v4522_v18 = vld [vmem:[#allocation31_spill] sm:$0xff] }
 0x325   :  { %1919 = vmatpush.msrb.mxu2 %v3372_v19  ;;  %1939 = vmatpush.msrb.mxu3 %v3375_v20  ;;  %v4523_v19 = vld [vmem:[#allocation32_spill] sm:$0xff]  ;;  %v4524_v20 = vld [vmem:[#allocation34_spill] sm:$0xff] }
 0x326   :  { %1880 = vmatpush.msrb.mxu0 %v3378_v23  ;;  %1900 = vmatpush.msrb.mxu1 %v3381_v62  ;;  %v4525_v23 = vld [vmem:[#allocation33_spill] sm:$0xff]  ;;  %v4526_v62 = vld [vmem:[#allocation35_spill] sm:$0xff] }
 0x327   :  { %1920 = vmatpush.msrb.mxu2 %v3384_v30  ;;  %1940 = vmatpush.msrb.mxu3 %v3387_v40  ;;  %v4527_v30 = vld [vmem:[#allocation36_spill] sm:$0xff]  ;;  %v4528_v40 = vld [vmem:[#allocation38_spill] sm:$0xff] }
 0x328   :  { %1881 = vmatpush.msrb.mxu0 %v3390_v56  ;;  %1901 = vmatpush.msrb.mxu1 %v3393_v0  ;;  %v4529_v56 = vld [vmem:[#allocation37_spill] sm:$0xff]  ;;  %v4530_v0 = vld [vmem:[#allocation39_spill] sm:$0xff] }
 0x329   :  { %1921 = vmatpush.msrb.mxu2 %v3396_v36  ;;  %1941 = vmatpush.msrb.mxu3 %v3399_v50  ;;  %v4531_v36 = vld [vmem:[#allocation40_spill] sm:$0xff]  ;;  %v4532_v50 = vld [vmem:[#allocation42_spill] sm:$0xff] }
 0x32a   :  { %1882 = vmatpush.msrb.mxu0 %v3402_v33  ;;  %1902 = vmatpush.msrb.mxu1 %v3405_v26  ;;  %v4533_v33 = vld [vmem:[#allocation41_spill] sm:$0xff]  ;;  %v4534_v26 = vld [vmem:[#allocation43_spill] sm:$0xff] }
 0x32b   :  { %1922 = vmatpush.msrb.mxu2 %v3408_v49  ;;  %1942 = vmatpush.msrb.mxu3 %v3411_v55  ;;  %v4535_v49 = vld [vmem:[#allocation44_spill] sm:$0xff]  ;;  %v4536_v55 = vld [vmem:[#allocation46_spill] sm:$0xff] }
 0x32c   :  { %1883 = vmatpush.msrb.mxu0 %v3414_v59  ;;  %1903 = vmatpush.msrb.mxu1 %v4456_v25  ;;  %v4537_v59 = vld [vmem:[#allocation45_spill] sm:$0xff]  ;;  %v4539_v25 = vld [vmem:[#allocation48_spill] sm:$0xff] }
 0x32d   :  { %1923 = vmatpush.msrb.mxu2 %v4457_v43  ;;  %1943 = vmatpush.msrb.mxu3 %v4458_v52  ;;  %v4540_v43 = vld [vmem:[#allocation50_spill] sm:$0xff]  ;;  %v4541_v52 = vld [vmem:[#allocation49_spill] sm:$0xff] }
 0x32e   :  { %1884 = vmatpush.msrb.mxu0 %v4459_v34  ;;  %1904 = vmatpush.msrb.mxu1 %v4460_v3  ;;  %v4542_v34 = vld [vmem:[#allocation51_spill] sm:$0xff]  ;;  %v4543_v3 = vld [vmem:[#allocation52_spill] sm:$0xff] }
 0x32f   :  { %1924 = vmatpush.msrb.mxu2 %v4461_v41  ;;  %1944 = vmatpush.msrb.mxu3 %v4514_v24  ;;  %v4544_v41 = vld [vmem:[#allocation53_spill] sm:$0xff]  ;;  %v4557_v24 = vld [vmem:[#allocation70_spill] sm:$0xff] }
 0x330   :  { %1885 = vmatpush.msrb.mxu0 %v4515_v54  ;;  %1905 = vmatpush.msrb.mxu1 %v4516_v22  ;;  %v652_v54 = vrot.slane %v4557_v24, 7  ;;  %v660_v22 = vsel %vm379_vm0, %v659_v27, %v658_v53 }
 0x331   :  { %1925 = vmatpush.msrb.mxu2 %v4517_v35  ;;  %1945 = vmatpush.msrb.mxu3 %v4518_v15  ;;  %v666_v35 = vrot.slane %v4504_v32, 7  ;;  %v648_v15 = vsel %vm382_vm1, %v647_v37, %v646_v21  ;;  %v4564_v21 = vld [vmem:[#allocation80_spill] sm:$0xff] }
 0x332   :  { %1886 = vmatpush.msrb.mxu0 %v4519_v2  ;;  %1906 = vmatpush.msrb.mxu1 %v4520_v16  ;;  %v4558_v2 = vld [vmem:[#allocation72_spill] sm:$0xff] }
 0x333   :  { %1926 = vmatpush.msrb.mxu2 %v4521_v17  ;;  %1946 = vmatpush.msrb.mxu3 %v4522_v18  ;;  %v654_v16 = vrot.slane %v4558_v2, 6  ;;  %v662_v17 = vsel %vm382_vm1, %v661_v57, %v660_v22  ;;  %v4559_v18 = vld [vmem:[#allocation73_spill] sm:$0xff]  ;;  %v4565_v22 = vld [vmem:[#allocation76_spill] sm:$0xff] }
 0x334   :  { %1887 = vmatpush.msrb.mxu0 %v4523_v19  ;;  %1907 = vmatpush.msrb.mxu1 %v4524_v20  ;;  %v668_v19 = vrot.slane %v4559_v18, 6  ;;  %v650_v20 = vsel %vm385_vm2, %v649_v38, %v648_v15 }
 0x335   :  { %1927 = vmatpush.msrb.mxu2 %v4525_v23  ;;  %1947 = vmatpush.msrb.mxu3 %v4526_v62  ;;  %v4560_v23 = vld [vmem:[#allocation74_spill] sm:$0xff] }
 0x336   :  { %1888 = vmatpush.msrb.mxu0 %v4527_v30  ;;  %1908 = vmatpush.msrb.mxu1 %v4528_v40  ;;  %v656_v62 = vrot.slane %v4560_v23, 5  ;;  %v664_v30 = vsel %vm385_vm2, %v663_v10, %v662_v17  ;;  %v4561_v40 = vld [vmem:[#allocation75_spill] sm:$0xff] }
 0x337   :  { %1928 = vmatpush.msrb.mxu2 %v4529_v56  ;;  %1948 = vmatpush.msrb.mxu3 %v4530_v0  ;;  %v670_v56 = vrot.slane %v4561_v40, 5  ;;  %v4562_v0 = vld [vmem:[#allocation68_spill] sm:$0xff] }
 0x338   :  { %1889 = vmatpush.msrb.mxu0 %v4531_v36  ;;  %1909 = vmatpush.msrb.mxu1 %v4532_v50  ;;  %v651_v36 = vsel %vm388_vm3, %v4562_v0, %v650_v20  ;;  %v4563_v50 = vld [vmem:[#allocation69_spill] sm:$0xff] }
 0x339   :  { %1929 = vmatpush.msrb.mxu2 %v4533_v33  ;;  %1949 = vmatpush.msrb.mxu3 %v4534_v26  ;;  %v665_v33 = vsel %vm388_vm3, %v4563_v50, %v664_v30  ;;  %v687_v26 = vrot.slane %v4406_v47, 3 }
 0x33a   :  { %1890 = vmatpush.msrb.mxu0 %v4535_v49  ;;  %1910 = vmatpush.msrb.mxu1 %v4536_v55  ;;  %v653_v49 = vsel %vm391_vm4, %v652_v54, %v651_v36  ;;  %v667_v55 = vsel %vm391_vm4, %v666_v35, %v665_v33  ;;  %v672_v54 = vrot.slane %v4564_v21, 4  ;;  %v673_v35 = vrot.slane %v4565_v22, 3  ;;  %v4567_v36 = vld [vmem:[#allocation78_spill] sm:$0xff] }
 0x33b   :  { %1930 = vmatpush.msrb.mxu2 %v4537_v59  ;;  %1950 = vmatpush.msrb.mxu3 %v4538_v11  ;;  %v689_v59 = vrot.slane %v3130_v31, 2  ;;  %v655_v11 = vsel %vm394_vm5, %v654_v16, %v653_v49  ;;  %v677_v33 = vrot.slane %v4567_v36, 1 }
 0x33c   :  { %1891 = vmatpush.msrb.mxu0 %v4539_v25  ;;  %1911 = vmatpush.msrb.mxu1 %v4540_v43  ;;  %v669_v25 = vsel %vm394_vm5, %v668_v19, %v667_v55  ;;  %v686_v43 = vrot.slane %v3100_v13, 4  ;;  %v4566_v19 = vld [vmem:[#allocation77_spill] sm:$0xff] }
 0x33d   :  { %1931 = vmatpush.msrb.mxu2 %v4541_v52  ;;  %1951 = vmatpush.msrb.mxu3 %v4542_v34  ;;  %v691_v52 = vrot.slane %v3136_v45, 1  ;;  %v657_v34 = vsel %vm397_vm6, %v656_v62, %v655_v11  ;;  %v675_v20 = vrot.slane %v4566_v19, 2 }
 0x33e   :  { %1892 = vmatpush.msrb.mxu0 %v4543_v3  ;;  %1912 = vmatpush.msrb.mxu1 %v4544_v41  ;;  %v671_v41 = vsel %vm397_vm6, %v670_v56, %v669_v25  ;;  %v674_v56 = vsel %vm379_vm0, %v673_v35, %v672_v54 }
 0x33f   :  { %1932 = vmatpush.msrb.mxu2 %v4545_v63  ;;  %1952 = vmatpush.msrb.mxu3 %v4546_v58  ;;  %v676_v25 = vsel %vm382_vm1, %v675_v20, %v674_v56 }
 0x340   :  { %1893 = vmatpush.msrb.mxu0 %v4547_v1  ;;  %1913 = vmatpush.msrb.mxu1 %v4548_v42  ;;  %v688_v42 = vsel %vm379_vm0, %v687_v26, %v686_v43  ;;  %v4569_v43 = vld [vmem:[#allocation82_spill] sm:$0xff] }
 0x341   :  { %1933 = vmatpush.msrb.mxu2 %v4549_v29  ;;  %1953 = vmatpush.msrb.mxu3 %v4550_v60  ;;  %v694_v29 = vrot.slane %v3148_v46, 7  ;;  %v690_v60 = vsel %vm382_vm1, %v689_v59, %v688_v42  ;;  %v4568_v59 = vld [vmem:[#allocation81_spill] sm:$0xff] }
 0x342   :  { %v692_v57 = vsel %vm385_vm2, %v691_v52, %v690_v60  ;;  %v680_v11 = vrot.slane %v4568_v59, 7  ;;  %v682_v52 = vrot.slane %v4569_v43, 6 }
 0x343   :  { %v693_v38 = vsel %vm388_vm3, %v3142_v51, %v692_v57 }
 0x344   :  { %v695_v53 = vsel %vm391_vm4, %v694_v29, %v693_v38 }
 0x345   :  { %v697_v10 = vsel %vm394_vm5, %v696_v61, %v695_v53 }
 0x346   :  { %v699_v15 = vsel %vm397_vm6, %v698_v6, %v697_v10 }
 0x39d   :  { %v1593_v3 = vpop.f32.mrf.mxu0  ;;  %v1613_v63 = vpop.f32.mrf.mxu1 }
 0x39e   :  { %v1656_v58 = vadd.f32 %v1593_v3, %v657_v34  ;;  %v1657_v1 = vadd.f32 %v1613_v63, %v671_v41  ;;  %v678_v34 = vsel %vm385_vm2, %v677_v33, %v676_v25  ;;  %v4570_v3 = vld [vmem:[#allocation83_spill] sm:$0xff] }
 0x39f   :  { %v684_v41 = vrot.slane %v4570_v3, 5  ;;  %v4571_v63 = vld [vmem:[#allocation79_spill] sm:$0xff] }
 0x3a0   :  { %v2248_v27 = vmul.f32 -1.442695, %v1656_v58  ;;  %v2249_v37 = vmul.f32 -1.442695, %v1657_v1  ;;  %v679_v58 = vsel %vm388_vm3, %v4571_v63, %v678_v34 }
 0x3a1   :  { %v681_v1 = vsel %vm391_vm4, %v680_v11, %v679_v58 }
 0x3a2   :  { %2336 = vpow2.f32 %v2248_v27  ;;  %v683_v60 = vsel %vm394_vm5, %v682_v52, %v681_v1 }
 0x3a3   :  { %2338 = vpow2.f32 %v2249_v37  ;;  %v685_v61 = vsel %vm397_vm6, %v684_v41, %v683_v60 }
 0x3a4   :  { %v1653_v16 = vpop.f32.mrf.mxu3  ;;  %v1633_v42 = vpop.f32.mrf.mxu2 }
 0x3a5   :  { %v1659_v17 = vadd.f32 %v1653_v16, %v699_v15  ;;  %v1658_v57 = vadd.f32 %v1633_v42, %v685_v61 }
 0x3a7   :  { %v2250_v62 = vmul.f32 -1.442695, %v1659_v17 }
 0x3a8   :  { %v2337_v30 = vpop.eup %2336 }
 0x3a9   :  { %v2339_v26 = vpop.eup %2338  ;;  %v1663_v49 = vadd.f32 1.0, %v2337_v30  ;;  %2340 = vpow2.f32 %v2250_v62 }
 0x3aa   :  { %v1682_v55 = vadd.f32 1.0, %v2339_v26 }
 0x3ab   :  { %2342 = vrcp.f32 %v1663_v49  ;;  %v1675_v35 = vand.u32 2147483648, %v1663_v49  ;;  %v1673_v17 = vand.u32 2147483647, %v1663_v49  ;;  %vm1669_vm12 = vweird.f32 %v1663_v49 }
 0x3ac   :  { %2344 = vrcp.f32 %v1682_v55  ;;  %v1694_v15 = vand.u32 2147483648, %v1682_v55  ;;  %v1692_v62 = vand.u32 2147483647, %v1682_v55  ;;  %vm1688_vm13 = vweird.f32 %v1682_v55 }
 0x3ad   :  { %v1676_v33 = vor.u32 1.1754944e-38, %v1675_v35  ;;  %vm1674_vm7 = vcmp.eq.f32.partialorder %v1673_v17, 8.507059e+37  ;;  %v2465_v35 = vld [vmem:[#allocation8 + $0x1e8] sm:$0xff] }
 0x3ae   :  { %v1695_v25 = vor.u32 1.1754944e-38, %v1694_v15  ;;  %vm1693_vm9 = vcmp.eq.f32.partialorder %v1692_v62, 8.507059e+37  ;;  %v2466_v15 = vld [vmem:[#allocation8 + $0x1f0] sm:$0xff]  ;;  %v2469_v17 = vld [vmem:[#allocation8 + $0x1c8] sm:$0xff]  ;;  %v2471_v62 = vld [vmem:[#allocation8 + $0x1d8] sm:$0xff] }
 0x3af   :  { %v2341_v29 = vpop.eup %2340 }
 0x3b0   :  { %v1702_v27 = vadd.f32 1.0, %v2341_v29 }
 0x3b1   :  { %v2343_v37 = vpop.eup %2342 }
 0x3b2   :  { %v2345_v6 = vpop.eup %2344  ;;  %v1665_v38 = vmul.f32 %v2343_v37, %v1663_v49  ;;  %2346 = vrcp.f32 %v1702_v27  ;;  %vm1670_vm10 = vweird.f32 %v2343_v37 }
 0x3b3   :  { %v1684_v53 = vmul.f32 %v2345_v6, %v1682_v55  ;;  %2348 = vtanh.f32 %v1658_v57  ;;  %vm1689_vm11 = vweird.f32 %v2345_v6  ;;  %vm1671_vm14 = vmor %vm1669_vm12, %vm1670_vm10  ;;  %v1714_v57 = vand.u32 2147483648, %v1702_v27 }
 0x3b4   :  { %v1666_v10 = vsub.f32 1.0, %v1665_v38  ;;  %vm1690_vm15 = vmor %vm1688_vm13, %vm1689_vm11  ;;  %vm1708_vm10 = vweird.f32 %v1702_v27 }
 0x3b5   :  { %v1685_v54 = vsub.f32 1.0, %v1684_v53  ;;  %v1715_v53 = vor.u32 1.1754944e-38, %v1714_v57  ;;  %v2488_v57 = vld [vmem:[#allocation8 + $0x120] sm:$0xff] }
 0x3b6   :  { %v1667_v16 = vmul.f32 %v2343_v37, %v1666_v10 }
 0x3b7   :  { %v1686_v20 = vmul.f32 %v2345_v6, %v1685_v54 }
 0x3b8   :  { %v2347_v30 = vpop.eup %2346  ;;  %v1668_v56 = vadd.f32 %v2343_v37, %v1667_v16  ;;  %v2467_v16 = vld [vmem:[#allocation8 + $0x1f8] sm:$0xff] }
 0x3b9   :  { %v1687_v26 = vadd.f32 %v2345_v6, %v1686_v20  ;;  %v1704_v11 = vmul.f32 %v2347_v30, %v1702_v27  ;;  %v2349_v34 = vpop.eup %2348  ;;  %vm1709_vm8 = vweird.f32 %v2347_v30  ;;  %v2470_v20 = vld [vmem:[#allocation8 + $0x1d0] sm:$0xff] }
 0x3ba   :  { %v1672_v52 = vsel %vm1671_vm14, %v2343_v37, %v1668_v56  ;;  %v1712_v37 = vand.u32 2147483647, %v1702_v27  ;;  %vm1710_vm11 = vmor %vm1708_vm10, %vm1709_vm8  ;;  %v2468_v27 = vld [vmem:[#allocation8 + $0x1c0] sm:$0xff]  ;;  %v2473_v56 = vld [vmem:[#allocation8 + $0x1a8] sm:$0xff] }
 0x3bb   :  { %v1677_v41 = vsel %vm1674_vm7, %v1676_v33, %v1672_v52  ;;  %v1691_v58 = vsel %vm1690_vm15, %v2345_v6, %v1687_v26  ;;  %v1705_v1 = vsub.f32 1.0, %v1704_v11  ;;  %v2474_v33 = vld [vmem:[#allocation8 + $0x1b0] sm:$0xff]  ;;  %v2475_v26 = vld [vmem:[#allocation8 + $0x1b8] sm:$0xff]  ;;  %v2476_v11 = vld [vmem:[#allocation8 + $0x180] sm:$0xff] }
 0x3bc   :  { %v1696_v42 = vsel %vm1693_vm9, %v1695_v25, %v1691_v58  ;;  %v1719_v29 = vmul.f32 %v2349_v34, %v1677_v41  ;;  %vm1713_vm12 = vcmp.eq.f32.partialorder %v1712_v37, 8.507059e+37  ;;  %v2477_v25 = vld [vmem:[#allocation8 + $0x188] sm:$0xff]  ;;  %v2478_v52 = vld [vmem:[#allocation8 + $0x190] sm:$0xff]  ;;  %v2479_v34 = vld [vmem:[#allocation8 + $0x198] sm:$0xff] }
 0x3bd   :  { %v1718_v60 = vmul.f32 %v1696_v42, %v3735_v9  ;;  %v1706_v61 = vmul.f32 %v2347_v30, %v1705_v1  ;;  %v2464_v9 = vld [vmem:[#allocation8 + $0x1e0] sm:$0xff]  ;;  %v2481_v58 = vld [vmem:[#allocation8 + $0x168] sm:$0xff]  ;;  %v2482_v1 = vld [vmem:[#allocation8 + $0x170] sm:$0xff] }
 0x3be   :  { %v2480_v41 = vld [vmem:[#allocation8 + $0x160] sm:$0xff]  ;;  %v2483_v42 = vld [vmem:[#allocation8 + $0x178] sm:$0xff]  ;;  %v2489_v37 = vld [vmem:[#allocation8 + $0x128] sm:$0xff] }
 0x3bf   :  { %v3863_v49 = vadd.f32 %v1719_v29, %v1718_v60  ;;  %v1707_v55 = vadd.f32 %v2347_v30, %v1706_v61  ;;  %v2484_v29 = vld [vmem:[#allocation8 + $0x140] sm:$0xff]  ;;  %v2485_v60 = vld [vmem:[#allocation8 + $0x148] sm:$0xff]  ;;  %v2486_v61 = vld [vmem:[#allocation8 + $0x150] sm:$0xff] }
 0x3c1   :  { %2350 = vtanh.f32 %v3863_v49  ;;  %v1711_v38 = vsel %vm1710_vm11, %v2347_v30, %v1707_v55  ;;  %v2472_v30 = vld [vmem:[#allocation8 + $0x1a0] sm:$0xff]  ;;  %v2487_v55 = vld [vmem:[#allocation8 + $0x158] sm:$0xff] }
 0x3c2   :  { %v1716_v10 = vsel %vm1713_vm12, %v1715_v53, %v1711_v38  ;;  %v2490_v38 = vld [vmem:[#allocation8 + $0x130] sm:$0xff]  ;;  %v2491_v53 = vld [vmem:[#allocation8 + $0x138] sm:$0xff] }
 0x3c7   :  { %v2351_v6 = vpop.eup %2350 }
 0x3c8   :  { %v1722_v54 = vmul.f32 %v2351_v6, %v1716_v10  ;;  %v2492_v6 = vld [vmem:[#allocation8 + $0x100] sm:$0xff]  ;;  %v2493_v10 = vld [vmem:[#allocation8 + $0x108] sm:$0xff] }
 0x3ca   :  { %1743 = vmatmul.f32.vlgmr.msra.gmra.mxu0 %v1722_v54  ;;  %1763 = vmatmul.f32.vlgmr.msra.gmra.mxu1 %v1722_v54 }
 0x3cb   :  { %1783 = vmatmul.f32.vlgmr.msra.gmra.mxu2 %v1722_v54  ;;  %1803 = vmatmul.f32.vlgmr.msra.gmra.mxu3 %v1722_v54  ;;  %v2494_v54 = vld [vmem:[#allocation8 + $0x110] sm:$0xff] }
 0x3cc   :  { %2029 = vmatpush.msra.mxu0 %v2464_v9  ;;  %2049 = vmatpush.msra.mxu1 %v2465_v35  ;;  %v2495_v9 = vld [vmem:[#allocation8 + $0x118] sm:$0xff]  ;;  %v2496_v35 = vld [vmem:[#allocation8 + $0xe0] sm:$0xff] }
 0x3cd   :  { %2069 = vmatpush.msra.mxu2 %v2466_v15  ;;  %2089 = vmatpush.msra.mxu3 %v2467_v16  ;;  %v2497_v15 = vld [vmem:[#allocation8 + $0xe8] sm:$0xff]  ;;  %v2498_v16 = vld [vmem:[#allocation8 + $0xf0] sm:$0xff] }
 0x3ce   :  { %2030 = vmatpush.msra.mxu0 %v2468_v27  ;;  %2050 = vmatpush.msra.mxu1 %v2469_v17  ;;  %v2499_v27 = vld [vmem:[#allocation8 + $0xf8] sm:$0xff]  ;;  %v2500_v17 = vld [vmem:[#allocation8 + $0xc0] sm:$0xff] }
 0x3cf   :  { %2070 = vmatpush.msra.mxu2 %v2470_v20  ;;  %2090 = vmatpush.msra.mxu3 %v2471_v62  ;;  %v2501_v20 = vld [vmem:[#allocation8 + $0xc8] sm:$0xff]  ;;  %v2502_v62 = vld [vmem:[#allocation8 + $0xd0] sm:$0xff] }
 0x3d0   :  { %2031 = vmatpush.msra.mxu0 %v2472_v30  ;;  %2051 = vmatpush.msra.mxu1 %v2473_v56  ;;  %v2503_v30 = vld [vmem:[#allocation8 + $0xd8] sm:$0xff]  ;;  %v2504_v56 = vld [vmem:[#allocation8 + $0xa0] sm:$0xff] }
 0x3d1   :  { %2071 = vmatpush.msra.mxu2 %v2474_v33  ;;  %2091 = vmatpush.msra.mxu3 %v2475_v26  ;;  %v2505_v33 = vld [vmem:[#allocation8 + $0xa8] sm:$0xff]  ;;  %v2506_v26 = vld [vmem:[#allocation8 + $0xb0] sm:$0xff] }
 0x3d2   :  { %2032 = vmatpush.msra.mxu0 %v2476_v11  ;;  %2052 = vmatpush.msra.mxu1 %v2477_v25  ;;  %v2507_v11 = vld [vmem:[#allocation8 + $0xb8] sm:$0xff]  ;;  %v2508_v25 = vld [vmem:[#allocation8 + $0x80] sm:$0xff] }
 0x3d3   :  { %2072 = vmatpush.msra.mxu2 %v2478_v52  ;;  %2092 = vmatpush.msra.mxu3 %v2479_v34  ;;  %v2509_v52 = vld [vmem:[#allocation8 + $0x88] sm:$0xff]  ;;  %v2510_v34 = vld [vmem:[#allocation8 + $0x90] sm:$0xff] }
 0x3d4   :  { %2033 = vmatpush.msra.mxu0 %v2480_v41  ;;  %2053 = vmatpush.msra.mxu1 %v2481_v58  ;;  %v2511_v41 = vld [vmem:[#allocation8 + $0x98] sm:$0xff]  ;;  %v2512_v58 = vld [vmem:[#allocation8 + $0x60] sm:$0xff] }
 0x3d5   :  { %2073 = vmatpush.msra.mxu2 %v2482_v1  ;;  %2093 = vmatpush.msra.mxu3 %v2483_v42  ;;  %v2513_v1 = vld [vmem:[#allocation8 + $0x68] sm:$0xff]  ;;  %v2514_v42 = vld [vmem:[#allocation8 + $0x70] sm:$0xff] }
 0x3d6   :  { %2034 = vmatpush.msra.mxu0 %v2484_v29  ;;  %2054 = vmatpush.msra.mxu1 %v2485_v60  ;;  %v2515_v29 = vld [vmem:[#allocation8 + $0x78] sm:$0xff]  ;;  %v2516_v60 = vld [vmem:[#allocation8 + $0x40] sm:$0xff] }
 0x3d7   :  { %2074 = vmatpush.msra.mxu2 %v2486_v61  ;;  %2094 = vmatpush.msra.mxu3 %v2487_v55  ;;  %v2517_v61 = vld [vmem:[#allocation8 + $0x48] sm:$0xff]  ;;  %v2518_v55 = vld [vmem:[#allocation8 + $0x50] sm:$0xff] }
 0x3d8   :  { %2035 = vmatpush.msra.mxu0 %v2488_v57  ;;  %2055 = vmatpush.msra.mxu1 %v2489_v37  ;;  %v2519_v57 = vld [vmem:[#allocation8 + $0x58] sm:$0xff]  ;;  %v2520_v37 = vld [vmem:[#allocation8 + $0x20] sm:$0xff] }
 0x3d9   :  { %2075 = vmatpush.msra.mxu2 %v2490_v38  ;;  %2095 = vmatpush.msra.mxu3 %v2491_v53  ;;  %v2521_v38 = vld [vmem:[#allocation8 + $0x28] sm:$0xff]  ;;  %v2522_v53 = vld [vmem:[#allocation8 + $0x30] sm:$0xff] }
 0x3da   :  { %2036 = vmatpush.msra.mxu0 %v2492_v6  ;;  %2056 = vmatpush.msra.mxu1 %v2493_v10  ;;  %v2523_v6 = vld [vmem:[#allocation8 + $0x38] sm:$0xff]  ;;  %v2524_v10 = vld [vmem:[#allocation8] sm:$0xff] }
 0x3db   :  { %2076 = vmatpush.msra.mxu2 %v2494_v54  ;;  %2096 = vmatpush.msra.mxu3 %v2495_v9  ;;  %v2525_v54 = vld [vmem:[#allocation8 + $0x8] sm:$0xff]  ;;  %v2526_v9 = vld [vmem:[#allocation8 + $0x10] sm:$0xff] }
 0x3dc   :  { %2037 = vmatpush.msra.mxu0 %v2496_v35  ;;  %2057 = vmatpush.msra.mxu1 %v2497_v15  ;;  %v2527_v35 = vld [vmem:[#allocation8 + $0x18] sm:$0xff]  ;;  %v710_v15 = vrot.slane %v4551_v12, 4 }
 0x3dd   :  { %2077 = vmatpush.msra.mxu2 %v2498_v16  ;;  %2097 = vmatpush.msra.mxu3 %v2499_v27  ;;  %v724_v16 = vrot.slane %v4552_v4, 4  ;;  %v712_v27 = vrot.slane %v4553_v7, 3 }
 0x3de   :  { %2038 = vmatpush.msra.mxu0 %v2500_v17  ;;  %2058 = vmatpush.msra.mxu1 %v2501_v20  ;;  %v726_v17 = vrot.slane %v4554_v28, 3  ;;  %v709_v20 = vrot.slane %v4555_v8, 5 }
 0x3df   :  { %2078 = vmatpush.msra.mxu2 %v2502_v62  ;;  %2098 = vmatpush.msra.mxu3 %v2503_v30  ;;  %v714_v62 = vrot.slane %v4507_v5, 2  ;;  %v723_v30 = vrot.slane %v4556_v39, 5 }
 0x3e0   :  { %2039 = vmatpush.msra.mxu0 %v2504_v56  ;;  %2059 = vmatpush.msra.mxu1 %v2505_v33  ;;  %v728_v56 = vrot.slane %v4508_v14, 2  ;;  %v716_v33 = vrot.slane %v4562_v0, 1 }
 0x3e1   :  { %2079 = vmatpush.msra.mxu2 %v2506_v26  ;;  %2099 = vmatpush.msra.mxu3 %v2507_v11  ;;  %v730_v26 = vrot.slane %v4563_v50, 1  ;;  %v711_v11 = vsel %vm379_vm0, %v710_v15, %v709_v20 }
 0x3e2   :  { %2040 = vmatpush.msra.mxu0 %v2508_v25  ;;  %2060 = vmatpush.msra.mxu1 %v2509_v52  ;;  %v725_v25 = vsel %vm379_vm0, %v724_v16, %v723_v30  ;;  %v713_v52 = vsel %vm382_vm1, %v712_v27, %v711_v11 }
 0x3e3   :  { %2080 = vmatpush.msra.mxu2 %v2510_v34  ;;  %2100 = vmatpush.msra.mxu3 %v2511_v41  ;;  %v719_v34 = vrot.slane %v4558_v2, 7  ;;  %v727_v41 = vsel %vm382_vm1, %v726_v17, %v725_v25  ;;  %v758_v17 = vrot.slane %v3142_v51, 1 }
 0x3e4   :  { %2041 = vmatpush.msra.mxu0 %v2512_v58  ;;  %2061 = vmatpush.msra.mxu1 %v2513_v1  ;;  %v733_v58 = vrot.slane %v4559_v18, 7  ;;  %v715_v1 = vsel %vm385_vm2, %v714_v62, %v713_v52  ;;  %v763_v52 = vrot.slane %v3162_v44, 6 }
 0x3e5   :  { %2081 = vmatpush.msra.mxu2 %v2514_v42  ;;  %2101 = vmatpush.msra.mxu3 %v2515_v29  ;;  %v721_v42 = vrot.slane %v4560_v23, 6  ;;  %v729_v29 = vsel %vm385_vm2, %v728_v56, %v727_v41 }
 0x3e6   :  { %2042 = vmatpush.msra.mxu0 %v2516_v60  ;;  %2062 = vmatpush.msra.mxu1 %v2517_v61  ;;  %v735_v60 = vrot.slane %v4561_v40, 6  ;;  %v717_v61 = vsel %vm388_vm3, %v716_v33, %v715_v1  ;;  %v761_v33 = vrot.slane %v3153_v48, 7  ;;  %v737_v1 = vrot.slane %v4564_v21, 5 }
 0x3e7   :  { %2082 = vmatpush.msra.mxu2 %v2518_v55  ;;  %2102 = vmatpush.msra.mxu3 %v2519_v57  ;;  %v731_v55 = vsel %vm388_vm3, %v730_v26, %v729_v29  ;;  %v752_v57 = vrot.slane %v4406_v47, 4 }
 0x3e8   :  { %2043 = vmatpush.msra.mxu0 %v2520_v37  ;;  %2063 = vmatpush.msra.mxu1 %v2521_v38  ;;  %v718_v37 = vsel %vm391_vm4, %v4557_v24, %v717_v61  ;;  %v732_v38 = vsel %vm391_vm4, %v4504_v32, %v731_v55  ;;  %v740_v55 = vrot.slane %v4566_v19, 3 }
 0x3e9   :  { %2083 = vmatpush.msra.mxu2 %v2522_v53  ;;  %2103 = vmatpush.msra.mxu3 %v2523_v6  ;;  %v754_v53 = vrot.slane %v3130_v31, 3  ;;  %v720_v6 = vsel %vm394_vm5, %v719_v34, %v718_v37 }
 0x3ea   :  { %2044 = vmatpush.msra.mxu0 %v2524_v10  ;;  %2064 = vmatpush.msra.mxu1 %v2525_v54  ;;  %v734_v10 = vsel %vm394_vm5, %v733_v58, %v732_v38  ;;  %v751_v54 = vrot.slane %v3100_v13, 5 }
 0x3eb   :  { %2084 = vmatpush.msra.mxu2 %v2526_v9  ;;  %2104 = vmatpush.msra.mxu3 %v2527_v35  ;;  %v756_v9 = vrot.slane %v3136_v45, 2  ;;  %v722_v35 = vsel %vm397_vm6, %v721_v42, %v720_v6  ;;  %v736_v16 = vsel %vm397_vm6, %v735_v60, %v734_v10  ;;  %v738_v42 = vrot.slane %v4565_v22, 4 }
 0x3ec   :  { %v753_v30 = vsel %vm379_vm0, %v752_v57, %v751_v54  ;;  %v744_v54 = vrot.slane %v4571_v63, 1 }
 0x3ed   :  { %v755_v56 = vsel %vm382_vm1, %v754_v53, %v753_v30  ;;  %v739_v38 = vsel %vm379_vm0, %v738_v42, %v737_v1  ;;  %v742_v53 = vrot.slane %v4567_v36, 2 }
 0x3ee   :  { %v757_v25 = vsel %vm385_vm2, %v756_v9, %v755_v56 }
 0x3ef   :  { %v759_v34 = vsel %vm388_vm3, %v758_v17, %v757_v25 }
 0x3f0   :  { %v760_v41 = vsel %vm391_vm4, %v3148_v46, %v759_v34 }
 0x3f1   :  { %v762_v58 = vsel %vm394_vm5, %v761_v33, %v760_v41 }
 0x3f2   :  { %v764_v29 = vsel %vm397_vm6, %v763_v52, %v762_v58 }
 0x447   :  { %v1744_v15 = vpop.f32.mrf.mxu0  ;;  %v1764_v27 = vpop.f32.mrf.mxu1 }
 0x448   :  { %v1807_v20 = vadd.f32 %v1744_v15, %v722_v35  ;;  %v1808_v62 = vadd.f32 %v1764_v27, %v736_v16  ;;  %v741_v35 = vsel %vm382_vm1, %v740_v55, %v739_v38  ;;  %v747_v15 = vrot.slane %v4569_v43, 7 }
 0x449   :  { %v743_v16 = vsel %vm385_vm2, %v742_v53, %v741_v35  ;;  %v749_v27 = vrot.slane %v4570_v3, 6 }
 0x44a   :  { %v2251_v26 = vmul.f32 -1.442695, %v1807_v20  ;;  %v2252_v11 = vmul.f32 -1.442695, %v1808_v62  ;;  %v745_v17 = vsel %vm388_vm3, %v744_v54, %v743_v16 }
 0x44b   :  { %v746_v20 = vsel %vm391_vm4, %v4568_v59, %v745_v17 }
 0x44c   :  { %2352 = vpow2.f32 %v2251_v26  ;;  %v748_v56 = vsel %vm394_vm5, %v747_v15, %v746_v20 }
 0x44d   :  { %2354 = vpow2.f32 %v2252_v11  ;;  %v750_v33 = vsel %vm397_vm6, %v749_v27, %v748_v56 }
 0x44e   :  { %v1804_v60 = vpop.f32.mrf.mxu3  ;;  %v1784_v62 = vpop.f32.mrf.mxu2 }
 0x44f   :  { %v1810_v61 = vadd.f32 %v1804_v60, %v764_v29  ;;  %v1809_v25 = vadd.f32 %v1784_v62, %v750_v33 }
 0x451   :  { %v2253_v57 = vmul.f32 -1.442695, %v1810_v61 }
 0x452   :  { %v2353_v37 = vpop.eup %2352 }
 0x453   :  { %v2355_v6 = vpop.eup %2354  ;;  %v1814_v10 = vadd.f32 1.0, %v2353_v37  ;;  %2356 = vpow2.f32 %v2253_v57 }
 0x454   :  { %v1833_v9 = vadd.f32 1.0, %v2355_v6 }
 0x455   :  { %2358 = vrcp.f32 %v1814_v10  ;;  %v1826_v42 = vand.u32 2147483648, %v1814_v10  ;;  %v1824_v61 = vand.u32 2147483647, %v1814_v10  ;;  %vm1820_vm15 = vweird.f32 %v1814_v10 }
 0x456   :  { %2360 = vrcp.f32 %v1833_v9  ;;  %v1845_v29 = vand.u32 2147483648, %v1833_v9  ;;  %v1843_v57 = vand.u32 2147483647, %v1833_v9  ;;  %vm1839_vm7 = vweird.f32 %v1833_v9 }
 0x457   :  { %v1827_v53 = vor.u32 1.1754944e-38, %v1826_v42  ;;  %vm1825_vm10 = vcmp.eq.f32.partialorder %v1824_v61, 8.507059e+37  ;;  %v789_v42 = vrot.slane %v4552_v4, 5  ;;  %v779_v61 = vrot.slane %v4507_v5, 3 }
 0x458   :  { %v1846_v35 = vor.u32 1.1754944e-38, %v1845_v29  ;;  %vm1844_vm11 = vcmp.eq.f32.partialorder %v1843_v57, 8.507059e+37  ;;  %v777_v29 = vrot.slane %v4553_v7, 4  ;;  %v793_v57 = vrot.slane %v4508_v14, 3 }
 0x459   :  { %v2357_v30 = vpop.eup %2356 }
 0x45a   :  { %v1853_v26 = vadd.f32 1.0, %v2357_v30 }
 0x45b   :  { %v2359_v11 = vpop.eup %2358 }
 0x45c   :  { %v2361_v52 = vpop.eup %2360  ;;  %v1816_v34 = vmul.f32 %v2359_v11, %v1814_v10  ;;  %2362 = vrcp.f32 %v1853_v26  ;;  %vm1821_vm13 = vweird.f32 %v2359_v11 }
 0x45d   :  { %v1835_v41 = vmul.f32 %v2361_v52, %v1833_v9  ;;  %2364 = vtanh.f32 %v1809_v25  ;;  %vm1840_vm14 = vweird.f32 %v2361_v52  ;;  %vm1822_vm9 = vmor %vm1820_vm15, %vm1821_vm13  ;;  %v1865_v25 = vand.u32 2147483648, %v1853_v26 }
 0x45e   :  { %v1817_v58 = vsub.f32 1.0, %v1816_v34  ;;  %vm1841_vm8 = vmor %vm1839_vm7, %vm1840_vm14  ;;  %vm1859_vm13 = vweird.f32 %v1853_v26 }
 0x45f   :  { %v1836_v1 = vsub.f32 1.0, %v1835_v41  ;;  %v1866_v41 = vor.u32 1.1754944e-38, %v1865_v25 }
 0x460   :  { %v1818_v60 = vmul.f32 %v2359_v11, %v1817_v58 }
 0x461   :  { %v1837_v55 = vmul.f32 %v2361_v52, %v1836_v1 }
 0x462   :  { %v2363_v37 = vpop.eup %2362  ;;  %v1819_v38 = vadd.f32 %v2359_v11, %v1818_v60  ;;  %v791_v60 = vrot.slane %v4554_v28, 4 }
 0x463   :  { %v1838_v6 = vadd.f32 %v2361_v52, %v1837_v55  ;;  %v1855_v54 = vmul.f32 %v2363_v37, %v1853_v26  ;;  %v2365_v16 = vpop.eup %2364  ;;  %vm1860_vm12 = vweird.f32 %v2363_v37  ;;  %v788_v55 = vrot.slane %v4556_v39, 6 }
 0x464   :  { %v1823_v15 = vsel %vm1822_vm9, %v2359_v11, %v1819_v38  ;;  %v1863_v11 = vand.u32 2147483647, %v1853_v26  ;;  %vm1861_vm14 = vmor %vm1859_vm13, %vm1860_vm12  ;;  %v774_v26 = vrot.slane %v4555_v8, 6  ;;  %v795_v38 = vrot.slane %v4563_v50, 2 }
 0x465   :  { %v1828_v27 = vsel %vm1825_vm10, %v1827_v53, %v1823_v15  ;;  %v1842_v17 = vsel %vm1841_vm8, %v2361_v52, %v1838_v6  ;;  %v1856_v20 = vsub.f32 1.0, %v1855_v54  ;;  %v783_v6 = vrot.slane %v4557_v24, 1 }
 0x466   :  { %v1847_v62 = vsel %vm1844_vm11, %v1846_v35, %v1842_v17  ;;  %v1870_v30 = vmul.f32 %v2365_v16, %v1828_v27  ;;  %vm1864_vm15 = vcmp.eq.f32.partialorder %v1863_v11, 8.507059e+37  ;;  %v790_v54 = vsel %vm379_vm0, %v789_v42, %v788_v55 }
 0x467   :  { %v1869_v56 = vmul.f32 %v1847_v62, %v3863_v49  ;;  %v1857_v33 = vmul.f32 %v2363_v37, %v1856_v20  ;;  %v775_v49 = vrot.slane %v4551_v12, 5  ;;  %v797_v35 = vrot.slane %v4504_v32, 1 }
 0x468   :  { %v792_v16 = vsel %vm382_vm1, %v791_v60, %v790_v54  ;;  %v786_v17 = vrot.slane %v4560_v23, 7  ;;  %v800_v62 = vrot.slane %v4561_v40, 7  ;;  %v819_v11 = vrot.slane %v3130_v31, 4 }
 0x469   :  { %v3927_v10 = vadd.f32 %v1870_v30, %v1869_v56  ;;  %v1858_v9 = vadd.f32 %v2363_v37, %v1857_v33  ;;  %v776_v53 = vsel %vm379_vm0, %v775_v49, %v774_v26  ;;  %v794_v20 = vsel %vm385_vm2, %v793_v57, %v792_v16 }
 0x46a   :  { %v778_v15 = vsel %vm382_vm1, %v777_v29, %v776_v53  ;;  %v796_v56 = vsel %vm388_vm3, %v795_v38, %v794_v20  ;;  %v817_v33 = vrot.slane %v4406_v47, 5  ;;  %v823_v60 = vrot.slane %v3142_v51, 2 }
 0x46b   :  { %2366 = vtanh.f32 %v3927_v10  ;;  %v1862_v34 = vsel %vm1861_vm14, %v2363_v37, %v1858_v9  ;;  %v781_v37 = vrot.slane %v4562_v0, 2  ;;  %v780_v27 = vsel %vm385_vm2, %v779_v61, %v778_v15 }
 0x46c   :  { %v1867_v58 = vsel %vm1864_vm15, %v1866_v41, %v1862_v34  ;;  %v798_v25 = vsel %vm391_vm4, %v797_v35, %v796_v56  ;;  %v825_v57 = vrot.slane %v3148_v46, 1  ;;  %v828_v54 = vrot.slane %v3162_v44, 7 }
 0x46d   :  { %v782_v30 = vsel %vm388_vm3, %v781_v37, %v780_v27  ;;  %v799_v41 = vsel %vm394_vm5, %v4559_v18, %v798_v25  ;;  %v802_v27 = vrot.slane %v4564_v21, 6  ;;  %v805_v56 = vrot.slane %v4566_v19, 4 }
 0x46e   :  { %v784_v9 = vsel %vm391_vm4, %v783_v6, %v782_v30  ;;  %v801_v42 = vsel %vm397_vm6, %v800_v62, %v799_v41 }
 0x46f   :  { %v785_v34 = vsel %vm394_vm5, %v4558_v2, %v784_v9 }
 0x471   :  { %v2367_v52 = vpop.eup %2366 }
 0x472   :  { %v1873_v1 = vmul.f32 %v2367_v52, %v1867_v58  ;;  %v816_v52 = vrot.slane %v3100_v13, 6  ;;  %v821_v58 = vrot.slane %v3136_v45, 3 }
 0x474   :  { %1894 = vmatmul.f32.vlgmr.msrb.gmra.mxu0 %v1873_v1  ;;  %1914 = vmatmul.f32.vlgmr.msrb.gmra.mxu1 %v1873_v1  ;;  %v818_v55 = vsel %vm379_vm0, %v817_v33, %v816_v52  ;;  %v809_v52 = vrot.slane %v4571_v63, 2 }
 0x475   :  { %1934 = vmatmul.f32.vlgmr.msrb.gmra.mxu2 %v1873_v1  ;;  %1954 = vmatmul.f32.vlgmr.msrb.gmra.mxu3 %v1873_v1  ;;  %v787_v1 = vsel %vm397_vm6, %v786_v17, %v785_v34  ;;  %v820_v37 = vsel %vm382_vm1, %v819_v11, %v818_v55  ;;  %v803_v17 = vrot.slane %v4565_v22, 5  ;;  %v807_v11 = vrot.slane %v4567_v36, 3 }
 0x476   :  { %v822_v6 = vsel %vm385_vm2, %v821_v58, %v820_v37 }
 0x477   :  { %v824_v35 = vsel %vm388_vm3, %v823_v60, %v822_v6  ;;  %v804_v25 = vsel %vm379_vm0, %v803_v17, %v802_v27 }
 0x478   :  { %v826_v15 = vsel %vm391_vm4, %v825_v57, %v824_v35 }
 0x479   :  { %v827_v16 = vsel %vm394_vm5, %v3153_v48, %v826_v15 }
 0x47a   :  { %v829_v20 = vsel %vm397_vm6, %v828_v54, %v827_v16 }
 0x4f1   :  { %v1895_v49 = vpop.f32.mrf.mxu0  ;;  %v1915_v29 = vpop.f32.mrf.mxu1 }
 0x4f2   :  { %v1958_v26 = vadd.f32 %v1895_v49, %v787_v1  ;;  %v1959_v61 = vadd.f32 %v1915_v29, %v801_v42  ;;  %v811_v1 = vrot.slane %v4568_v59, 1  ;;  %v806_v49 = vsel %vm382_vm1, %v805_v56, %v804_v25 }
 0x4f3   :  { %v808_v42 = vsel %vm385_vm2, %v807_v11, %v806_v49  ;;  %v814_v29 = vrot.slane %v4570_v3, 7 }
 0x4f4   :  { %v2254_v38 = vmul.f32 -1.442695, %v1958_v26  ;;  %v2255_v53 = vmul.f32 -1.442695, %v1959_v61  ;;  %v810_v60 = vsel %vm388_vm3, %v809_v52, %v808_v42 }
 0x4f5   :  { %v812_v26 = vsel %vm391_vm4, %v811_v1, %v810_v60 }
 0x4f6   :  { %2368 = vpow2.f32 %v2254_v38  ;;  %v813_v57 = vsel %vm394_vm5, %v4569_v43, %v812_v26 }
 0x4f7   :  { %2370 = vpow2.f32 %v2255_v53  ;;  %v815_v37 = vsel %vm397_vm6, %v814_v29, %v813_v57 }
 0x4f8   :  { %v1955_v62 = vpop.f32.mrf.mxu3  ;;  %v1935_v61 = vpop.f32.mrf.mxu2 }
 0x4f9   :  { %v1961_v30 = vadd.f32 %v1955_v62, %v829_v20  ;;  %v1960_v6 = vadd.f32 %v1935_v61, %v815_v37 }
 0x4fb   :  { %v2256_v33 = vmul.f32 -1.442695, %v1961_v30 }
 0x4fc   :  { %v2369_v9 = vpop.eup %2368 }
 0x4fd   :  { %v2371_v34 = vpop.eup %2370  ;;  %v1965_v41 = vadd.f32 1.0, %v2369_v9  ;;  %2372 = vpow2.f32 %v2256_v33 }
 0x4fe   :  { %v1984_v58 = vadd.f32 1.0, %v2371_v34 }
 0x4ff   :  { %2374 = vrcp.f32 %v1965_v41  ;;  %v1977_v17 = vand.u32 2147483648, %v1965_v41  ;;  %v1975_v30 = vand.u32 2147483647, %v1965_v41  ;;  %vm1971_vm8 = vweird.f32 %v1965_v41 }
 0x500   :  { %2376 = vrcp.f32 %v1984_v58  ;;  %v1996_v20 = vand.u32 2147483648, %v1984_v58  ;;  %v1994_v33 = vand.u32 2147483647, %v1984_v58  ;;  %vm1990_vm10 = vweird.f32 %v1984_v58 }
 0x501   :  { %v1978_v11 = vor.u32 1.1754944e-38, %v1977_v17  ;;  %vm1976_vm13 = vcmp.eq.f32.partialorder %v1975_v30, 8.507059e+37  ;;  %v854_v17 = vrot.slane %v4552_v4, 6  ;;  %v844_v30 = vrot.slane %v4507_v5, 4 }
 0x502   :  { %v1997_v1 = vor.u32 1.1754944e-38, %v1996_v20  ;;  %vm1995_vm14 = vcmp.eq.f32.partialorder %v1994_v33, 8.507059e+37  ;;  %v842_v20 = vrot.slane %v4553_v7, 5  ;;  %v858_v33 = vrot.slane %v4508_v14, 4 }
 0x503   :  { %v2373_v55 = vpop.eup %2372  ;;  %v848_v4 = vrot.slane %v4557_v24, 2  ;;  %v850_v5 = vrot.slane %v4558_v2, 1  ;;  %v864_v14 = vrot.slane %v4559_v18, 1  ;;  %v884_v2 = vrot.slane %v3130_v31, 5 }
 0x504   :  { %v2004_v38 = vadd.f32 1.0, %v2373_v55 }
 0x505   :  { %v2375_v53 = vpop.eup %2374 }
 0x506   :  { %v2377_v54 = vpop.eup %2376  ;;  %v1967_v35 = vmul.f32 %v2375_v53, %v1965_v41  ;;  %2378 = vrcp.f32 %v2004_v38  ;;  %vm1972_vm7 = vweird.f32 %v2375_v53 }
 0x507   :  { %v1986_v15 = vmul.f32 %v2377_v54, %v1984_v58  ;;  %2380 = vtanh.f32 %v1960_v6  ;;  %vm1991_vm9 = vweird.f32 %v2377_v54  ;;  %vm1973_vm11 = vmor %vm1971_vm8, %vm1972_vm7  ;;  %v2016_v6 = vand.u32 2147483648, %v2004_v38 }
 0x508   :  { %v1968_v16 = vsub.f32 1.0, %v1967_v35  ;;  %vm1992_vm12 = vmor %vm1990_vm10, %vm1991_vm9  ;;  %vm2010_vm7 = vweird.f32 %v2004_v38 }
 0x509   :  { %v1987_v27 = vsub.f32 1.0, %v1986_v15  ;;  %v2017_v15 = vor.u32 1.1754944e-38, %v2016_v6 }
 0x50a   :  { %v1969_v62 = vmul.f32 %v2375_v53, %v1968_v16 }
 0x50b   :  { %v1988_v56 = vmul.f32 %v2377_v54, %v1987_v27 }
 0x50c   :  { %v2379_v9 = vpop.eup %2378  ;;  %v1970_v25 = vadd.f32 %v2375_v53, %v1969_v62  ;;  %v856_v62 = vrot.slane %v4554_v28, 5  ;;  %v862_v28 = vrot.slane %v4504_v32, 2 }
 0x50d   :  { %v1989_v34 = vadd.f32 %v2377_v54, %v1988_v56  ;;  %v2006_v52 = vmul.f32 %v2379_v9, %v2004_v38  ;;  %v2381_v42 = vpop.eup %2380  ;;  %vm2011_vm15 = vweird.f32 %v2379_v9  ;;  %v853_v56 = vrot.slane %v4556_v39, 7 }
 0x50e   :  { %v1974_v49 = vsel %vm1973_vm11, %v2375_v53, %v1970_v25  ;;  %v2014_v53 = vand.u32 2147483647, %v2004_v38  ;;  %vm2012_vm9 = vmor %vm2010_vm7, %vm2011_vm15  ;;  %v839_v38 = vrot.slane %v4555_v8, 7  ;;  %v860_v25 = vrot.slane %v4563_v50, 3 }
 0x50f   :  { %v1979_v29 = vsel %vm1976_vm13, %v1978_v11, %v1974_v49  ;;  %v1993_v60 = vsel %vm1992_vm12, %v2377_v54, %v1989_v34  ;;  %v2007_v26 = vsub.f32 1.0, %v2006_v52  ;;  %v855_v7 = vsel %vm379_vm0, %v854_v17, %v853_v56  ;;  %v2188_v17 = vld [vmem:[#allocation11 + $0x60] sm:$0xff] }
 0x510   :  { %v1998_v61 = vsel %vm1995_vm14, %v1997_v1, %v1993_v60  ;;  %v2021_v55 = vmul.f32 %v2381_v42, %v1979_v29  ;;  %vm2015_vm8 = vcmp.eq.f32.partialorder %v2014_v53, 8.507059e+37  ;;  %v857_v39 = vsel %vm382_vm1, %v856_v62, %v855_v7 }
 0x511   :  { %v2020_v57 = vmul.f32 %v1998_v61, %v3927_v10  ;;  %v2008_v37 = vmul.f32 %v2379_v9, %v2007_v26  ;;  %v840_v10 = vrot.slane %v4551_v12, 6  ;;  %v859_v50 = vsel %vm385_vm2, %v858_v33, %v857_v39 }
 0x512   :  { %v861_v24 = vsel %vm388_vm3, %v860_v25, %v859_v50  ;;  %v882_v34 = vrot.slane %v4406_v47, 6  ;;  %v881_v49 = vrot.slane %v3100_v13, 7  ;;  %v886_v42 = vrot.slane %v3136_v45, 4 }
 0x513   :  { %v3991_v41 = vadd.f32 %v2021_v55, %v2020_v57  ;;  %v2009_v58 = vadd.f32 %v2379_v9, %v2008_v37  ;;  %v841_v12 = vsel %vm379_vm0, %v840_v10, %v839_v38  ;;  %v863_v52 = vsel %vm391_vm4, %v862_v28, %v861_v24  ;;  %v2187_v38 = vld [vmem:[#allocation11 + $0x58] sm:$0xff]  ;;  %v2184_v28 = vld [vmem:[#allocation11 + $0x40] sm:$0xff]  ;;  %v2182_v24 = vld [vmem:[#allocation11 + $0x30] sm:$0xff] }
 0x514   :  { %v843_v8 = vsel %vm382_vm1, %v842_v20, %v841_v12  ;;  %v865_v18 = vsel %vm394_vm5, %v864_v14, %v863_v52  ;;  %v888_v61 = vrot.slane %v3142_v51, 3  ;;  %v883_v57 = vsel %vm379_vm0, %v882_v34, %v881_v49  ;;  %v2183_v14 = vld [vmem:[#allocation11 + $0x38] sm:$0xff]  ;;  %v2180_v49 = vld [vmem:[#allocation11 + $0x20] sm:$0xff] }
 0x515   :  { %2382 = vtanh.f32 %v3991_v41  ;;  %v2013_v35 = vsel %vm2012_vm9, %v2379_v9, %v2009_v58  ;;  %v846_v9 = vrot.slane %v4562_v0, 3  ;;  %v845_v0 = vsel %vm385_vm2, %v844_v30, %v843_v8 }
 0x516   :  { %v2018_v16 = vsel %vm2015_vm8, %v2017_v15, %v2013_v35  ;;  %v866_v47 = vsel %vm397_vm6, %v4561_v40, %v865_v18  ;;  %v890_v37 = vrot.slane %v3148_v46, 2  ;;  %v885_v13 = vsel %vm382_vm1, %v884_v2, %v883_v57  ;;  %v2191_v40 = vld [vmem:[#allocation11 + $0x78] sm:$0xff]  ;;  %v2190_v35 = vld [vmem:[#allocation11 + $0x70] sm:$0xff]  ;;  %v2189_v46 = vld [vmem:[#allocation11 + $0x68] sm:$0xff] }
 0x517   :  { %v847_v11 = vsel %vm388_vm3, %v846_v9, %v845_v0  ;;  %v892_v45 = vrot.slane %v3153_v48, 1  ;;  %2196 = vmatpush.msrb.mxu0 %v2191_v40  ;;  %v868_v48 = vrot.slane %v4565_v22, 6  ;;  %v870_v20 = vrot.slane %v4566_v19, 5  ;;  %v2186_v9 = vld [vmem:[#allocation11 + $0x50] sm:$0xff]  ;;  %v2181_v2 = vld [vmem:[#allocation11 + $0x28] sm:$0xff] }
 0x518   :  { %v849_v32 = vsel %vm391_vm4, %v848_v4, %v847_v11  ;;  %v872_v33 = vrot.slane %v4567_v36, 4  ;;  %v876_v12 = vrot.slane %v4568_v59, 2  ;;  %v878_v4 = vrot.slane %v4569_v43, 1  ;;  %v2185_v36 = vld [vmem:[#allocation11 + $0x48] sm:$0xff] }
 0x519   :  { %v851_v1 = vsel %vm394_vm5, %v850_v5, %v849_v32  ;;  %2197 = vmatpush.msrb.mxu0 %v2190_v35 }
 0x51a   :  { %v852_v29 = vsel %vm397_vm6, %v4560_v23, %v851_v1  ;;  %v887_v23 = vsel %vm385_vm2, %v886_v42, %v885_v13 }
 0x51b   :  { %v2383_v54 = vpop.eup %2382  ;;  %v889_v53 = vsel %vm388_vm3, %v888_v61, %v887_v23  ;;  %2198 = vmatpush.msrb.mxu0 %v2189_v46  ;;  %v2179_v61 = vld [vmem:[#allocation11 + $0x18] sm:$0xff] }
 0x51c   :  { %v2024_v27 = vmul.f32 %v2383_v54, %v2018_v16  ;;  %v891_v51 = vsel %vm391_vm4, %v890_v37, %v889_v53  ;;  %v867_v54 = vrot.slane %v4564_v21, 7 }
 0x51d   :  { %v893_v15 = vsel %vm394_vm5, %v892_v45, %v891_v51  ;;  %2199 = vmatpush.msrb.mxu0 %v2188_v17  ;;  %v2178_v45 = vld [vmem:[#allocation11 + $0x10] sm:$0xff]  ;;  %v2177_v51 = vld [vmem:[#allocation11 + $0x8] sm:$0xff] }
 0x51e   :  { %2045 = vmatmul.f32.vlgmr.msra.gmra.mxu0 %v2024_v27  ;;  %2065 = vmatmul.f32.vlgmr.msra.gmra.mxu1 %v2024_v27  ;;  %v894_v16 = vsel %vm397_vm6, %v3162_v44, %v893_v15  ;;  %v869_v56 = vsel %vm379_vm0, %v868_v48, %v867_v54  ;;  %v874_v44 = vrot.slane %v4571_v63, 3  ;;  %v2176_v48 = vld [vmem:[#allocation11] sm:$0xff] }
 0x51f   :  { %2085 = vmatmul.f32.vlgmr.msra.gmra.mxu2 %v2024_v27  ;;  %2105 = vmatmul.f32.vlgmr.msra.gmra.mxu3 %v2024_v27  ;;  %v871_v19 = vsel %vm382_vm1, %v870_v20, %v869_v56 }
 0x520   :  { %2200 = vmatpush.msrb.mxu0 %v2187_v38  ;;  %v873_v7 = vsel %vm385_vm2, %v872_v33, %v871_v19  ;;  %v2271_v33 = vld [vmem:[%s4087_s5] ss:$0 sm:$0xff] }
 0x521   :  { %v875_v63 = vsel %vm388_vm3, %v874_v44, %v873_v7 }
 0x522   :  { %2201 = vmatpush.msrb.mxu0 %v2186_v9  ;;  %v877_v8 = vsel %vm391_vm4, %v876_v12, %v875_v63 }
 0x523   :  { %v879_v39 = vsel %vm394_vm5, %v878_v4, %v877_v8 }
 0x524   :  { %2202 = vmatpush.msrb.mxu0 %v2185_v36  ;;  %v880_v43 = vsel %vm397_vm6, %v4570_v3, %v879_v39 }
 0x526   :  { %2203 = vmatpush.msrb.mxu0 %v2184_v28 }
 0x528   :  { %2204 = vmatpush.msrb.mxu0 %v2183_v14 }
 0x52a   :  { %2205 = vmatpush.msrb.mxu0 %v2182_v24 }
 0x52c   :  { %2206 = vmatpush.msrb.mxu0 %v2181_v2 }
 0x52e   :  { %2207 = vmatpush.msrb.mxu0 %v2180_v49 }
 0x530   :  { %2208 = vmatpush.msrb.mxu0 %v2179_v61 }
 0x532   :  { %2209 = vmatpush.msrb.mxu0 %v2178_v45 }
 0x534   :  { %2210 = vmatpush.msrb.mxu0 %v2177_v51 }
 0x536   :  { %2211 = vmatpush.msrb.mxu0 %v2176_v48 }
 0x59b   :  { %v2046_v60 = vpop.f32.mrf.mxu0  ;;  %v2066_v26 = vpop.f32.mrf.mxu1 }
 0x59c   :  { %v2109_v55 = vadd.f32 %v2046_v60, %v852_v29  ;;  %v2110_v31 = vadd.f32 %v2066_v26, %v866_v47 }
 0x59e   :  { %v2257_v58 = vmul.f32 -1.442695, %v2109_v55  ;;  %v2258_v6 = vmul.f32 -1.442695, %v2110_v31 }
 0x5a0   :  { %2384 = vpow2.f32 %v2257_v58 }
 0x5a1   :  { %2386 = vpow2.f32 %v2258_v6 }
 0x5a2   :  { %v2106_v27 = vpop.f32.mrf.mxu3  ;;  %v2086_v5 = vpop.f32.mrf.mxu2 }
 0x5a3   :  { %v2112_v10 = vadd.f32 %v2106_v27, %v894_v16  ;;  %v2111_v11 = vadd.f32 %v2086_v5, %v880_v43 }
 0x5a5   :  { %v2259_v62 = vmul.f32 -1.442695, %v2112_v10 }
 0x5a6   :  { %v2385_v30 = vpop.eup %2384 }
 0x5a7   :  { %v2387_v21 = vpop.eup %2386  ;;  %v4044_v22 = vadd.f32 1.0, %v2385_v30  ;;  %2388 = vpow2.f32 %v2259_v62 }
 0x5a8   :  { %v4047_v25 = vadd.f32 1.0, %v2387_v21 }
 0x5a9   :  { %2390 = vrcp.f32 %v4044_v22  ;;  %v2128_v3 = vand.u32 2147483648, %v4044_v22  ;;  %v2126_v60 = vand.u32 2147483647, %v4044_v22  ;;  %vm2122_vm2 = vweird.f32 %v4044_v22 }
 0x5aa   :  { %2392 = vrcp.f32 %v4047_v25  ;;  %v2147_v42 = vand.u32 2147483648, %v4047_v25  ;;  %v2145_v26 = vand.u32 2147483647, %v4047_v25  ;;  %vm2141_vm3 = vweird.f32 %v4047_v25 }
 0x5ab   :  { %v2129_v57 = vor.u32 1.1754944e-38, %v2128_v3  ;;  %vm2127_vm6 = vcmp.eq.f32.partialorder %v2126_v60, 8.507059e+37 }
 0x5ac   :  { %v2148_v58 = vor.u32 1.1754944e-38, %v2147_v42  ;;  %vm2146_vm10 = vcmp.eq.f32.partialorder %v2145_v26, 8.507059e+37 }
 0x5ad   :  { %v2389_v59 = vpop.eup %2388 }
 0x5ae   :  { %v4060_v0 = vadd.f32 1.0, %v2389_v59 }
 0x5af   :  { %v2391_v50 = vpop.eup %2390 }
 0x5b0   :  { %v2393_v34 = vpop.eup %2392  ;;  %v2118_v32 = vmul.f32 %v2391_v50, %v4044_v22  ;;  %2394 = vrcp.f32 %v4060_v0  ;;  %vm2123_vm0 = vweird.f32 %v2391_v50  ;;  %v2167_v17 = vand.u32 2147483648, %v4060_v0 }
 0x5b1   :  { %v2137_v52 = vmul.f32 %v2393_v34, %v4047_v25  ;;  %2396 = vtanh.f32 %v2111_v11  ;;  %vm2142_vm1 = vweird.f32 %v2393_v34  ;;  %vm2124_vm4 = vmor %vm2122_vm2, %vm2123_vm0  ;;  %vm2161_vm12 = vweird.f32 %v4060_v0 }
 0x5b2   :  { %v2119_v1 = vsub.f32 1.0, %v2118_v32  ;;  %vm2143_vm5 = vmor %vm2141_vm3, %vm2142_vm1  ;;  %v2165_v20 = vand.u32 2147483647, %v4060_v0  ;;  %v2168_v38 = vor.u32 1.1754944e-38, %v2167_v17 }
 0x5b3   :  { %v2138_v18 = vsub.f32 1.0, %v2137_v52 }
 0x5b4   :  { %v2120_v29 = vmul.f32 %v2391_v50, %v2119_v1  ;;  %vm2166_vm14 = vcmp.eq.f32.partialorder %v2165_v20, 8.507059e+37 }
 0x5b5   :  { %v2139_v47 = vmul.f32 %v2393_v34, %v2138_v18 }
 0x5b6   :  { %v2395_v55 = vpop.eup %2394  ;;  %v2121_v31 = vadd.f32 %v2391_v50, %v2120_v29 }
 0x5b7   :  { %v2140_v37 = vadd.f32 %v2393_v34, %v2139_v47  ;;  %v2157_v13 = vmul.f32 %v2395_v55, %v4060_v0  ;;  %v2397_v23 = vpop.eup %2396  ;;  %vm2162_vm11 = vweird.f32 %v2395_v55 }
 0x5b8   :  { %v2125_v6 = vsel %vm2124_vm4, %v2391_v50, %v2121_v31  ;;  %vm2163_vm13 = vmor %vm2161_vm12, %vm2162_vm11 }
 0x5b9   :  { %v2130_v53 = vsel %vm2127_vm6, %v2129_v57, %v2125_v6  ;;  %v2144_v40 = vsel %vm2143_vm5, %v2393_v34, %v2140_v37  ;;  %v2158_v35 = vsub.f32 1.0, %v2157_v13 }
 0x5ba   :  { %v2149_v15 = vsel %vm2146_vm10, %v2148_v58, %v2144_v40  ;;  %v2172_v46 = vmul.f32 %v2397_v23, %v2130_v53 }
 0x5bb   :  { %v2171_v54 = vmul.f32 %v2149_v15, %v3991_v41  ;;  %v2159_v16 = vmul.f32 %v2395_v55, %v2158_v35 }
 0x5bd   :  { %v2173_v27 = vadd.f32 %v2172_v46, %v2171_v54  ;;  %v2160_v10 = vadd.f32 %v2395_v55, %v2159_v16 }
 0x5bf   :  { %2398 = vtanh.f32 %v2173_v27  ;;  %v2164_v62 = vsel %vm2163_vm13, %v2395_v55, %v2160_v10 }
 0x5c0   :  { %v2169_v41 = vsel %vm2166_vm14, %v2168_v38, %v2164_v62 }
 0x5c5   :  { %v2399_v30 = vpop.eup %2398 }
 0x5c6   :  { %v2175_v56 = vmul.f32 %v2399_v30, %v2169_v41 }
 0x5c8   :  { %2212 = vmatmul.f32.vlgmr.msrb.gmra.mxu0 %v2175_v56 }
 0x645   :  { %v2213_v21 = vpop.f32.mrf.mxu0 }
 0x646   :  { %v2214_v22 = vadd.f32 %v2271_v33, %v2213_v21 }
 0x648   :  { %2216 = vst [vmem:[#allocation12] sm:$0xff] %v2214_v22 }
 0x649   :  { %2227 = dma.vmem_to_hbm [thread:$0]  %s2223_s24, 128, %s2225_s27, [#allocation5]  }
 0x64a   :  { %2678 = dma.done.wait [#allocation5], 128  }
 0x64b   :  { %2679 = vsyncadd [#allocation5], 4294967168 }
 0x64c   :  { %2232 = vsyncpa [#allocation4], 1 }
 0x64d   :  { %2233 = vsyncpa [#allocation7], 1 }
 0x64e   :  { %2234 = vsyncpa [#allocation10], 1 }
 0x64f   :  { %2235 = vsyncpa [#allocation5], 1 }

</bundles_post_ra>
